<compile_context>
chip_gen: v7x
topology: tpu7x:2x2x1
jax: 0.10.0
libtpu: 0.0.40
codegen_flags: <defaults>
</compile_context>

<pallas_src>
import functools
import numpy as np
import jax
import jax.numpy as jnp
from jax.experimental import pallas as pl
from jax.experimental.pallas import tpu as pltpu

# ----------------------------- small config ---------------------------------
NMODES = 2        # polarisations
M_TOTAL = 21      # taps fed to the combined equalizer
M_PBC = 11        # EqAMPBC window
RHO = 1.0
M_NN = 15         # EqCNNBiLSTM window
K_CONV = 4        # conv kernel size
CHANNELS = 16     # conv output channels
HIDDEN = 16       # LSTM hidden size per direction
T_SEQ = M_NN - K_CONV + 1

SEGW = 128        # lane width of each constant-slab segment (tile aligned)
# segment order inside the constant slab (rows <= 16, lanes <= 128 each):
#   0:wc  1:wih_f  2:wih_b  3:whh_f  4:whh_b  5:gcat(+pad row)  6:ccat
#   7:bc  8:bf  9:bb  10:bd
N_SEG = 11


# ------------------------------ PBC index set --------------------------------
def pbc_index(M, rho):
    h = M // 2
    idx = []
    for m in range(-h, h + 1):
        for n in range(m, h + 1):
            if abs(m * n) <= rho * h and abs(m + n) <= h:
                idx.append((m, n))
    return idx


def build_gather_matrix(idx, m_pbc):
    """One-hot gather matrix [Mp, 3L]: columns [0,L) pick tap h+m, [L,2L) pick
    tap h+n, [2L,3L) pick tap h+m+n.  Gather becomes a single tiny matmul."""
    h = m_pbc // 2
    L = len(idx)
    g = np.zeros((m_pbc, 3 * L), np.float32)
    for l, (m, n) in enumerate(idx):
        g[h + m, l] = 1.0
        g[h + n, L + l] = 1.0
        g[h + m + n, 2 * L + l] = 1.0
    return jnp.asarray(g)


# --------------------------- fused Pallas kernel ------------------------------
def _fused_kernel(xpbc_ref, xnn_ref, wslab_ref, wd_ref, out_ref, hbuf_ref,
                  *, blk_b, nmodes, m_pbc, n_trip, t_seq, k_conv,
                  channels, hidden):
    L = n_trip
    h_tap = m_pbc // 2
    cin = 2 * nmodes
    n_grp = 2 * nmodes                      # (re,pol0),(re,pol1),(im,pol0),(im,pol1)
    H = hidden
    TH = t_seq * hidden
    BB = blk_b

    def seg(i, rows, width):
        return wslab_ref[0:rows, i * SEGW: i * SEGW + width]

    # ---- loop-invariant constants (128-aligned, sliced once) ----
    wc    = seg(0, k_conv * cin, channels)          # [K*Cin, CH]
    wih_f = seg(1, channels, 4 * H)                 # gate order (i,f,o,g)
    wih_b = seg(2, channels, 4 * H)
    whh_f = seg(3, H, 4 * H)
    whh_b = seg(4, H, 4 * H)
    gcat  = seg(5, m_pbc + 1, 3 * L)                # last row = 0 (power lane pad)
    c_r   = wslab_ref[0:1, 6 * SEGW: 6 * SEGW + L]
    c_i   = wslab_ref[1:2, 6 * SEGW: 6 * SEGW + L]
    bc    = wslab_ref[0:1, 7 * SEGW: 7 * SEGW + channels]
    bf    = wslab_ref[0:1, 8 * SEGW: 8 * SEGW + 4 * H]
    bb    = wslab_ref[0:1, 9 * SEGW: 9 * SEGW + 4 * H]
    bd    = wslab_ref[0:1, 10 * SEGW: 10 * SEGW + 2 * nmodes]

    # =================== EqAMPBC (first-order perturbation) ===================
    # xpbc: [2*Nm, BB, Mp+1]; rows (after merge) = group*BB + b; lane Mp holds
    # the per-window launch power (zeroed out of the gather matmul by gcat's
    # pad row).
    xall = xpbc_ref[...].reshape(n_grp * BB, m_pbc + 1)
    power = xall[0:BB, m_pbc:m_pbc + 1]                               # [BB, 1]
    gall = jnp.dot(xall, gcat, preferred_element_type=jnp.float32)    # [4BB, 3L]
    gr = gall[0:nmodes * BB]                                          # re, pol-major
    gi = gall[nmodes * BB:2 * nmodes * BB]                            # im, pol-major
    gm_r, gn_r, gs_r = gr[:, :L], gr[:, L:2 * L], gr[:, 2 * L:3 * L]
    gm_i, gn_i, gs_i = gi[:, :L], gi[:, L:2 * L], gi[:, 2 * L:3 * L]
    # E[c+n] * conj(E[c+m+n]) per (pol, b, l)
    prod_r = gn_r * gs_r + gn_i * gs_i
    prod_i = gn_i * gs_r - gn_r * gs_i
    # polarisation sum: static sublane slices + add (pure VPU)
    inner_r = prod_r[0:BB]
    inner_i = prod_i[0:BB]
    for p in range(1, nmodes):
        inner_r = inner_r + prod_r[p * BB:(p + 1) * BB]
        inner_i = inner_i + prod_i[p * BB:(p + 1) * BB]
    pbc_r, pbc_i = [], []
    for p in range(nmodes):
        gmr = gm_r[p * BB:(p + 1) * BB]
        gmi = gm_i[p * BB:(p + 1) * BB]
        t_r = inner_r * gmr - inner_i * gmi
        t_i = inner_r * gmi + inner_i * gmr
        d_r = jnp.sum(c_r * t_r - c_i * t_i, axis=-1, keepdims=True)  # [BB, 1]
        d_i = jnp.sum(c_r * t_i + c_i * t_r, axis=-1, keepdims=True)
        x0_r = xall[p * BB:(p + 1) * BB, h_tap:h_tap + 1]
        x0_i = xall[(nmodes + p) * BB:(nmodes + p + 1) * BB, h_tap:h_tap + 1]
        pbc_r.append(x0_r + power * d_r)
        pbc_i.append(x0_i + power * d_i)
    pbc_out = jnp.concatenate(pbc_r + pbc_i, axis=-1)                 # [BB, 2Nm]

    # ========================== EqCNNBiLSTM ==================================
    # xnn: [Mn, BB, 2Nm] time-major, channels = [re0, re1, im0, im1].
    m_nn = xnn_ref.shape[0]
    rows = t_seq * BB

    # Conv1d as K shifted matmuls (in-kernel im2col, no xcol materialisation).
    # TODO(synk): activation after Conv1d in pkufiber's EqCNNBiLSTM not verified;
    # linear conv assumed (kernel and reference are consistent).
    conv = None
    for k in range(k_conv):
        xk = xnn_ref[k:k + t_seq].reshape(rows, cin)                  # [T*BB, Cin]
        part = jnp.dot(xk, wc[k * cin:(k + 1) * cin, :],
                       preferred_element_type=jnp.float32)            # [T*BB, CH]
        conv = part if conv is None else conv + part
    conv = conv + bc                                                  # [T*BB, CH]

    # Hoisted input-side gate pre-activations (one matmul per direction, all T
    # steps at once); only h @ whh stays inside the recurrence.
    gx_f = jnp.dot(conv, wih_f, preferred_element_type=jnp.float32) + bf
    gx_b = jnp.dot(conv, wih_b, preferred_element_type=jnp.float32) + bb

    def cell(g, c_state):
        # gate order (i, f, o | g): one sigmoid push + one tanh push
        s = jax.nn.sigmoid(g[:, 0:3 * H])
        gg = jnp.tanh(g[:, 3 * H:4 * H])
        i_g = s[:, 0:H]
        f_g = s[:, H:2 * H]
        o_g = s[:, 2 * H:3 * H]
        c_new = f_g * c_state + i_g * gg
        h_new = o_g * jnp.tanh(c_new)
        return h_new, c_new

    h_f = jnp.zeros((BB, H), jnp.float32)
    c_f = jnp.zeros((BB, H), jnp.float32)
    h_b = jnp.zeros((BB, H), jnp.float32)
    c_b = jnp.zeros((BB, H), jnp.float32)

    for t in range(t_seq):
        tb = t_seq - 1 - t
        # forward / backward chains are independent -> they interleave
        g_f = gx_f[t * BB:(t + 1) * BB, :] + jnp.dot(
            h_f, whh_f, preferred_element_type=jnp.float32)
        g_b = gx_b[tb * BB:(tb + 1) * BB, :] + jnp.dot(
            h_b, whh_b, preferred_element_type=jnp.float32)
        h_f, c_f = cell(g_f, c_f)
        h_b, c_b = cell(g_b, c_b)
        # hbuf layout: rows [0,BB) = fwd hidden at lane offset t*H,
        #              rows [BB,2BB) = bwd hidden (for source time tb) at tb*H.
        hbuf_ref[0:BB, t * H:(t + 1) * H] = h_f
        hbuf_ref[BB:2 * BB, tb * H:(tb + 1) * H] = h_b

    # Full coverage note: every lane region [t*H,(t+1)*H) of every row of hbuf
    # is (re)written above each grid iteration before being read here, so the
    # persistent scratch never needs zero-init across the grid.
    hbuf = hbuf_ref[...]
    dense = (jnp.dot(hbuf[0:BB], wd_ref[0:TH],
                     preferred_element_type=jnp.float32)
             + jnp.dot(hbuf[BB:2 * BB], wd_ref[TH:2 * TH],
                       preferred_element_type=jnp.float32)
             + bd)                                                    # [BB, 2Nm]

    # centre symbol (packed [re0, re1, im0, im1]); same symbol for both windows.
    xc = xnn_ref[m_nn // 2]                                           # [BB, 2Nm]
    nn_out = xc + dense                                               # residual add
    out_ref[...] = pbc_out + nn_out - xc


# ------------------------- pure-JAX reference path ----------------------------
def _pbc_reference(x_win, power, params):
    b, mp, nm = x_win.shape
    h = mp // 2
    idx = params["pbc_index"]
    m = np.array([t[0] for t in idx])
    n = np.array([t[1] for t in idx])
    s = m + n
    xr = jnp.real(x_win).astype(jnp.float32)
    xi = jnp.imag(x_win).astype(jnp.float32)

    def gather(a, off):
        return jnp.transpose(a[:, h + off, :], (0, 2, 1))          # [B, Nm, L]

    gm_r, gm_i = gather(xr, m), gather(xi, m)
    gn_r, gn_i = gather(xr, n), gather(xi, n)
    gs_r, gs_i = gather(xr, s), gather(xi, s)
    c_r, c_i = params["pbc_cr"], params["pbc_ci"]
    inner_r = jnp.sum(gn_r * gs_r + gn_i * gs_i, axis=1, keepdims=True)
    inner_i = jnp.sum(gn_i * gs_r - gn_r * gs_i, axis=1, keepdims=True)
    t_r = inner_r * gm_r - inner_i * gm_i
    t_i = inner_r * gm_i + inner_i * gm_r
    d_r = jnp.sum(c_r * t_r - c_i * t_i, axis=-1)
    d_i = jnp.sum(c_r * t_i + c_i * t_r, axis=-1)
    p = power.reshape(b, 1)
    return (xr[:, h, :] + p * d_r) + 1j * (xi[:, h, :] + p * d_i)


def _nn_reference(x_win, params):
    b, mn, nm = x_win.shape
    cin = 2 * nm
    t_seq = mn - K_CONV + 1
    hidden = HIDDEN
    x0 = x_win[:, mn // 2, :]
    xr = jnp.concatenate([jnp.real(x_win), jnp.imag(x_win)],
                         axis=-1).astype(jnp.float32)
    cols = [xr[:, t:t + K_CONV, :].reshape(b, K_CONV * cin) for t in range(t_seq)]
    xcol = jnp.concatenate(cols, axis=0)
    conv = jnp.dot(xcol, params["wc"]) + params["bc"]
    # TODO(synk): linear conv assumed (see kernel comment).

    def cell(x_t, h, c, wih, whh, bias):
        g = jnp.dot(x_t, wih) + jnp.dot(h, whh) + bias
        i = jax.nn.sigmoid(g[:, :hidden])
        f = jax.nn.sigmoid(g[:, hidden:2 * hidden])
        gg = jnp.tanh(g[:, 2 * hidden:3 * hidden])
        o = jax.nn.sigmoid(g[:, 3 * hidden:4 * hidden])
        c2 = f * c + i * gg
        return o * jnp.tanh(c2), c2

    zero = jnp.zeros((b, hidden), jnp.float32)
    h, c = zero, zero
    h_fwd = []
    for t in range(t_seq):
        h, c = cell(conv[t * b:(t + 1) * b], h, c,
                    params["wih_f"], params["whh_f"], params["bf"])
        h_fwd.append(h)
    h, c = zero, zero
    h_bwd = [None] * t_seq
    for t in range(t_seq - 1, -1, -1):
        h, c = cell(conv[t * b:(t + 1) * b], h, c,
                    params["wih_b"], params["whh_b"], params["bb"])
        h_bwd[t] = h
    out = jnp.zeros((b, params["bd"].shape[-1]), jnp.float32) + params["bd"]
    for t in range(t_seq):
        base = t * 2 * hidden
        out = out + jnp.dot(h_fwd[t], params["wd"][base:base + hidden, :])
        out = out + jnp.dot(h_bwd[t], params["wd"][base + hidden:base + 2 * hidden, :])
    return x0 + (out[:, :nm] + 1j * out[:, nm:])


# --------------------------- combined forward -------------------------------
def eq_ampbc_add_nn(x, task_info, params, use_pallas=True, blk_b=8):
    # x: [B, M_TOTAL, Nmodes] complex64 ; task_info: [B, 4] = (P_dBm, Fi, Fs, Nch)
    b, mtot, nm = x.shape
    c = mtot // 2
    power = (10.0 ** (task_info[:, 0] / 10.0) / nm).astype(jnp.float32)
    xp = x[:, c - M_PBC // 2: c + M_PBC // 2 + 1, :]
    xn = x[:, c - M_NN // 2: c + M_NN // 2 + 1, :]

    if not use_pallas:
        return (_pbc_reference(xp, power, params)
                + _nn_reference(xn, params)
                - x[:, c, :])

    # --- layout plumbing for the fused kernel (no math in the wrapper) ---
    blk_b = min(blk_b, b)
    assert b % blk_b == 0, "batch must be a multiple of the window block size"
    assert blk_b == b or blk_b % 8 == 0, "window block must fill sublanes"

    # PBC slab: [2*Nm, B, Mp+1] with groups (re-p0, re-p1, im-p0, im-p1) and
    # the launch power folded into the last lane of every group.
    xp_r = jnp.transpose(jnp.real(xp).astype(jnp.float32), (2, 0, 1))   # [Nm,B,Mp]
    xp_i = jnp.transpose(jnp.imag(xp).astype(jnp.float32), (2, 0, 1))
    xpbc = jnp.concatenate([xp_r, xp_i], axis=0)                        # [2Nm,B,Mp]
    pw = jnp.broadcast_to(power.reshape(1, b, 1), (2 * nm, b, 1))
    xpbc = jnp.concatenate([xpbc, pw], axis=-1)                         # [2Nm,B,Mp+1]

    # NN slab: [Mn, B, 2Nm] time-major, channels [re0, re1, im0, im1].
    xnn = jnp.transpose(
        jnp.concatenate([jnp.real(xn), jnp.imag(xn)], axis=-1).astype(jnp.float32),
        (1, 0, 2))

    n_trip = params["n_trip"]
    nb = b // blk_b
    grid_spec = pltpu.PrefetchScalarGridSpec(
        num_scalar_prefetch=0,
        grid=(nb,),
        in_specs=[
            pl.BlockSpec((2 * nm, blk_b, M_PBC + 1), lambda i: (0, i, 0)),
            pl.BlockSpec((M_NN, blk_b, 2 * nm), lambda i: (0, i, 0)),
            pl.BlockSpec(params["wslab"].shape, lambda i: (0, 0)),
            pl.BlockSpec(params["wd_pack"].shape, lambda i: (0, 0)),
        ],
        out_specs=pl.BlockSpec((blk_b, 2 * nm), lambda i: (i, 0)),
        scratch_shapes=[pltpu.VMEM((2 * blk_b, T_SEQ * HIDDEN), jnp.float32)],
    )
    out = pl.pallas_call(
        functools.partial(_fused_kernel, blk_b=blk_b, nmodes=nm, m_pbc=M_PBC,
                          n_trip=n_trip, t_seq=T_SEQ, k_conv=K_CONV,
                          channels=CHANNELS, hidden=HIDDEN),
        out_shape=jax.ShapeDtypeStruct((b, 2 * nm), jnp.float32),
        grid_spec=grid_spec,
        compiler_params=pltpu.CompilerParams(
            dimension_semantics=("parallel",)),
    )(xpbc, xnn, params["wslab"], params["wd_pack"])
    return out[:, :nm] + 1j * out[:, nm:]


# ----------------------------- parameters -----------------------------------
def init_params(key):
    idx = pbc_index(M_PBC, RHO)
    L = len(idx)
    cin = 2 * NMODES
    H = HIDDEN
    ks = jax.random.split(key, 12)

    def rnd(k, shape, scale):
        return scale * jax.random.normal(k, shape, jnp.float32)

    p = dict(
        pbc_index=idx,
        n_trip=L,
        pbc_cr=rnd(ks[0], (1, 1, L), 0.05),
        pbc_ci=rnd(ks[1], (1, 1, L), 0.05),
        wc=rnd(ks[2], (K_CONV * cin, CHANNELS), 1.0 / np.sqrt(K_CONV * cin)),
        bc=rnd(ks[3], (1, CHANNELS), 0.02),
        wih_f=rnd(ks[4], (CHANNELS, 4 * HIDDEN), 1.0 / np.sqrt(CHANNELS)),
        whh_f=rnd(ks[5], (HIDDEN, 4 * HIDDEN), 1.0 / np.sqrt(HIDDEN)),
        bf=rnd(ks[6], (1, 4 * HIDDEN), 0.02),
        wih_b=rnd(ks[7], (CHANNELS, 4 * HIDDEN), 1.0 / np.sqrt(CHANNELS)),
        whh_b=rnd(ks[8], (HIDDEN, 4 * HIDDEN), 1.0 / np.sqrt(HIDDEN)),
        bb=rnd(ks[9], (1, 4 * HIDDEN), 0.02),
        wd=rnd(ks[10], (T_SEQ * 2 * HIDDEN, 2 * NMODES),
               1.0 / np.sqrt(T_SEQ * 2 * HIDDEN)),
        bd=rnd(ks[11], (1, 2 * NMODES), 0.02),
    )

    # ---- packed operands consumed by the fused Pallas kernel ----
    def reorder(w):
        # gate columns (i, f, g, o) -> (i, f, o, g): sigmoid once on [.,3H]
        return jnp.concatenate([w[..., :2 * H], w[..., 3 * H:],
                                w[..., 2 * H:3 * H]], axis=-1)

    gcat = build_gather_matrix(idx, M_PBC)                           # [Mp, 3L]
    gcat_pad = jnp.pad(gcat, ((0, 1), (0, 0)))                       # power lane -> 0
    ccat = jnp.concatenate([p["pbc_cr"].reshape(1, L),
                            p["pbc_ci"].reshape(1, L)], axis=0)      # [2, L]

    segs = [p["wc"], reorder(p["wih_f"]), reorder(p["wih_b"]),
            reorder(p["whh_f"]), reorder(p["whh_b"]),
            gcat_pad, ccat, p["bc"], reorder(p["bf"]), reorder(p["bb"]), p["bd"]]
    assert len(segs) == N_SEG

    def seg_block(w):
        w = jnp.asarray(w, jnp.float32)
        return jnp.pad(w, ((0, 16 - w.shape[0]), (0, SEGW - w.shape[1])))

    # one lane-dense constant slab, every segment 128-lane aligned
    p["wslab"] = jnp.concatenate([seg_block(s) for s in segs], axis=1)  # [16, 1408]

    # dense weights split by direction, rows ordered (t, j): epilogue becomes
    # hbuf[:B] @ Wf + hbuf[B:] @ Wb
    wd3 = p["wd"].reshape(T_SEQ, 2, HIDDEN, 2 * NMODES)
    p["wd_pack"] = jnp.concatenate(
        [wd3[:, 0].reshape(T_SEQ * HIDDEN, 2 * NMODES),
         wd3[:, 1].reshape(T_SEQ * HIDDEN, 2 * NMODES)], axis=0)        # [2*T*H, 2Nm]
    return p


# --------------------------------- main --------------------------------------
if __name__ == "__main__":
    key = jax.random.PRNGKey(0)
    kx, kt, kp = jax.random.split(key, 3)

    BATCH = 16     # sliding windows per call; grid = BATCH // 8 blocks
    xri = jax.random.normal(kx, (BATCH, M_TOTAL, NMODES, 2), jnp.float32) * 0.5
    x = (xri[..., 0] + 1j * xri[..., 1]).astype(jnp.complex64)
    task_info = jnp.concatenate(
        [jax.random.uniform(kt, (BATCH, 1), jnp.float32, -2.0, 2.0),  # launch power dBm
         jnp.zeros((BATCH, 3), jnp.float32)], axis=1)
    params = init_params(kp)

    out = jax.block_until_ready(eq_ampbc_add_nn(x, task_info, params, use_pallas=True))
    ref = jax.block_until_ready(eq_ampbc_add_nn(x, task_info, params, use_pallas=False))

    assert out.shape == (BATCH, NMODES) and out.dtype == jnp.complex64
    np.testing.assert_allclose(np.asarray(out), np.asarray(ref), rtol=1e-3, atol=1e-3)
    print("KERNEL_OK")
</pallas_src>

<mosaic_0001>
module attributes {stable_mosaic.version = 11 : i64} {
  func.func @_fused_kernel(%arg0: i32, %arg1: memref<4x8x12xf32, #tpu.memory_space<vmem>>, %arg2: memref<15x8x4xf32, #tpu.memory_space<vmem>>, %arg3: memref<16x1408xf32, #tpu.memory_space<vmem>>, %arg4: memref<384x4xf32, #tpu.memory_space<vmem>>, %arg5: memref<8x4xf32, #tpu.memory_space<vmem>>, %arg6: memref<16x192xf32, #tpu.memory_space<vmem>>) attributes {dimension_semantics = [#tpu.dimension_semantics<parallel>], iteration_bounds = array<i64: 2>, scalar_prefetch = 0 : i64, scratch_operands = 1 : i64, tpu.core_type = #tpu.core_type<tc>, window_params = [{transform_indices = @transform_0, window_bounds = array<i64: 4, 8, 12>}, {transform_indices = @transform_1, window_bounds = array<i64: 15, 8, 4>}, {pipeline_mode = #tpu.pipeline_mode<synchronous>, transform_indices = @transform_2, window_bounds = array<i64: 16, 1408>}, {pipeline_mode = #tpu.pipeline_mode<synchronous>, transform_indices = @transform_3, window_bounds = array<i64: 384, 4>}, {transform_indices = @transform_4, window_bounds = array<i64: 8, 4>}]} {
    %c0 = arith.constant 0 : index
    %c0_0 = arith.constant 0 : index
    %0 = vector.load %arg3[%c0, %c0_0] : memref<16x1408xf32, #tpu.memory_space<vmem>>, vector<16x16xf32>
    %c0_1 = arith.constant 0 : index
    %c128 = arith.constant 128 : index
    %1 = vector.load %arg3[%c0_1, %c128] : memref<16x1408xf32, #tpu.memory_space<vmem>>, vector<16x64xf32>
    %c0_2 = arith.constant 0 : index
    %c256 = arith.constant 256 : index
    %2 = vector.load %arg3[%c0_2, %c256] : memref<16x1408xf32, #tpu.memory_space<vmem>>, vector<16x64xf32>
    %c0_3 = arith.constant 0 : index
    %c384 = arith.constant 384 : index
    %3 = vector.load %arg3[%c0_3, %c384] : memref<16x1408xf32, #tpu.memory_space<vmem>>, vector<16x64xf32>
    %c0_4 = arith.constant 0 : index
    %c512 = arith.constant 512 : index
    %4 = vector.load %arg3[%c0_4, %c512] : memref<16x1408xf32, #tpu.memory_space<vmem>>, vector<16x64xf32>
    %c0_5 = arith.constant 0 : index
    %c640 = arith.constant 640 : index
    %5 = vector.load %arg3[%c0_5, %c640] : memref<16x1408xf32, #tpu.memory_space<vmem>>, vector<12x93xf32>
    %c0_6 = arith.constant 0 : index
    %c768 = arith.constant 768 : index
    %6 = vector.load %arg3[%c0_6, %c768] : memref<16x1408xf32, #tpu.memory_space<vmem>>, vector<1x31xf32>
    %c1 = arith.constant 1 : index
    %c768_7 = arith.constant 768 : index
    %7 = vector.load %arg3[%c1, %c768_7] : memref<16x1408xf32, #tpu.memory_space<vmem>>, vector<1x31xf32>
    %c0_8 = arith.constant 0 : index
    %c896 = arith.constant 896 : index
    %8 = vector.load %arg3[%c0_8, %c896] : memref<16x1408xf32, #tpu.memory_space<vmem>>, vector<1x16xf32>
    %c0_9 = arith.constant 0 : index
    %c1024 = arith.constant 1024 : index
    %9 = vector.load %arg3[%c0_9, %c1024] : memref<16x1408xf32, #tpu.memory_space<vmem>>, vector<1x64xf32>
    %c0_10 = arith.constant 0 : index
    %c1152 = arith.constant 1152 : index
    %10 = vector.load %arg3[%c0_10, %c1152] : memref<16x1408xf32, #tpu.memory_space<vmem>>, vector<1x64xf32>
    %c0_11 = arith.constant 0 : index
    %c1280 = arith.constant 1280 : index
    %11 = vector.load %arg3[%c0_11, %c1280] : memref<16x1408xf32, #tpu.memory_space<vmem>>, vector<1x4xf32>
    %c0_12 = arith.constant 0 : index
    %c0_13 = arith.constant 0 : index
    %c0_14 = arith.constant 0 : index
    %12 = vector.load %arg1[%c0_12, %c0_13, %c0_14] : memref<4x8x12xf32, #tpu.memory_space<vmem>>, vector<4x8x12xf32>
    %13 = vector.shape_cast %12 : vector<4x8x12xf32> to vector<32x12xf32>
    %14 = vector.extract_strided_slice %13 {offsets = [0, 11], sizes = [8, 1], strides = [1, 1]} : vector<32x12xf32> to vector<8x1xf32>
    %cst = arith.constant dense<0.000000e+00> : vector<32x93xf32>
    %15 = tpu.matmul %13, %5, %cst {dimension_numbers = #tpu.dot_dimension_numbers<[1], [0], [0], [1], [0, 0, 1, 1], [], []>} : vector<32x12xf32>, vector<12x93xf32>, vector<32x93xf32> -> vector<32x93xf32>
    %16 = vector.extract_strided_slice %15 {offsets = [0, 0], sizes = [16, 93], strides = [1, 1]} : vector<32x93xf32> to vector<16x93xf32>
    %17 = vector.extract_strided_slice %15 {offsets = [16, 0], sizes = [16, 93], strides = [1, 1]} : vector<32x93xf32> to vector<16x93xf32>
    %18 = vector.extract_strided_slice %16 {offsets = [0, 0], sizes = [16, 31], strides = [1, 1]} : vector<16x93xf32> to vector<16x31xf32>
    %19 = vector.extract_strided_slice %16 {offsets = [0, 31], sizes = [16, 31], strides = [1, 1]} : vector<16x93xf32> to vector<16x31xf32>
    %20 = vector.extract_strided_slice %16 {offsets = [0, 62], sizes = [16, 31], strides = [1, 1]} : vector<16x93xf32> to vector<16x31xf32>
    %21 = vector.extract_strided_slice %17 {offsets = [0, 0], sizes = [16, 31], strides = [1, 1]} : vector<16x93xf32> to vector<16x31xf32>
    %22 = vector.extract_strided_slice %17 {offsets = [0, 31], sizes = [16, 31], strides = [1, 1]} : vector<16x93xf32> to vector<16x31xf32>
    %23 = vector.extract_strided_slice %17 {offsets = [0, 62], sizes = [16, 31], strides = [1, 1]} : vector<16x93xf32> to vector<16x31xf32>
    %24 = arith.mulf %19, %20 : vector<16x31xf32>
    %25 = arith.mulf %22, %23 : vector<16x31xf32>
    %26 = arith.addf %24, %25 : vector<16x31xf32>
    %27 = arith.mulf %22, %20 : vector<16x31xf32>
    %28 = arith.mulf %19, %23 : vector<16x31xf32>
    %29 = arith.subf %27, %28 : vector<16x31xf32>
    %30 = vector.extract_strided_slice %26 {offsets = [0, 0], sizes = [8, 31], strides = [1, 1]} : vector<16x31xf32> to vector<8x31xf32>
    %31 = vector.extract_strided_slice %29 {offsets = [0, 0], sizes = [8, 31], strides = [1, 1]} : vector<16x31xf32> to vector<8x31xf32>
    %32 = vector.extract_strided_slice %26 {offsets = [8, 0], sizes = [8, 31], strides = [1, 1]} : vector<16x31xf32> to vector<8x31xf32>
    %33 = arith.addf %30, %32 : vector<8x31xf32>
    %34 = vector.extract_strided_slice %29 {offsets = [8, 0], sizes = [8, 31], strides = [1, 1]} : vector<16x31xf32> to vector<8x31xf32>
    %35 = arith.addf %31, %34 : vector<8x31xf32>
    %36 = vector.extract_strided_slice %18 {offsets = [0, 0], sizes = [8, 31], strides = [1, 1]} : vector<16x31xf32> to vector<8x31xf32>
    %37 = vector.extract_strided_slice %21 {offsets = [0, 0], sizes = [8, 31], strides = [1, 1]} : vector<16x31xf32> to vector<8x31xf32>
    %38 = arith.mulf %33, %36 : vector<8x31xf32>
    %39 = arith.mulf %35, %37 : vector<8x31xf32>
    %40 = arith.subf %38, %39 : vector<8x31xf32>
    %41 = arith.mulf %33, %37 : vector<8x31xf32>
    %42 = arith.mulf %35, %36 : vector<8x31xf32>
    %43 = arith.addf %41, %42 : vector<8x31xf32>
    %44 = vector.broadcast %6 : vector<1x31xf32> to vector<8x31xf32>
    %45 = arith.mulf %44, %40 : vector<8x31xf32>
    %46 = vector.broadcast %7 : vector<1x31xf32> to vector<8x31xf32>
    %47 = arith.mulf %46, %43 : vector<8x31xf32>
    %48 = arith.subf %45, %47 : vector<8x31xf32>
    %cst_15 = arith.constant dense<0.000000e+00> : vector<8xf32>
    %49 = vector.multi_reduction <add>, %48, %cst_15 [1] : vector<8x31xf32> to vector<8xf32>
    %50 = vector.shape_cast %49 : vector<8xf32> to vector<8x1xf32>
    %51 = vector.broadcast %6 : vector<1x31xf32> to vector<8x31xf32>
    %52 = arith.mulf %51, %43 : vector<8x31xf32>
    %53 = vector.broadcast %7 : vector<1x31xf32> to vector<8x31xf32>
    %54 = arith.mulf %53, %40 : vector<8x31xf32>
    %55 = arith.addf %52, %54 : vector<8x31xf32>
    %cst_16 = arith.constant dense<0.000000e+00> : vector<8xf32>
    %56 = vector.multi_reduction <add>, %55, %cst_16 [1] : vector<8x31xf32> to vector<8xf32>
    %57 = vector.shape_cast %56 : vector<8xf32> to vector<8x1xf32>
    %58 = vector.extract_strided_slice %13 {offsets = [0, 5], sizes = [8, 1], strides = [1, 1]} : vector<32x12xf32> to vector<8x1xf32>
    %59 = vector.extract_strided_slice %13 {offsets = [16, 5], sizes = [8, 1], strides = [1, 1]} : vector<32x12xf32> to vector<8x1xf32>
    %60 = arith.mulf %14, %50 : vector<8x1xf32>
    %61 = arith.addf %58, %60 : vector<8x1xf32>
    %62 = arith.mulf %14, %57 : vector<8x1xf32>
    %63 = arith.addf %59, %62 : vector<8x1xf32>
    %64 = vector.extract_strided_slice %18 {offsets = [8, 0], sizes = [8, 31], strides = [1, 1]} : vector<16x31xf32> to vector<8x31xf32>
    %65 = vector.extract_strided_slice %21 {offsets = [8, 0], sizes = [8, 31], strides = [1, 1]} : vector<16x31xf32> to vector<8x31xf32>
    %66 = arith.mulf %33, %64 : vector<8x31xf32>
    %67 = arith.mulf %35, %65 : vector<8x31xf32>
    %68 = arith.subf %66, %67 : vector<8x31xf32>
    %69 = arith.mulf %33, %65 : vector<8x31xf32>
    %70 = arith.mulf %35, %64 : vector<8x31xf32>
    %71 = arith.addf %69, %70 : vector<8x31xf32>
    %72 = vector.broadcast %6 : vector<1x31xf32> to vector<8x31xf32>
    %73 = arith.mulf %72, %68 : vector<8x31xf32>
    %74 = vector.broadcast %7 : vector<1x31xf32> to vector<8x31xf32>
    %75 = arith.mulf %74, %71 : vector<8x31xf32>
    %76 = arith.subf %73, %75 : vector<8x31xf32>
    %cst_17 = arith.constant dense<0.000000e+00> : vector<8xf32>
    %77 = vector.multi_reduction <add>, %76, %cst_17 [1] : vector<8x31xf32> to vector<8xf32>
    %78 = vector.shape_cast %77 : vector<8xf32> to vector<8x1xf32>
    %79 = vector.broadcast %6 : vector<1x31xf32> to vector<8x31xf32>
    %80 = arith.mulf %79, %71 : vector<8x31xf32>
    %81 = vector.broadcast %7 : vector<1x31xf32> to vector<8x31xf32>
    %82 = arith.mulf %81, %68 : vector<8x31xf32>
    %83 = arith.addf %80, %82 : vector<8x31xf32>
    %cst_18 = arith.constant dense<0.000000e+00> : vector<8xf32>
    %84 = vector.multi_reduction <add>, %83, %cst_18 [1] : vector<8x31xf32> to vector<8xf32>
    %85 = vector.shape_cast %84 : vector<8xf32> to vector<8x1xf32>
    %86 = vector.extract_strided_slice %13 {offsets = [8, 5], sizes = [8, 1], strides = [1, 1]} : vector<32x12xf32> to vector<8x1xf32>
    %87 = vector.extract_strided_slice %13 {offsets = [24, 5], sizes = [8, 1], strides = [1, 1]} : vector<32x12xf32> to vector<8x1xf32>
    %88 = arith.mulf %14, %78 : vector<8x1xf32>
    %89 = arith.addf %86, %88 : vector<8x1xf32>
    %90 = arith.mulf %14, %85 : vector<8x1xf32>
    %91 = arith.addf %87, %90 : vector<8x1xf32>
    %92 = tpu.concatenate %61, %89, %63, %91 in 1 : vector<8x1xf32>, vector<8x1xf32>, vector<8x1xf32>, vector<8x1xf32> -> vector<8x4xf32>
    %c0_19 = arith.constant 0 : index
    %c0_20 = arith.constant 0 : index
    %c0_21 = arith.constant 0 : index
    %93 = vector.load %arg2[%c0_19, %c0_20, %c0_21] : memref<15x8x4xf32, #tpu.memory_space<vmem>>, vector<12x8x4xf32>
    %94 = vector.shape_cast %93 : vector<12x8x4xf32> to vector<96x4xf32>
    %95 = vector.extract_strided_slice %0 {offsets = [0, 0], sizes = [4, 16], strides = [1, 1]} : vector<16x16xf32> to vector<4x16xf32>
    %cst_22 = arith.constant dense<0.000000e+00> : vector<96x16xf32>
    %96 = tpu.matmul %94, %95, %cst_22 {dimension_numbers = #tpu.dot_dimension_numbers<[1], [0], [0], [1], [0, 0, 1, 1], [], []>} : vector<96x4xf32>, vector<4x16xf32>, vector<96x16xf32> -> vector<96x16xf32>
    %c1_23 = arith.constant 1 : index
    %c0_24 = arith.constant 0 : index
    %c0_25 = arith.constant 0 : index
    %97 = vector.load %arg2[%c1_23, %c0_24, %c0_25] : memref<15x8x4xf32, #tpu.memory_space<vmem>>, vector<12x8x4xf32>
    %98 = vector.shape_cast %97 : vector<12x8x4xf32> to vector<96x4xf32>
    %99 = vector.extract_strided_slice %0 {offsets = [4, 0], sizes = [4, 16], strides = [1, 1]} : vector<16x16xf32> to vector<4x16xf32>
    %cst_26 = arith.constant dense<0.000000e+00> : vector<96x16xf32>
    %100 = tpu.matmul %98, %99, %cst_26 {dimension_numbers = #tpu.dot_dimension_numbers<[1], [0], [0], [1], [0, 0, 1, 1], [], []>} : vector<96x4xf32>, vector<4x16xf32>, vector<96x16xf32> -> vector<96x16xf32>
    %101 = arith.addf %96, %100 : vector<96x16xf32>
    %c2 = arith.constant 2 : index
    %c0_27 = arith.constant 0 : index
    %c0_28 = arith.constant 0 : index
    %102 = vector.load %arg2[%c2, %c0_27, %c0_28] : memref<15x8x4xf32, #tpu.memory_space<vmem>>, vector<12x8x4xf32>
    %103 = vector.shape_cast %102 : vector<12x8x4xf32> to vector<96x4xf32>
    %104 = vector.extract_strided_slice %0 {offsets = [8, 0], sizes = [4, 16], strides = [1, 1]} : vector<16x16xf32> to vector<4x16xf32>
    %cst_29 = arith.constant dense<0.000000e+00> : vector<96x16xf32>
    %105 = tpu.matmul %103, %104, %cst_29 {dimension_numbers = #tpu.dot_dimension_numbers<[1], [0], [0], [1], [0, 0, 1, 1], [], []>} : vector<96x4xf32>, vector<4x16xf32>, vector<96x16xf32> -> vector<96x16xf32>
    %106 = arith.addf %101, %105 : vector<96x16xf32>
    %c3 = arith.constant 3 : index
    %c0_30 = arith.constant 0 : index
    %c0_31 = arith.constant 0 : index
    %107 = vector.load %arg2[%c3, %c0_30, %c0_31] : memref<15x8x4xf32, #tpu.memory_space<vmem>>, vector<12x8x4xf32>
    %108 = vector.shape_cast %107 : vector<12x8x4xf32> to vector<96x4xf32>
    %109 = vector.extract_strided_slice %0 {offsets = [12, 0], sizes = [4, 16], strides = [1, 1]} : vector<16x16xf32> to vector<4x16xf32>
    %cst_32 = arith.constant dense<0.000000e+00> : vector<96x16xf32>
    %110 = tpu.matmul %108, %109, %cst_32 {dimension_numbers = #tpu.dot_dimension_numbers<[1], [0], [0], [1], [0, 0, 1, 1], [], []>} : vector<96x4xf32>, vector<4x16xf32>, vector<96x16xf32> -> vector<96x16xf32>
    %111 = arith.addf %106, %110 : vector<96x16xf32>
    %112 = vector.broadcast %8 : vector<1x16xf32> to vector<96x16xf32>
    %113 = arith.addf %111, %112 : vector<96x16xf32>
    %cst_33 = arith.constant dense<0.000000e+00> : vector<96x64xf32>
    %114 = tpu.matmul %113, %1, %cst_33 {dimension_numbers = #tpu.dot_dimension_numbers<[1], [0], [0], [1], [0, 0, 1, 1], [], []>} : vector<96x16xf32>, vector<16x64xf32>, vector<96x64xf32> -> vector<96x64xf32>
    %115 = vector.broadcast %9 : vector<1x64xf32> to vector<96x64xf32>
    %116 = arith.addf %114, %115 : vector<96x64xf32>
    %cst_34 = arith.constant dense<0.000000e+00> : vector<96x64xf32>
    %117 = tpu.matmul %113, %2, %cst_34 {dimension_numbers = #tpu.dot_dimension_numbers<[1], [0], [0], [1], [0, 0, 1, 1], [], []>} : vector<96x16xf32>, vector<16x64xf32>, vector<96x64xf32> -> vector<96x64xf32>
    %118 = vector.broadcast %10 : vector<1x64xf32> to vector<96x64xf32>
    %119 = arith.addf %117, %118 : vector<96x64xf32>
    %cst_35 = arith.constant 0.000000e+00 : f32
    %120 = vector.broadcast %cst_35 : f32 to vector<8x16xf32>
    %cst_36 = arith.constant 0.000000e+00 : f32
    %121 = vector.broadcast %cst_36 : f32 to vector<8x16xf32>
    %cst_37 = arith.constant 0.000000e+00 : f32
    %122 = vector.broadcast %cst_37 : f32 to vector<8x16xf32>
    %cst_38 = arith.constant 0.000000e+00 : f32
    %123 = vector.broadcast %cst_38 : f32 to vector<8x16xf32>
    %124 = vector.extract_strided_slice %116 {offsets = [0, 0], sizes = [8, 64], strides = [1, 1]} : vector<96x64xf32> to vector<8x64xf32>
    %cst_39 = arith.constant dense<0.000000e+00> : vector<8x64xf32>
    %125 = tpu.matmul %120, %3, %cst_39 {dimension_numbers = #tpu.dot_dimension_numbers<[1], [0], [0], [1], [0, 0, 1, 1], [], []>} : vector<8x16xf32>, vector<16x64xf32>, vector<8x64xf32> -> vector<8x64xf32>
    %126 = arith.addf %124, %125 : vector<8x64xf32>
    %127 = vector.extract_strided_slice %119 {offsets = [88, 0], sizes = [8, 64], strides = [1, 1]} : vector<96x64xf32> to vector<8x64xf32>
    %cst_40 = arith.constant dense<0.000000e+00> : vector<8x64xf32>
    %128 = tpu.matmul %122, %4, %cst_40 {dimension_numbers = #tpu.dot_dimension_numbers<[1], [0], [0], [1], [0, 0, 1, 1], [], []>} : vector<8x16xf32>, vector<16x64xf32>, vector<8x64xf32> -> vector<8x64xf32>
    %129 = arith.addf %127, %128 : vector<8x64xf32>
    %130 = vector.extract_strided_slice %126 {offsets = [0, 0], sizes = [8, 48], strides = [1, 1]} : vector<8x64xf32> to vector<8x48xf32>
    %131 = arith.negf %130 : vector<8x48xf32>
    %132 = math.exp %131 : vector<8x48xf32>
    %cst_41 = arith.constant 1.000000e+00 : f32
    %133 = vector.broadcast %cst_41 : f32 to vector<8x48xf32>
    %134 = arith.addf %133, %132 : vector<8x48xf32>
    %135 = arith.divf %133, %134 : vector<8x48xf32>
    %136 = vector.extract_strided_slice %126 {offsets = [0, 48], sizes = [8, 16], strides = [1, 1]} : vector<8x64xf32> to vector<8x16xf32>
    %137 = math.tanh %136 : vector<8x16xf32>
    %138 = vector.extract_strided_slice %135 {offsets = [0, 0], sizes = [8, 16], strides = [1, 1]} : vector<8x48xf32> to vector<8x16xf32>
    %139 = vector.extract_strided_slice %135 {offsets = [0, 16], sizes = [8, 16], strides = [1, 1]} : vector<8x48xf32> to vector<8x16xf32>
    %140 = vector.extract_strided_slice %135 {offsets = [0, 32], sizes = [8, 16], strides = [1, 1]} : vector<8x48xf32> to vector<8x16xf32>
    %141 = arith.mulf %139, %121 : vector<8x16xf32>
    %142 = arith.mulf %138, %137 : vector<8x16xf32>
    %143 = arith.addf %141, %142 : vector<8x16xf32>
    %144 = math.tanh %143 : vector<8x16xf32>
    %145 = arith.mulf %140, %144 : vector<8x16xf32>
    %146 = vector.extract_strided_slice %129 {offsets = [0, 0], sizes = [8, 48], strides = [1, 1]} : vector<8x64xf32> to vector<8x48xf32>
    %147 = arith.negf %146 : vector<8x48xf32>
    %148 = math.exp %147 : vector<8x48xf32>
    %cst_42 = arith.constant 1.000000e+00 : f32
    %149 = vector.broadcast %cst_42 : f32 to vector<8x48xf32>
    %150 = arith.addf %149, %148 : vector<8x48xf32>
    %151 = arith.divf %149, %150 : vector<8x48xf32>
    %152 = vector.extract_strided_slice %129 {offsets = [0, 48], sizes = [8, 16], strides = [1, 1]} : vector<8x64xf32> to vector<8x16xf32>
    %153 = math.tanh %152 : vector<8x16xf32>
    %154 = vector.extract_strided_slice %151 {offsets = [0, 0], sizes = [8, 16], strides = [1, 1]} : vector<8x48xf32> to vector<8x16xf32>
    %155 = vector.extract_strided_slice %151 {offsets = [0, 16], sizes = [8, 16], strides = [1, 1]} : vector<8x48xf32> to vector<8x16xf32>
    %156 = vector.extract_strided_slice %151 {offsets = [0, 32], sizes = [8, 16], strides = [1, 1]} : vector<8x48xf32> to vector<8x16xf32>
    %157 = arith.mulf %155, %123 : vector<8x16xf32>
    %158 = arith.mulf %154, %153 : vector<8x16xf32>
    %159 = arith.addf %157, %158 : vector<8x16xf32>
    %160 = math.tanh %159 : vector<8x16xf32>
    %161 = arith.mulf %156, %160 : vector<8x16xf32>
    %c0_43 = arith.constant 0 : index
    %c0_44 = arith.constant 0 : index
    %162 = vector.load %arg6[%c0_43, %c0_44] : memref<16x192xf32, #tpu.memory_space<vmem>>, vector<8x16xf32>
    tpu.vector_store %arg6[%c0_43, %c0_44], %145 {strides = array<i32>} : memref<16x192xf32, #tpu.memory_space<vmem>>, vector<8x16xf32>,
    %c8 = arith.constant 8 : index
    %c176 = arith.constant 176 : index
    %163 = vector.load %arg6[%c8, %c176] : memref<16x192xf32, #tpu.memory_space<vmem>>, vector<8x16xf32>
    tpu.vector_store %arg6[%c8, %c176], %161 {strides = array<i32>} : memref<16x192xf32, #tpu.memory_space<vmem>>, vector<8x16xf32>,
    %164 = vector.extract_strided_slice %116 {offsets = [8, 0], sizes = [8, 64], strides = [1, 1]} : vector<96x64xf32> to vector<8x64xf32>
    %cst_45 = arith.constant dense<0.000000e+00> : vector<8x64xf32>
    %165 = tpu.matmul %145, %3, %cst_45 {dimension_numbers = #tpu.dot_dimension_numbers<[1], [0], [0], [1], [0, 0, 1, 1], [], []>} : vector<8x16xf32>, vector<16x64xf32>, vector<8x64xf32> -> vector<8x64xf32>
    %166 = arith.addf %164, %165 : vector<8x64xf32>
    %167 = vector.extract_strided_slice %119 {offsets = [80, 0], sizes = [8, 64], strides = [1, 1]} : vector<96x64xf32> to vector<8x64xf32>
    %cst_46 = arith.constant dense<0.000000e+00> : vector<8x64xf32>
    %168 = tpu.matmul %161, %4, %cst_46 {dimension_numbers = #tpu.dot_dimension_numbers<[1], [0], [0], [1], [0, 0, 1, 1], [], []>} : vector<8x16xf32>, vector<16x64xf32>, vector<8x64xf32> -> vector<8x64xf32>
    %169 = arith.addf %167, %168 : vector<8x64xf32>
    %170 = vector.extract_strided_slice %166 {offsets = [0, 0], sizes = [8, 48], strides = [1, 1]} : vector<8x64xf32> to vector<8x48xf32>
    %171 = arith.negf %170 : vector<8x48xf32>
    %172 = math.exp %171 : vector<8x48xf32>
    %cst_47 = arith.constant 1.000000e+00 : f32
    %173 = vector.broadcast %cst_47 : f32 to vector<8x48xf32>
    %174 = arith.addf %173, %172 : vector<8x48xf32>
    %175 = arith.divf %173, %174 : vector<8x48xf32>
    %176 = vector.extract_strided_slice %166 {offsets = [0, 48], sizes = [8, 16], strides = [1, 1]} : vector<8x64xf32> to vector<8x16xf32>
    %177 = math.tanh %176 : vector<8x16xf32>
    %178 = vector.extract_strided_slice %175 {offsets = [0, 0], sizes = [8, 16], strides = [1, 1]} : vector<8x48xf32> to vector<8x16xf32>
    %179 = vector.extract_strided_slice %175 {offsets = [0, 16], sizes = [8, 16], strides = [1, 1]} : vector<8x48xf32> to vector<8x16xf32>
    %180 = vector.extract_strided_slice %175 {offsets = [0, 32], sizes = [8, 16], strides = [1, 1]} : vector<8x48xf32> to vector<8x16xf32>
    %181 = arith.mulf %179, %143 : vector<8x16xf32>
    %182 = arith.mulf %178, %177 : vector<8x16xf32>
    %183 = arith.addf %181, %182 : vector<8x16xf32>
    %184 = math.tanh %183 : vector<8x16xf32>
    %185 = arith.mulf %180, %184 : vector<8x16xf32>
    %186 = vector.extract_strided_slice %169 {offsets = [0, 0], sizes = [8, 48], strides = [1, 1]} : vector<8x64xf32> to vector<8x48xf32>
    %187 = arith.negf %186 : vector<8x48xf32>
    %188 = math.exp %187 : vector<8x48xf32>
    %cst_48 = arith.constant 1.000000e+00 : f32
    %189 = vector.broadcast %cst_48 : f32 to vector<8x48xf32>
    %190 = arith.addf %189, %188 : vector<8x48xf32>
    %191 = arith.divf %189, %190 : vector<8x48xf32>
    %192 = vector.extract_strided_slice %169 {offsets = [0, 48], sizes = [8, 16], strides = [1, 1]} : vector<8x64xf32> to vector<8x16xf32>
    %193 = math.tanh %192 : vector<8x16xf32>
    %194 = vector.extract_strided_slice %191 {offsets = [0, 0], sizes = [8, 16], strides = [1, 1]} : vector<8x48xf32> to vector<8x16xf32>
    %195 = vector.extract_strided_slice %191 {offsets = [0, 16], sizes = [8, 16], strides = [1, 1]} : vector<8x48xf32> to vector<8x16xf32>
    %196 = vector.extract_strided_slice %191 {offsets = [0, 32], sizes = [8, 16], strides = [1, 1]} : vector<8x48xf32> to vector<8x16xf32>
    %197 = arith.mulf %195, %159 : vector<8x16xf32>
    %198 = arith.mulf %194, %193 : vector<8x16xf32>
    %199 = arith.addf %197, %198 : vector<8x16xf32>
    %200 = math.tanh %199 : vector<8x16xf32>
    %201 = arith.mulf %196, %200 : vector<8x16xf32>
    %c0_49 = arith.constant 0 : index
    %c16 = arith.constant 16 : index
    %202 = vector.load %arg6[%c0_49, %c16] : memref<16x192xf32, #tpu.memory_space<vmem>>, vector<8x16xf32>
    tpu.vector_store %arg6[%c0_49, %c16], %185 {strides = array<i32>} : memref<16x192xf32, #tpu.memory_space<vmem>>, vector<8x16xf32>,
    %c8_50 = arith.constant 8 : index
    %c160 = arith.constant 160 : index
    %203 = vector.load %arg6[%c8_50, %c160] : memref<16x192xf32, #tpu.memory_space<vmem>>, vector<8x16xf32>
    tpu.vector_store %arg6[%c8_50, %c160], %201 {strides = array<i32>} : memref<16x192xf32, #tpu.memory_space<vmem>>, vector<8x16xf32>,
    %204 = vector.extract_strided_slice %116 {offsets = [16, 0], sizes = [8, 64], strides = [1, 1]} : vector<96x64xf32> to vector<8x64xf32>
    %cst_51 = arith.constant dense<0.000000e+00> : vector<8x64xf32>
    %205 = tpu.matmul %185, %3, %cst_51 {dimension_numbers = #tpu.dot_dimension_numbers<[1], [0], [0], [1], [0, 0, 1, 1], [], []>} : vector<8x16xf32>, vector<16x64xf32>, vector<8x64xf32> -> vector<8x64xf32>
    %206 = arith.addf %204, %205 : vector<8x64xf32>
    %207 = vector.extract_strided_slice %119 {offsets = [72, 0], sizes = [8, 64], strides = [1, 1]} : vector<96x64xf32> to vector<8x64xf32>
    %cst_52 = arith.constant dense<0.000000e+00> : vector<8x64xf32>
    %208 = tpu.matmul %201, %4, %cst_52 {dimension_numbers = #tpu.dot_dimension_numbers<[1], [0], [0], [1], [0, 0, 1, 1], [], []>} : vector<8x16xf32>, vector<16x64xf32>, vector<8x64xf32> -> vector<8x64xf32>
    %209 = arith.addf %207, %208 : vector<8x64xf32>
    %210 = vector.extract_strided_slice %206 {offsets = [0, 0], sizes = [8, 48], strides = [1, 1]} : vector<8x64xf32> to vector<8x48xf32>
    %211 = arith.negf %210 : vector<8x48xf32>
    %212 = math.exp %211 : vector<8x48xf32>
    %cst_53 = arith.constant 1.000000e+00 : f32
    %213 = vector.broadcast %cst_53 : f32 to vector<8x48xf32>
    %214 = arith.addf %213, %212 : vector<8x48xf32>
    %215 = arith.divf %213, %214 : vector<8x48xf32>
    %216 = vector.extract_strided_slice %206 {offsets = [0, 48], sizes = [8, 16], strides = [1, 1]} : vector<8x64xf32> to vector<8x16xf32>
    %217 = math.tanh %216 : vector<8x16xf32>
    %218 = vector.extract_strided_slice %215 {offsets = [0, 0], sizes = [8, 16], strides = [1, 1]} : vector<8x48xf32> to vector<8x16xf32>
    %219 = vector.extract_strided_slice %215 {offsets = [0, 16], sizes = [8, 16], strides = [1, 1]} : vector<8x48xf32> to vector<8x16xf32>
    %220 = vector.extract_strided_slice %215 {offsets = [0, 32], sizes = [8, 16], strides = [1, 1]} : vector<8x48xf32> to vector<8x16xf32>
    %221 = arith.mulf %219, %183 : vector<8x16xf32>
    %222 = arith.mulf %218, %217 : vector<8x16xf32>
    %223 = arith.addf %221, %222 : vector<8x16xf32>
    %224 = math.tanh %223 : vector<8x16xf32>
    %225 = arith.mulf %220, %224 : vector<8x16xf32>
    %226 = vector.extract_strided_slice %209 {offsets = [0, 0], sizes = [8, 48], strides = [1, 1]} : vector<8x64xf32> to vector<8x48xf32>
    %227 = arith.negf %226 : vector<8x48xf32>
    %228 = math.exp %227 : vector<8x48xf32>
    %cst_54 = arith.constant 1.000000e+00 : f32
    %229 = vector.broadcast %cst_54 : f32 to vector<8x48xf32>
    %230 = arith.addf %229, %228 : vector<8x48xf32>
    %231 = arith.divf %229, %230 : vector<8x48xf32>
    %232 = vector.extract_strided_slice %209 {offsets = [0, 48], sizes = [8, 16], strides = [1, 1]} : vector<8x64xf32> to vector<8x16xf32>
    %233 = math.tanh %232 : vector<8x16xf32>
    %234 = vector.extract_strided_slice %231 {offsets = [0, 0], sizes = [8, 16], strides = [1, 1]} : vector<8x48xf32> to vector<8x16xf32>
    %235 = vector.extract_strided_slice %231 {offsets = [0, 16], sizes = [8, 16], strides = [1, 1]} : vector<8x48xf32> to vector<8x16xf32>
    %236 = vector.extract_strided_slice %231 {offsets = [0, 32], sizes = [8, 16], strides = [1, 1]} : vector<8x48xf32> to vector<8x16xf32>
    %237 = arith.mulf %235, %199 : vector<8x16xf32>
    %238 = arith.mulf %234, %233 : vector<8x16xf32>
    %239 = arith.addf %237, %238 : vector<8x16xf32>
    %240 = math.tanh %239 : vector<8x16xf32>
    %241 = arith.mulf %236, %240 : vector<8x16xf32>
    %c0_55 = arith.constant 0 : index
    %c32 = arith.constant 32 : index
    %242 = vector.load %arg6[%c0_55, %c32] : memref<16x192xf32, #tpu.memory_space<vmem>>, vector<8x16xf32>
    tpu.vector_store %arg6[%c0_55, %c32], %225 {strides = array<i32>} : memref<16x192xf32, #tpu.memory_space<vmem>>, vector<8x16xf32>,
    %c8_56 = arith.constant 8 : index
    %c144 = arith.constant 144 : index
    %243 = vector.load %arg6[%c8_56, %c144] : memref<16x192xf32, #tpu.memory_space<vmem>>, vector<8x16xf32>
    tpu.vector_store %arg6[%c8_56, %c144], %241 {strides = array<i32>} : memref<16x192xf32, #tpu.memory_space<vmem>>, vector<8x16xf32>,
    %244 = vector.extract_strided_slice %116 {offsets = [24, 0], sizes = [8, 64], strides = [1, 1]} : vector<96x64xf32> to vector<8x64xf32>
    %cst_57 = arith.constant dense<0.000000e+00> : vector<8x64xf32>
    %245 = tpu.matmul %225, %3, %cst_57 {dimension_numbers = #tpu.dot_dimension_numbers<[1], [0], [0], [1], [0, 0, 1, 1], [], []>} : vector<8x16xf32>, vector<16x64xf32>, vector<8x64xf32> -> vector<8x64xf32>
    %246 = arith.addf %244, %245 : vector<8x64xf32>
    %247 = vector.extract_strided_slice %119 {offsets = [64, 0], sizes = [8, 64], strides = [1, 1]} : vector<96x64xf32> to vector<8x64xf32>
    %cst_58 = arith.constant dense<0.000000e+00> : vector<8x64xf32>
    %248 = tpu.matmul %241, %4, %cst_58 {dimension_numbers = #tpu.dot_dimension_numbers<[1], [0], [0], [1], [0, 0, 1, 1], [], []>} : vector<8x16xf32>, vector<16x64xf32>, vector<8x64xf32> -> vector<8x64xf32>
    %249 = arith.addf %247, %248 : vector<8x64xf32>
    %250 = vector.extract_strided_slice %246 {offsets = [0, 0], sizes = [8, 48], strides = [1, 1]} : vector<8x64xf32> to vector<8x48xf32>
    %251 = arith.negf %250 : vector<8x48xf32>
    %252 = math.exp %251 : vector<8x48xf32>
    %cst_59 = arith.constant 1.000000e+00 : f32
    %253 = vector.broadcast %cst_59 : f32 to vector<8x48xf32>
    %254 = arith.addf %253, %252 : vector<8x48xf32>
    %255 = arith.divf %253, %254 : vector<8x48xf32>
    %256 = vector.extract_strided_slice %246 {offsets = [0, 48], sizes = [8, 16], strides = [1, 1]} : vector<8x64xf32> to vector<8x16xf32>
    %257 = math.tanh %256 : vector<8x16xf32>
    %258 = vector.extract_strided_slice %255 {offsets = [0, 0], sizes = [8, 16], strides = [1, 1]} : vector<8x48xf32> to vector<8x16xf32>
    %259 = vector.extract_strided_slice %255 {offsets = [0, 16], sizes = [8, 16], strides = [1, 1]} : vector<8x48xf32> to vector<8x16xf32>
    %260 = vector.extract_strided_slice %255 {offsets = [0, 32], sizes = [8, 16], strides = [1, 1]} : vector<8x48xf32> to vector<8x16xf32>
    %261 = arith.mulf %259, %223 : vector<8x16xf32>
    %262 = arith.mulf %258, %257 : vector<8x16xf32>
    %263 = arith.addf %261, %262 : vector<8x16xf32>
    %264 = math.tanh %263 : vector<8x16xf32>
    %265 = arith.mulf %260, %264 : vector<8x16xf32>
    %266 = vector.extract_strided_slice %249 {offsets = [0, 0], sizes = [8, 48], strides = [1, 1]} : vector<8x64xf32> to vector<8x48xf32>
    %267 = arith.negf %266 : vector<8x48xf32>
    %268 = math.exp %267 : vector<8x48xf32>
    %cst_60 = arith.constant 1.000000e+00 : f32
    %269 = vector.broadcast %cst_60 : f32 to vector<8x48xf32>
    %270 = arith.addf %269, %268 : vector<8x48xf32>
    %271 = arith.divf %269, %270 : vector<8x48xf32>
    %272 = vector.extract_strided_slice %249 {offsets = [0, 48], sizes = [8, 16], strides = [1, 1]} : vector<8x64xf32> to vector<8x16xf32>
    %273 = math.tanh %272 : vector<8x16xf32>
    %274 = vector.extract_strided_slice %271 {offsets = [0, 0], sizes = [8, 16], strides = [1, 1]} : vector<8x48xf32> to vector<8x16xf32>
    %275 = vector.extract_strided_slice %271 {offsets = [0, 16], sizes = [8, 16], strides = [1, 1]} : vector<8x48xf32> to vector<8x16xf32>
    %276 = vector.extract_strided_slice %271 {offsets = [0, 32], sizes = [8, 16], strides = [1, 1]} : vector<8x48xf32> to vector<8x16xf32>
    %277 = arith.mulf %275, %239 : vector<8x16xf32>
    %278 = arith.mulf %274, %273 : vector<8x16xf32>
    %279 = arith.addf %277, %278 : vector<8x16xf32>
    %280 = math.tanh %279 : vector<8x16xf32>
    %281 = arith.mulf %276, %280 : vector<8x16xf32>
    %c0_61 = arith.constant 0 : index
    %c48 = arith.constant 48 : index
    %282 = vector.load %arg6[%c0_61, %c48] : memref<16x192xf32, #tpu.memory_space<vmem>>, vector<8x16xf32>
    tpu.vector_store %arg6[%c0_61, %c48], %265 {strides = array<i32>} : memref<16x192xf32, #tpu.memory_space<vmem>>, vector<8x16xf32>,
    %c8_62 = arith.constant 8 : index
    %c128_63 = arith.constant 128 : index
    %283 = vector.load %arg6[%c8_62, %c128_63] : memref<16x192xf32, #tpu.memory_space<vmem>>, vector<8x16xf32>
    tpu.vector_store %arg6[%c8_62, %c128_63], %281 {strides = array<i32>} : memref<16x192xf32, #tpu.memory_space<vmem>>, vector<8x16xf32>,
    %284 = vector.extract_strided_slice %116 {offsets = [32, 0], sizes = [8, 64], strides = [1, 1]} : vector<96x64xf32> to vector<8x64xf32>
    %cst_64 = arith.constant dense<0.000000e+00> : vector<8x64xf32>
    %285 = tpu.matmul %265, %3, %cst_64 {dimension_numbers = #tpu.dot_dimension_numbers<[1], [0], [0], [1], [0, 0, 1, 1], [], []>} : vector<8x16xf32>, vector<16x64xf32>, vector<8x64xf32> -> vector<8x64xf32>
    %286 = arith.addf %284, %285 : vector<8x64xf32>
    %287 = vector.extract_strided_slice %119 {offsets = [56, 0], sizes = [8, 64], strides = [1, 1]} : vector<96x64xf32> to vector<8x64xf32>
    %cst_65 = arith.constant dense<0.000000e+00> : vector<8x64xf32>
    %288 = tpu.matmul %281, %4, %cst_65 {dimension_numbers = #tpu.dot_dimension_numbers<[1], [0], [0], [1], [0, 0, 1, 1], [], []>} : vector<8x16xf32>, vector<16x64xf32>, vector<8x64xf32> -> vector<8x64xf32>
    %289 = arith.addf %287, %288 : vector<8x64xf32>
    %290 = vector.extract_strided_slice %286 {offsets = [0, 0], sizes = [8, 48], strides = [1, 1]} : vector<8x64xf32> to vector<8x48xf32>
    %291 = arith.negf %290 : vector<8x48xf32>
    %292 = math.exp %291 : vector<8x48xf32>
    %cst_66 = arith.constant 1.000000e+00 : f32
    %293 = vector.broadcast %cst_66 : f32 to vector<8x48xf32>
    %294 = arith.addf %293, %292 : vector<8x48xf32>
    %295 = arith.divf %293, %294 : vector<8x48xf32>
    %296 = vector.extract_strided_slice %286 {offsets = [0, 48], sizes = [8, 16], strides = [1, 1]} : vector<8x64xf32> to vector<8x16xf32>
    %297 = math.tanh %296 : vector<8x16xf32>
    %298 = vector.extract_strided_slice %295 {offsets = [0, 0], sizes = [8, 16], strides = [1, 1]} : vector<8x48xf32> to vector<8x16xf32>
    %299 = vector.extract_strided_slice %295 {offsets = [0, 16], sizes = [8, 16], strides = [1, 1]} : vector<8x48xf32> to vector<8x16xf32>
    %300 = vector.extract_strided_slice %295 {offsets = [0, 32], sizes = [8, 16], strides = [1, 1]} : vector<8x48xf32> to vector<8x16xf32>
    %301 = arith.mulf %299, %263 : vector<8x16xf32>
    %302 = arith.mulf %298, %297 : vector<8x16xf32>
    %303 = arith.addf %301, %302 : vector<8x16xf32>
    %304 = math.tanh %303 : vector<8x16xf32>
    %305 = arith.mulf %300, %304 : vector<8x16xf32>
    %306 = vector.extract_strided_slice %289 {offsets = [0, 0], sizes = [8, 48], strides = [1, 1]} : vector<8x64xf32> to vector<8x48xf32>
    %307 = arith.negf %306 : vector<8x48xf32>
    %308 = math.exp %307 : vector<8x48xf32>
    %cst_67 = arith.constant 1.000000e+00 : f32
    %309 = vector.broadcast %cst_67 : f32 to vector<8x48xf32>
    %310 = arith.addf %309, %308 : vector<8x48xf32>
    %311 = arith.divf %309, %310 : vector<8x48xf32>
    %312 = vector.extract_strided_slice %289 {offsets = [0, 48], sizes = [8, 16], strides = [1, 1]} : vector<8x64xf32> to vector<8x16xf32>
    %313 = math.tanh %312 : vector<8x16xf32>
    %314 = vector.extract_strided_slice %311 {offsets = [0, 0], sizes = [8, 16], strides = [1, 1]} : vector<8x48xf32> to vector<8x16xf32>
    %315 = vector.extract_strided_slice %311 {offsets = [0, 16], sizes = [8, 16], strides = [1, 1]} : vector<8x48xf32> to vector<8x16xf32>
    %316 = vector.extract_strided_slice %311 {offsets = [0, 32], sizes = [8, 16], strides = [1, 1]} : vector<8x48xf32> to vector<8x16xf32>
    %317 = arith.mulf %315, %279 : vector<8x16xf32>
    %318 = arith.mulf %314, %313 : vector<8x16xf32>
    %319 = arith.addf %317, %318 : vector<8x16xf32>
    %320 = math.tanh %319 : vector<8x16xf32>
    %321 = arith.mulf %316, %320 : vector<8x16xf32>
    %c0_68 = arith.constant 0 : index
    %c64 = arith.constant 64 : index
    %322 = vector.load %arg6[%c0_68, %c64] : memref<16x192xf32, #tpu.memory_space<vmem>>, vector<8x16xf32>
    tpu.vector_store %arg6[%c0_68, %c64], %305 {strides = array<i32>} : memref<16x192xf32, #tpu.memory_space<vmem>>, vector<8x16xf32>,
    %c8_69 = arith.constant 8 : index
    %c112 = arith.constant 112 : index
    %323 = vector.load %arg6[%c8_69, %c112] : memref<16x192xf32, #tpu.memory_space<vmem>>, vector<8x16xf32>
    tpu.vector_store %arg6[%c8_69, %c112], %321 {strides = array<i32>} : memref<16x192xf32, #tpu.memory_space<vmem>>, vector<8x16xf32>,
    %324 = vector.extract_strided_slice %116 {offsets = [40, 0], sizes = [8, 64], strides = [1, 1]} : vector<96x64xf32> to vector<8x64xf32>
    %cst_70 = arith.constant dense<0.000000e+00> : vector<8x64xf32>
    %325 = tpu.matmul %305, %3, %cst_70 {dimension_numbers = #tpu.dot_dimension_numbers<[1], [0], [0], [1], [0, 0, 1, 1], [], []>} : vector<8x16xf32>, vector<16x64xf32>, vector<8x64xf32> -> vector<8x64xf32>
    %326 = arith.addf %324, %325 : vector<8x64xf32>
    %327 = vector.extract_strided_slice %119 {offsets = [48, 0], sizes = [8, 64], strides = [1, 1]} : vector<96x64xf32> to vector<8x64xf32>
    %cst_71 = arith.constant dense<0.000000e+00> : vector<8x64xf32>
    %328 = tpu.matmul %321, %4, %cst_71 {dimension_numbers = #tpu.dot_dimension_numbers<[1], [0], [0], [1], [0, 0, 1, 1], [], []>} : vector<8x16xf32>, vector<16x64xf32>, vector<8x64xf32> -> vector<8x64xf32>
    %329 = arith.addf %327, %328 : vector<8x64xf32>
    %330 = vector.extract_strided_slice %326 {offsets = [0, 0], sizes = [8, 48], strides = [1, 1]} : vector<8x64xf32> to vector<8x48xf32>
    %331 = arith.negf %330 : vector<8x48xf32>
    %332 = math.exp %331 : vector<8x48xf32>
    %cst_72 = arith.constant 1.000000e+00 : f32
    %333 = vector.broadcast %cst_72 : f32 to vector<8x48xf32>
    %334 = arith.addf %333, %332 : vector<8x48xf32>
    %335 = arith.divf %333, %334 : vector<8x48xf32>
    %336 = vector.extract_strided_slice %326 {offsets = [0, 48], sizes = [8, 16], strides = [1, 1]} : vector<8x64xf32> to vector<8x16xf32>
    %337 = math.tanh %336 : vector<8x16xf32>
    %338 = vector.extract_strided_slice %335 {offsets = [0, 0], sizes = [8, 16], strides = [1, 1]} : vector<8x48xf32> to vector<8x16xf32>
    %339 = vector.extract_strided_slice %335 {offsets = [0, 16], sizes = [8, 16], strides = [1, 1]} : vector<8x48xf32> to vector<8x16xf32>
    %340 = vector.extract_strided_slice %335 {offsets = [0, 32], sizes = [8, 16], strides = [1, 1]} : vector<8x48xf32> to vector<8x16xf32>
    %341 = arith.mulf %339, %303 : vector<8x16xf32>
    %342 = arith.mulf %338, %337 : vector<8x16xf32>
    %343 = arith.addf %341, %342 : vector<8x16xf32>
    %344 = math.tanh %343 : vector<8x16xf32>
    %345 = arith.mulf %340, %344 : vector<8x16xf32>
    %346 = vector.extract_strided_slice %329 {offsets = [0, 0], sizes = [8, 48], strides = [1, 1]} : vector<8x64xf32> to vector<8x48xf32>
    %347 = arith.negf %346 : vector<8x48xf32>
    %348 = math.exp %347 : vector<8x48xf32>
    %cst_73 = arith.constant 1.000000e+00 : f32
    %349 = vector.broadcast %cst_73 : f32 to vector<8x48xf32>
    %350 = arith.addf %349, %348 : vector<8x48xf32>
    %351 = arith.divf %349, %350 : vector<8x48xf32>
    %352 = vector.extract_strided_slice %329 {offsets = [0, 48], sizes = [8, 16], strides = [1, 1]} : vector<8x64xf32> to vector<8x16xf32>
    %353 = math.tanh %352 : vector<8x16xf32>
    %354 = vector.extract_strided_slice %351 {offsets = [0, 0], sizes = [8, 16], strides = [1, 1]} : vector<8x48xf32> to vector<8x16xf32>
    %355 = vector.extract_strided_slice %351 {offsets = [0, 16], sizes = [8, 16], strides = [1, 1]} : vector<8x48xf32> to vector<8x16xf32>
    %356 = vector.extract_strided_slice %351 {offsets = [0, 32], sizes = [8, 16], strides = [1, 1]} : vector<8x48xf32> to vector<8x16xf32>
    %357 = arith.mulf %355, %319 : vector<8x16xf32>
    %358 = arith.mulf %354, %353 : vector<8x16xf32>
    %359 = arith.addf %357, %358 : vector<8x16xf32>
    %360 = math.tanh %359 : vector<8x16xf32>
    %361 = arith.mulf %356, %360 : vector<8x16xf32>
    %c0_74 = arith.constant 0 : index
    %c80 = arith.constant 80 : index
    %362 = vector.load %arg6[%c0_74, %c80] : memref<16x192xf32, #tpu.memory_space<vmem>>, vector<8x16xf32>
    tpu.vector_store %arg6[%c0_74, %c80], %345 {strides = array<i32>} : memref<16x192xf32, #tpu.memory_space<vmem>>, vector<8x16xf32>,
    %c8_75 = arith.constant 8 : index
    %c96 = arith.constant 96 : index
    %363 = vector.load %arg6[%c8_75, %c96] : memref<16x192xf32, #tpu.memory_space<vmem>>, vector<8x16xf32>
    tpu.vector_store %arg6[%c8_75, %c96], %361 {strides = array<i32>} : memref<16x192xf32, #tpu.memory_space<vmem>>, vector<8x16xf32>,
    %364 = vector.extract_strided_slice %116 {offsets = [48, 0], sizes = [8, 64], strides = [1, 1]} : vector<96x64xf32> to vector<8x64xf32>
    %cst_76 = arith.constant dense<0.000000e+00> : vector<8x64xf32>
    %365 = tpu.matmul %345, %3, %cst_76 {dimension_numbers = #tpu.dot_dimension_numbers<[1], [0], [0], [1], [0, 0, 1, 1], [], []>} : vector<8x16xf32>, vector<16x64xf32>, vector<8x64xf32> -> vector<8x64xf32>
    %366 = arith.addf %364, %365 : vector<8x64xf32>
    %367 = vector.extract_strided_slice %119 {offsets = [40, 0], sizes = [8, 64], strides = [1, 1]} : vector<96x64xf32> to vector<8x64xf32>
    %cst_77 = arith.constant dense<0.000000e+00> : vector<8x64xf32>
    %368 = tpu.matmul %361, %4, %cst_77 {dimension_numbers = #tpu.dot_dimension_numbers<[1], [0], [0], [1], [0, 0, 1, 1], [], []>} : vector<8x16xf32>, vector<16x64xf32>, vector<8x64xf32> -> vector<8x64xf32>
    %369 = arith.addf %367, %368 : vector<8x64xf32>
    %370 = vector.extract_strided_slice %366 {offsets = [0, 0], sizes = [8, 48], strides = [1, 1]} : vector<8x64xf32> to vector<8x48xf32>
    %371 = arith.negf %370 : vector<8x48xf32>
    %372 = math.exp %371 : vector<8x48xf32>
    %cst_78 = arith.constant 1.000000e+00 : f32
    %373 = vector.broadcast %cst_78 : f32 to vector<8x48xf32>
    %374 = arith.addf %373, %372 : vector<8x48xf32>
    %375 = arith.divf %373, %374 : vector<8x48xf32>
    %376 = vector.extract_strided_slice %366 {offsets = [0, 48], sizes = [8, 16], strides = [1, 1]} : vector<8x64xf32> to vector<8x16xf32>
    %377 = math.tanh %376 : vector<8x16xf32>
    %378 = vector.extract_strided_slice %375 {offsets = [0, 0], sizes = [8, 16], strides = [1, 1]} : vector<8x48xf32> to vector<8x16xf32>
    %379 = vector.extract_strided_slice %375 {offsets = [0, 16], sizes = [8, 16], strides = [1, 1]} : vector<8x48xf32> to vector<8x16xf32>
    %380 = vector.extract_strided_slice %375 {offsets = [0, 32], sizes = [8, 16], strides = [1, 1]} : vector<8x48xf32> to vector<8x16xf32>
    %381 = arith.mulf %379, %343 : vector<8x16xf32>
    %382 = arith.mulf %378, %377 : vector<8x16xf32>
    %383 = arith.addf %381, %382 : vector<8x16xf32>
    %384 = math.tanh %383 : vector<8x16xf32>
    %385 = arith.mulf %380, %384 : vector<8x16xf32>
    %386 = vector.extract_strided_slice %369 {offsets = [0, 0], sizes = [8, 48], strides = [1, 1]} : vector<8x64xf32> to vector<8x48xf32>
    %387 = arith.negf %386 : vector<8x48xf32>
    %388 = math.exp %387 : vector<8x48xf32>
    %cst_79 = arith.constant 1.000000e+00 : f32
    %389 = vector.broadcast %cst_79 : f32 to vector<8x48xf32>
    %390 = arith.addf %389, %388 : vector<8x48xf32>
    %391 = arith.divf %389, %390 : vector<8x48xf32>
    %392 = vector.extract_strided_slice %369 {offsets = [0, 48], sizes = [8, 16], strides = [1, 1]} : vector<8x64xf32> to vector<8x16xf32>
    %393 = math.tanh %392 : vector<8x16xf32>
    %394 = vector.extract_strided_slice %391 {offsets = [0, 0], sizes = [8, 16], strides = [1, 1]} : vector<8x48xf32> to vector<8x16xf32>
    %395 = vector.extract_strided_slice %391 {offsets = [0, 16], sizes = [8, 16], strides = [1, 1]} : vector<8x48xf32> to vector<8x16xf32>
    %396 = vector.extract_strided_slice %391 {offsets = [0, 32], sizes = [8, 16], strides = [1, 1]} : vector<8x48xf32> to vector<8x16xf32>
    %397 = arith.mulf %395, %359 : vector<8x16xf32>
    %398 = arith.mulf %394, %393 : vector<8x16xf32>
    %399 = arith.addf %397, %398 : vector<8x16xf32>
    %400 = math.tanh %399 : vector<8x16xf32>
    %401 = arith.mulf %396, %400 : vector<8x16xf32>
    %c0_80 = arith.constant 0 : index
    %c96_81 = arith.constant 96 : index
    %402 = vector.load %arg6[%c0_80, %c96_81] : memref<16x192xf32, #tpu.memory_space<vmem>>, vector<8x16xf32>
    tpu.vector_store %arg6[%c0_80, %c96_81], %385 {strides = array<i32>} : memref<16x192xf32, #tpu.memory_space<vmem>>, vector<8x16xf32>,
    %c8_82 = arith.constant 8 : index
    %c80_83 = arith.constant 80 : index
    %403 = vector.load %arg6[%c8_82, %c80_83] : memref<16x192xf32, #tpu.memory_space<vmem>>, vector<8x16xf32>
    tpu.vector_store %arg6[%c8_82, %c80_83], %401 {strides = array<i32>} : memref<16x192xf32, #tpu.memory_space<vmem>>, vector<8x16xf32>,
    %404 = vector.extract_strided_slice %116 {offsets = [56, 0], sizes = [8, 64], strides = [1, 1]} : vector<96x64xf32> to vector<8x64xf32>
    %cst_84 = arith.constant dense<0.000000e+00> : vector<8x64xf32>
    %405 = tpu.matmul %385, %3, %cst_84 {dimension_numbers = #tpu.dot_dimension_numbers<[1], [0], [0], [1], [0, 0, 1, 1], [], []>} : vector<8x16xf32>, vector<16x64xf32>, vector<8x64xf32> -> vector<8x64xf32>
    %406 = arith.addf %404, %405 : vector<8x64xf32>
    %407 = vector.extract_strided_slice %119 {offsets = [32, 0], sizes = [8, 64], strides = [1, 1]} : vector<96x64xf32> to vector<8x64xf32>
    %cst_85 = arith.constant dense<0.000000e+00> : vector<8x64xf32>
    %408 = tpu.matmul %401, %4, %cst_85 {dimension_numbers = #tpu.dot_dimension_numbers<[1], [0], [0], [1], [0, 0, 1, 1], [], []>} : vector<8x16xf32>, vector<16x64xf32>, vector<8x64xf32> -> vector<8x64xf32>
    %409 = arith.addf %407, %408 : vector<8x64xf32>
    %410 = vector.extract_strided_slice %406 {offsets = [0, 0], sizes = [8, 48], strides = [1, 1]} : vector<8x64xf32> to vector<8x48xf32>
    %411 = arith.negf %410 : vector<8x48xf32>
    %412 = math.exp %411 : vector<8x48xf32>
    %cst_86 = arith.constant 1.000000e+00 : f32
    %413 = vector.broadcast %cst_86 : f32 to vector<8x48xf32>
    %414 = arith.addf %413, %412 : vector<8x48xf32>
    %415 = arith.divf %413, %414 : vector<8x48xf32>
    %416 = vector.extract_strided_slice %406 {offsets = [0, 48], sizes = [8, 16], strides = [1, 1]} : vector<8x64xf32> to vector<8x16xf32>
    %417 = math.tanh %416 : vector<8x16xf32>
    %418 = vector.extract_strided_slice %415 {offsets = [0, 0], sizes = [8, 16], strides = [1, 1]} : vector<8x48xf32> to vector<8x16xf32>
    %419 = vector.extract_strided_slice %415 {offsets = [0, 16], sizes = [8, 16], strides = [1, 1]} : vector<8x48xf32> to vector<8x16xf32>
    %420 = vector.extract_strided_slice %415 {offsets = [0, 32], sizes = [8, 16], strides = [1, 1]} : vector<8x48xf32> to vector<8x16xf32>
    %421 = arith.mulf %419, %383 : vector<8x16xf32>
    %422 = arith.mulf %418, %417 : vector<8x16xf32>
    %423 = arith.addf %421, %422 : vector<8x16xf32>
    %424 = math.tanh %423 : vector<8x16xf32>
    %425 = arith.mulf %420, %424 : vector<8x16xf32>
    %426 = vector.extract_strided_slice %409 {offsets = [0, 0], sizes = [8, 48], strides = [1, 1]} : vector<8x64xf32> to vector<8x48xf32>
    %427 = arith.negf %426 : vector<8x48xf32>
    %428 = math.exp %427 : vector<8x48xf32>
    %cst_87 = arith.constant 1.000000e+00 : f32
    %429 = vector.broadcast %cst_87 : f32 to vector<8x48xf32>
    %430 = arith.addf %429, %428 : vector<8x48xf32>
    %431 = arith.divf %429, %430 : vector<8x48xf32>
    %432 = vector.extract_strided_slice %409 {offsets = [0, 48], sizes = [8, 16], strides = [1, 1]} : vector<8x64xf32> to vector<8x16xf32>
    %433 = math.tanh %432 : vector<8x16xf32>
    %434 = vector.extract_strided_slice %431 {offsets = [0, 0], sizes = [8, 16], strides = [1, 1]} : vector<8x48xf32> to vector<8x16xf32>
    %435 = vector.extract_strided_slice %431 {offsets = [0, 16], sizes = [8, 16], strides = [1, 1]} : vector<8x48xf32> to vector<8x16xf32>
    %436 = vector.extract_strided_slice %431 {offsets = [0, 32], sizes = [8, 16], strides = [1, 1]} : vector<8x48xf32> to vector<8x16xf32>
    %437 = arith.mulf %435, %399 : vector<8x16xf32>
    %438 = arith.mulf %434, %433 : vector<8x16xf32>
    %439 = arith.addf %437, %438 : vector<8x16xf32>
    %440 = math.tanh %439 : vector<8x16xf32>
    %441 = arith.mulf %436, %440 : vector<8x16xf32>
    %c0_88 = arith.constant 0 : index
    %c112_89 = arith.constant 112 : index
    %442 = vector.load %arg6[%c0_88, %c112_89] : memref<16x192xf32, #tpu.memory_space<vmem>>, vector<8x16xf32>
    tpu.vector_store %arg6[%c0_88, %c112_89], %425 {strides = array<i32>} : memref<16x192xf32, #tpu.memory_space<vmem>>, vector<8x16xf32>,
    %c8_90 = arith.constant 8 : index
    %c64_91 = arith.constant 64 : index
    %443 = vector.load %arg6[%c8_90, %c64_91] : memref<16x192xf32, #tpu.memory_space<vmem>>, vector<8x16xf32>
    tpu.vector_store %arg6[%c8_90, %c64_91], %441 {strides = array<i32>} : memref<16x192xf32, #tpu.memory_space<vmem>>, vector<8x16xf32>,
    %444 = vector.extract_strided_slice %116 {offsets = [64, 0], sizes = [8, 64], strides = [1, 1]} : vector<96x64xf32> to vector<8x64xf32>
    %cst_92 = arith.constant dense<0.000000e+00> : vector<8x64xf32>
    %445 = tpu.matmul %425, %3, %cst_92 {dimension_numbers = #tpu.dot_dimension_numbers<[1], [0], [0], [1], [0, 0, 1, 1], [], []>} : vector<8x16xf32>, vector<16x64xf32>, vector<8x64xf32> -> vector<8x64xf32>
    %446 = arith.addf %444, %445 : vector<8x64xf32>
    %447 = vector.extract_strided_slice %119 {offsets = [24, 0], sizes = [8, 64], strides = [1, 1]} : vector<96x64xf32> to vector<8x64xf32>
    %cst_93 = arith.constant dense<0.000000e+00> : vector<8x64xf32>
    %448 = tpu.matmul %441, %4, %cst_93 {dimension_numbers = #tpu.dot_dimension_numbers<[1], [0], [0], [1], [0, 0, 1, 1], [], []>} : vector<8x16xf32>, vector<16x64xf32>, vector<8x64xf32> -> vector<8x64xf32>
    %449 = arith.addf %447, %448 : vector<8x64xf32>
    %450 = vector.extract_strided_slice %446 {offsets = [0, 0], sizes = [8, 48], strides = [1, 1]} : vector<8x64xf32> to vector<8x48xf32>
    %451 = arith.negf %450 : vector<8x48xf32>
    %452 = math.exp %451 : vector<8x48xf32>
    %cst_94 = arith.constant 1.000000e+00 : f32
    %453 = vector.broadcast %cst_94 : f32 to vector<8x48xf32>
    %454 = arith.addf %453, %452 : vector<8x48xf32>
    %455 = arith.divf %453, %454 : vector<8x48xf32>
    %456 = vector.extract_strided_slice %446 {offsets = [0, 48], sizes = [8, 16], strides = [1, 1]} : vector<8x64xf32> to vector<8x16xf32>
    %457 = math.tanh %456 : vector<8x16xf32>
    %458 = vector.extract_strided_slice %455 {offsets = [0, 0], sizes = [8, 16], strides = [1, 1]} : vector<8x48xf32> to vector<8x16xf32>
    %459 = vector.extract_strided_slice %455 {offsets = [0, 16], sizes = [8, 16], strides = [1, 1]} : vector<8x48xf32> to vector<8x16xf32>
    %460 = vector.extract_strided_slice %455 {offsets = [0, 32], sizes = [8, 16], strides = [1, 1]} : vector<8x48xf32> to vector<8x16xf32>
    %461 = arith.mulf %459, %423 : vector<8x16xf32>
    %462 = arith.mulf %458, %457 : vector<8x16xf32>
    %463 = arith.addf %461, %462 : vector<8x16xf32>
    %464 = math.tanh %463 : vector<8x16xf32>
    %465 = arith.mulf %460, %464 : vector<8x16xf32>
    %466 = vector.extract_strided_slice %449 {offsets = [0, 0], sizes = [8, 48], strides = [1, 1]} : vector<8x64xf32> to vector<8x48xf32>
    %467 = arith.negf %466 : vector<8x48xf32>
    %468 = math.exp %467 : vector<8x48xf32>
    %cst_95 = arith.constant 1.000000e+00 : f32
    %469 = vector.broadcast %cst_95 : f32 to vector<8x48xf32>
    %470 = arith.addf %469, %468 : vector<8x48xf32>
    %471 = arith.divf %469, %470 : vector<8x48xf32>
    %472 = vector.extract_strided_slice %449 {offsets = [0, 48], sizes = [8, 16], strides = [1, 1]} : vector<8x64xf32> to vector<8x16xf32>
    %473 = math.tanh %472 : vector<8x16xf32>
    %474 = vector.extract_strided_slice %471 {offsets = [0, 0], sizes = [8, 16], strides = [1, 1]} : vector<8x48xf32> to vector<8x16xf32>
    %475 = vector.extract_strided_slice %471 {offsets = [0, 16], sizes = [8, 16], strides = [1, 1]} : vector<8x48xf32> to vector<8x16xf32>
    %476 = vector.extract_strided_slice %471 {offsets = [0, 32], sizes = [8, 16], strides = [1, 1]} : vector<8x48xf32> to vector<8x16xf32>
    %477 = arith.mulf %475, %439 : vector<8x16xf32>
    %478 = arith.mulf %474, %473 : vector<8x16xf32>
    %479 = arith.addf %477, %478 : vector<8x16xf32>
    %480 = math.tanh %479 : vector<8x16xf32>
    %481 = arith.mulf %476, %480 : vector<8x16xf32>
    %c0_96 = arith.constant 0 : index
    %c128_97 = arith.constant 128 : index
    %482 = vector.load %arg6[%c0_96, %c128_97] : memref<16x192xf32, #tpu.memory_space<vmem>>, vector<8x16xf32>
    tpu.vector_store %arg6[%c0_96, %c128_97], %465 {strides = array<i32>} : memref<16x192xf32, #tpu.memory_space<vmem>>, vector<8x16xf32>,
    %c8_98 = arith.constant 8 : index
    %c48_99 = arith.constant 48 : index
    %483 = vector.load %arg6[%c8_98, %c48_99] : memref<16x192xf32, #tpu.memory_space<vmem>>, vector<8x16xf32>
    tpu.vector_store %arg6[%c8_98, %c48_99], %481 {strides = array<i32>} : memref<16x192xf32, #tpu.memory_space<vmem>>, vector<8x16xf32>,
    %484 = vector.extract_strided_slice %116 {offsets = [72, 0], sizes = [8, 64], strides = [1, 1]} : vector<96x64xf32> to vector<8x64xf32>
    %cst_100 = arith.constant dense<0.000000e+00> : vector<8x64xf32>
    %485 = tpu.matmul %465, %3, %cst_100 {dimension_numbers = #tpu.dot_dimension_numbers<[1], [0], [0], [1], [0, 0, 1, 1], [], []>} : vector<8x16xf32>, vector<16x64xf32>, vector<8x64xf32> -> vector<8x64xf32>
    %486 = arith.addf %484, %485 : vector<8x64xf32>
    %487 = vector.extract_strided_slice %119 {offsets = [16, 0], sizes = [8, 64], strides = [1, 1]} : vector<96x64xf32> to vector<8x64xf32>
    %cst_101 = arith.constant dense<0.000000e+00> : vector<8x64xf32>
    %488 = tpu.matmul %481, %4, %cst_101 {dimension_numbers = #tpu.dot_dimension_numbers<[1], [0], [0], [1], [0, 0, 1, 1], [], []>} : vector<8x16xf32>, vector<16x64xf32>, vector<8x64xf32> -> vector<8x64xf32>
    %489 = arith.addf %487, %488 : vector<8x64xf32>
    %490 = vector.extract_strided_slice %486 {offsets = [0, 0], sizes = [8, 48], strides = [1, 1]} : vector<8x64xf32> to vector<8x48xf32>
    %491 = arith.negf %490 : vector<8x48xf32>
    %492 = math.exp %491 : vector<8x48xf32>
    %cst_102 = arith.constant 1.000000e+00 : f32
    %493 = vector.broadcast %cst_102 : f32 to vector<8x48xf32>
    %494 = arith.addf %493, %492 : vector<8x48xf32>
    %495 = arith.divf %493, %494 : vector<8x48xf32>
    %496 = vector.extract_strided_slice %486 {offsets = [0, 48], sizes = [8, 16], strides = [1, 1]} : vector<8x64xf32> to vector<8x16xf32>
    %497 = math.tanh %496 : vector<8x16xf32>
    %498 = vector.extract_strided_slice %495 {offsets = [0, 0], sizes = [8, 16], strides = [1, 1]} : vector<8x48xf32> to vector<8x16xf32>
    %499 = vector.extract_strided_slice %495 {offsets = [0, 16], sizes = [8, 16], strides = [1, 1]} : vector<8x48xf32> to vector<8x16xf32>
    %500 = vector.extract_strided_slice %495 {offsets = [0, 32], sizes = [8, 16], strides = [1, 1]} : vector<8x48xf32> to vector<8x16xf32>
    %501 = arith.mulf %499, %463 : vector<8x16xf32>
    %502 = arith.mulf %498, %497 : vector<8x16xf32>
    %503 = arith.addf %501, %502 : vector<8x16xf32>
    %504 = math.tanh %503 : vector<8x16xf32>
    %505 = arith.mulf %500, %504 : vector<8x16xf32>
    %506 = vector.extract_strided_slice %489 {offsets = [0, 0], sizes = [8, 48], strides = [1, 1]} : vector<8x64xf32> to vector<8x48xf32>
    %507 = arith.negf %506 : vector<8x48xf32>
    %508 = math.exp %507 : vector<8x48xf32>
    %cst_103 = arith.constant 1.000000e+00 : f32
    %509 = vector.broadcast %cst_103 : f32 to vector<8x48xf32>
    %510 = arith.addf %509, %508 : vector<8x48xf32>
    %511 = arith.divf %509, %510 : vector<8x48xf32>
    %512 = vector.extract_strided_slice %489 {offsets = [0, 48], sizes = [8, 16], strides = [1, 1]} : vector<8x64xf32> to vector<8x16xf32>
    %513 = math.tanh %512 : vector<8x16xf32>
    %514 = vector.extract_strided_slice %511 {offsets = [0, 0], sizes = [8, 16], strides = [1, 1]} : vector<8x48xf32> to vector<8x16xf32>
    %515 = vector.extract_strided_slice %511 {offsets = [0, 16], sizes = [8, 16], strides = [1, 1]} : vector<8x48xf32> to vector<8x16xf32>
    %516 = vector.extract_strided_slice %511 {offsets = [0, 32], sizes = [8, 16], strides = [1, 1]} : vector<8x48xf32> to vector<8x16xf32>
    %517 = arith.mulf %515, %479 : vector<8x16xf32>
    %518 = arith.mulf %514, %513 : vector<8x16xf32>
    %519 = arith.addf %517, %518 : vector<8x16xf32>
    %520 = math.tanh %519 : vector<8x16xf32>
    %521 = arith.mulf %516, %520 : vector<8x16xf32>
    %c0_104 = arith.constant 0 : index
    %c144_105 = arith.constant 144 : index
    %522 = vector.load %arg6[%c0_104, %c144_105] : memref<16x192xf32, #tpu.memory_space<vmem>>, vector<8x16xf32>
    tpu.vector_store %arg6[%c0_104, %c144_105], %505 {strides = array<i32>} : memref<16x192xf32, #tpu.memory_space<vmem>>, vector<8x16xf32>,
    %c8_106 = arith.constant 8 : index
    %c32_107 = arith.constant 32 : index
    %523 = vector.load %arg6[%c8_106, %c32_107] : memref<16x192xf32, #tpu.memory_space<vmem>>, vector<8x16xf32>
    tpu.vector_store %arg6[%c8_106, %c32_107], %521 {strides = array<i32>} : memref<16x192xf32, #tpu.memory_space<vmem>>, vector<8x16xf32>,
    %524 = vector.extract_strided_slice %116 {offsets = [80, 0], sizes = [8, 64], strides = [1, 1]} : vector<96x64xf32> to vector<8x64xf32>
    %cst_108 = arith.constant dense<0.000000e+00> : vector<8x64xf32>
    %525 = tpu.matmul %505, %3, %cst_108 {dimension_numbers = #tpu.dot_dimension_numbers<[1], [0], [0], [1], [0, 0, 1, 1], [], []>} : vector<8x16xf32>, vector<16x64xf32>, vector<8x64xf32> -> vector<8x64xf32>
    %526 = arith.addf %524, %525 : vector<8x64xf32>
    %527 = vector.extract_strided_slice %119 {offsets = [8, 0], sizes = [8, 64], strides = [1, 1]} : vector<96x64xf32> to vector<8x64xf32>
    %cst_109 = arith.constant dense<0.000000e+00> : vector<8x64xf32>
    %528 = tpu.matmul %521, %4, %cst_109 {dimension_numbers = #tpu.dot_dimension_numbers<[1], [0], [0], [1], [0, 0, 1, 1], [], []>} : vector<8x16xf32>, vector<16x64xf32>, vector<8x64xf32> -> vector<8x64xf32>
    %529 = arith.addf %527, %528 : vector<8x64xf32>
    %530 = vector.extract_strided_slice %526 {offsets = [0, 0], sizes = [8, 48], strides = [1, 1]} : vector<8x64xf32> to vector<8x48xf32>
    %531 = arith.negf %530 : vector<8x48xf32>
    %532 = math.exp %531 : vector<8x48xf32>
    %cst_110 = arith.constant 1.000000e+00 : f32
    %533 = vector.broadcast %cst_110 : f32 to vector<8x48xf32>
    %534 = arith.addf %533, %532 : vector<8x48xf32>
    %535 = arith.divf %533, %534 : vector<8x48xf32>
    %536 = vector.extract_strided_slice %526 {offsets = [0, 48], sizes = [8, 16], strides = [1, 1]} : vector<8x64xf32> to vector<8x16xf32>
    %537 = math.tanh %536 : vector<8x16xf32>
    %538 = vector.extract_strided_slice %535 {offsets = [0, 0], sizes = [8, 16], strides = [1, 1]} : vector<8x48xf32> to vector<8x16xf32>
    %539 = vector.extract_strided_slice %535 {offsets = [0, 16], sizes = [8, 16], strides = [1, 1]} : vector<8x48xf32> to vector<8x16xf32>
    %540 = vector.extract_strided_slice %535 {offsets = [0, 32], sizes = [8, 16], strides = [1, 1]} : vector<8x48xf32> to vector<8x16xf32>
    %541 = arith.mulf %539, %503 : vector<8x16xf32>
    %542 = arith.mulf %538, %537 : vector<8x16xf32>
    %543 = arith.addf %541, %542 : vector<8x16xf32>
    %544 = math.tanh %543 : vector<8x16xf32>
    %545 = arith.mulf %540, %544 : vector<8x16xf32>
    %546 = vector.extract_strided_slice %529 {offsets = [0, 0], sizes = [8, 48], strides = [1, 1]} : vector<8x64xf32> to vector<8x48xf32>
    %547 = arith.negf %546 : vector<8x48xf32>
    %548 = math.exp %547 : vector<8x48xf32>
    %cst_111 = arith.constant 1.000000e+00 : f32
    %549 = vector.broadcast %cst_111 : f32 to vector<8x48xf32>
    %550 = arith.addf %549, %548 : vector<8x48xf32>
    %551 = arith.divf %549, %550 : vector<8x48xf32>
    %552 = vector.extract_strided_slice %529 {offsets = [0, 48], sizes = [8, 16], strides = [1, 1]} : vector<8x64xf32> to vector<8x16xf32>
    %553 = math.tanh %552 : vector<8x16xf32>
    %554 = vector.extract_strided_slice %551 {offsets = [0, 0], sizes = [8, 16], strides = [1, 1]} : vector<8x48xf32> to vector<8x16xf32>
    %555 = vector.extract_strided_slice %551 {offsets = [0, 16], sizes = [8, 16], strides = [1, 1]} : vector<8x48xf32> to vector<8x16xf32>
    %556 = vector.extract_strided_slice %551 {offsets = [0, 32], sizes = [8, 16], strides = [1, 1]} : vector<8x48xf32> to vector<8x16xf32>
    %557 = arith.mulf %555, %519 : vector<8x16xf32>
    %558 = arith.mulf %554, %553 : vector<8x16xf32>
    %559 = arith.addf %557, %558 : vector<8x16xf32>
    %560 = math.tanh %559 : vector<8x16xf32>
    %561 = arith.mulf %556, %560 : vector<8x16xf32>
    %c0_112 = arith.constant 0 : index
    %c160_113 = arith.constant 160 : index
    %562 = vector.load %arg6[%c0_112, %c160_113] : memref<16x192xf32, #tpu.memory_space<vmem>>, vector<8x16xf32>
    tpu.vector_store %arg6[%c0_112, %c160_113], %545 {strides = array<i32>} : memref<16x192xf32, #tpu.memory_space<vmem>>, vector<8x16xf32>,
    %c8_114 = arith.constant 8 : index
    %c16_115 = arith.constant 16 : index
    %563 = vector.load %arg6[%c8_114, %c16_115] : memref<16x192xf32, #tpu.memory_space<vmem>>, vector<8x16xf32>
    tpu.vector_store %arg6[%c8_114, %c16_115], %561 {strides = array<i32>} : memref<16x192xf32, #tpu.memory_space<vmem>>, vector<8x16xf32>,
    %564 = vector.extract_strided_slice %116 {offsets = [88, 0], sizes = [8, 64], strides = [1, 1]} : vector<96x64xf32> to vector<8x64xf32>
    %cst_116 = arith.constant dense<0.000000e+00> : vector<8x64xf32>
    %565 = tpu.matmul %545, %3, %cst_116 {dimension_numbers = #tpu.dot_dimension_numbers<[1], [0], [0], [1], [0, 0, 1, 1], [], []>} : vector<8x16xf32>, vector<16x64xf32>, vector<8x64xf32> -> vector<8x64xf32>
    %566 = arith.addf %564, %565 : vector<8x64xf32>
    %567 = vector.extract_strided_slice %119 {offsets = [0, 0], sizes = [8, 64], strides = [1, 1]} : vector<96x64xf32> to vector<8x64xf32>
    %cst_117 = arith.constant dense<0.000000e+00> : vector<8x64xf32>
    %568 = tpu.matmul %561, %4, %cst_117 {dimension_numbers = #tpu.dot_dimension_numbers<[1], [0], [0], [1], [0, 0, 1, 1], [], []>} : vector<8x16xf32>, vector<16x64xf32>, vector<8x64xf32> -> vector<8x64xf32>
    %569 = arith.addf %567, %568 : vector<8x64xf32>
    %570 = vector.extract_strided_slice %566 {offsets = [0, 0], sizes = [8, 48], strides = [1, 1]} : vector<8x64xf32> to vector<8x48xf32>
    %571 = arith.negf %570 : vector<8x48xf32>
    %572 = math.exp %571 : vector<8x48xf32>
    %cst_118 = arith.constant 1.000000e+00 : f32
    %573 = vector.broadcast %cst_118 : f32 to vector<8x48xf32>
    %574 = arith.addf %573, %572 : vector<8x48xf32>
    %575 = arith.divf %573, %574 : vector<8x48xf32>
    %576 = vector.extract_strided_slice %566 {offsets = [0, 48], sizes = [8, 16], strides = [1, 1]} : vector<8x64xf32> to vector<8x16xf32>
    %577 = math.tanh %576 : vector<8x16xf32>
    %578 = vector.extract_strided_slice %575 {offsets = [0, 0], sizes = [8, 16], strides = [1, 1]} : vector<8x48xf32> to vector<8x16xf32>
    %579 = vector.extract_strided_slice %575 {offsets = [0, 16], sizes = [8, 16], strides = [1, 1]} : vector<8x48xf32> to vector<8x16xf32>
    %580 = vector.extract_strided_slice %575 {offsets = [0, 32], sizes = [8, 16], strides = [1, 1]} : vector<8x48xf32> to vector<8x16xf32>
    %581 = arith.mulf %579, %543 : vector<8x16xf32>
    %582 = arith.mulf %578, %577 : vector<8x16xf32>
    %583 = arith.addf %581, %582 : vector<8x16xf32>
    %584 = math.tanh %583 : vector<8x16xf32>
    %585 = arith.mulf %580, %584 : vector<8x16xf32>
    %586 = vector.extract_strided_slice %569 {offsets = [0, 0], sizes = [8, 48], strides = [1, 1]} : vector<8x64xf32> to vector<8x48xf32>
    %587 = arith.negf %586 : vector<8x48xf32>
    %588 = math.exp %587 : vector<8x48xf32>
    %cst_119 = arith.constant 1.000000e+00 : f32
    %589 = vector.broadcast %cst_119 : f32 to vector<8x48xf32>
    %590 = arith.addf %589, %588 : vector<8x48xf32>
    %591 = arith.divf %589, %590 : vector<8x48xf32>
    %592 = vector.extract_strided_slice %569 {offsets = [0, 48], sizes = [8, 16], strides = [1, 1]} : vector<8x64xf32> to vector<8x16xf32>
    %593 = math.tanh %592 : vector<8x16xf32>
    %594 = vector.extract_strided_slice %591 {offsets = [0, 0], sizes = [8, 16], strides = [1, 1]} : vector<8x48xf32> to vector<8x16xf32>
    %595 = vector.extract_strided_slice %591 {offsets = [0, 16], sizes = [8, 16], strides = [1, 1]} : vector<8x48xf32> to vector<8x16xf32>
    %596 = vector.extract_strided_slice %591 {offsets = [0, 32], sizes = [8, 16], strides = [1, 1]} : vector<8x48xf32> to vector<8x16xf32>
    %597 = arith.mulf %595, %559 : vector<8x16xf32>
    %598 = arith.mulf %594, %593 : vector<8x16xf32>
    %599 = arith.addf %597, %598 : vector<8x16xf32>
    %600 = math.tanh %599 : vector<8x16xf32>
    %601 = arith.mulf %596, %600 : vector<8x16xf32>
    %c0_120 = arith.constant 0 : index
    %c176_121 = arith.constant 176 : index
    %602 = vector.load %arg6[%c0_120, %c176_121] : memref<16x192xf32, #tpu.memory_space<vmem>>, vector<8x16xf32>
    tpu.vector_store %arg6[%c0_120, %c176_121], %585 {strides = array<i32>} : memref<16x192xf32, #tpu.memory_space<vmem>>, vector<8x16xf32>,
    %c8_122 = arith.constant 8 : index
    %c0_123 = arith.constant 0 : index
    %603 = vector.load %arg6[%c8_122, %c0_123] : memref<16x192xf32, #tpu.memory_space<vmem>>, vector<8x16xf32>
    tpu.vector_store %arg6[%c8_122, %c0_123], %601 {strides = array<i32>} : memref<16x192xf32, #tpu.memory_space<vmem>>, vector<8x16xf32>,
    %c0_124 = arith.constant 0 : index
    %c0_125 = arith.constant 0 : index
    %604 = vector.load %arg6[%c0_124, %c0_125] : memref<16x192xf32, #tpu.memory_space<vmem>>, vector<16x192xf32>
    %605 = vector.extract_strided_slice %604 {offsets = [0, 0], sizes = [8, 192], strides = [1, 1]} : vector<16x192xf32> to vector<8x192xf32>
    %c0_126 = arith.constant 0 : index
    %c0_127 = arith.constant 0 : index
    %606 = vector.load %arg4[%c0_126, %c0_127] : memref<384x4xf32, #tpu.memory_space<vmem>>, vector<192x4xf32>
    %cst_128 = arith.constant dense<0.000000e+00> : vector<8x4xf32>
    %607 = tpu.matmul %605, %606, %cst_128 {dimension_numbers = #tpu.dot_dimension_numbers<[1], [0], [0], [1], [0, 0, 1, 1], [], []>} : vector<8x192xf32>, vector<192x4xf32>, vector<8x4xf32> -> vector<8x4xf32>
    %608 = vector.extract_strided_slice %604 {offsets = [8, 0], sizes = [8, 192], strides = [1, 1]} : vector<16x192xf32> to vector<8x192xf32>
    %c192 = arith.constant 192 : index
    %c0_129 = arith.constant 0 : index
    %609 = vector.load %arg4[%c192, %c0_129] : memref<384x4xf32, #tpu.memory_space<vmem>>, vector<192x4xf32>
    %cst_130 = arith.constant dense<0.000000e+00> : vector<8x4xf32>
    %610 = tpu.matmul %608, %609, %cst_130 {dimension_numbers = #tpu.dot_dimension_numbers<[1], [0], [0], [1], [0, 0, 1, 1], [], []>} : vector<8x192xf32>, vector<192x4xf32>, vector<8x4xf32> -> vector<8x4xf32>
    %611 = arith.addf %607, %610 : vector<8x4xf32>
    %612 = vector.broadcast %11 : vector<1x4xf32> to vector<8x4xf32>
    %613 = arith.addf %611, %612 : vector<8x4xf32>
    %c7 = arith.constant 7 : index
    %c0_131 = arith.constant 0 : index
    %c0_132 = arith.constant 0 : index
    %614 = vector.load %arg2[%c7, %c0_131, %c0_132] : memref<15x8x4xf32, #tpu.memory_space<vmem>>, vector<1x8x4xf32>
    %615 = vector.shape_cast %614 : vector<1x8x4xf32> to vector<8x4xf32>
    %616 = arith.addf %615, %613 : vector<8x4xf32>
    %617 = arith.addf %92, %616 : vector<8x4xf32>
    %618 = arith.subf %617, %615 : vector<8x4xf32>
    %c0_133 = arith.constant 0 : index
    %c0_134 = arith.constant 0 : index
    %619 = vector.load %arg5[%c0_133, %c0_134] : memref<8x4xf32, #tpu.memory_space<vmem>>, vector<8x4xf32>
    tpu.vector_store %arg5[%c0_133, %c0_134], %618 {strides = array<i32>} : memref<8x4xf32, #tpu.memory_space<vmem>>, vector<8x4xf32>,
    return
  }
  func.func @transform_0(%arg0: i32) -> (i32, i32, i32) {
    %c0_i32 = arith.constant 0 : i32
    %c0_i32_0 = arith.constant 0 : i32
    %c0_i32_1 = arith.constant 0 : i32
    return %c0_i32, %arg0, %c0_i32_0 : i32, i32, i32
  }
  func.func @transform_1(%arg0: i32) -> (i32, i32, i32) {
    %c0_i32 = arith.constant 0 : i32
    %c0_i32_0 = arith.constant 0 : i32
    %c0_i32_1 = arith.constant 0 : i32
    return %c0_i32, %arg0, %c0_i32_0 : i32, i32, i32
  }
  func.func @transform_2(%arg0: i32) -> (i32, i32) {
    %c0_i32 = arith.constant 0 : i32
    %c0_i32_0 = arith.constant 0 : i32
    %c0_i32_1 = arith.constant 0 : i32
    return %c0_i32, %c0_i32_0 : i32, i32
  }
  func.func @transform_3(%arg0: i32) -> (i32, i32) {
    %c0_i32 = arith.constant 0 : i32
    %c0_i32_0 = arith.constant 0 : i32
    %c0_i32_1 = arith.constant 0 : i32
    return %c0_i32, %c0_i32_0 : i32, i32
  }
  func.func @transform_4(%arg0: i32) -> (i32, i32) {
    %c0_i32 = arith.constant 0 : i32
    %c0_i32_0 = arith.constant 0 : i32
    return %arg0, %c0_i32 : i32, i32
  }
}

</mosaic_0001>

<bundles_post_ra>
// kernel: tpu_custom_call.1
= control target key start
LH: loop header
LB: loop body
LE: loop exit
PB: predicated region body
PF: predicated region fallthrough
CT: control target
= control target key end

     0   :  { %s5550_s15 = smov 0   ;;  %s5552_s16 = smov 0   ;;  %s6412_s0 = inlined_call_operand.vmem [shape: f32[4,16,12], index: 0, kind: input, shape index: {}]   ;;  %s6413_s1 = inlined_call_operand.vmem [shape: f32[15,16,4], index: 1, kind: input, shape index: {}]   ;;  %s6414_s2 = inlined_call_operand.vmem [shape: f32[16,1408], index: 2, kind: input, shape index: {}]   ;;  %s6415_s3 = inlined_call_operand.vmem [shape: f32[384,4], index: 3, kind: input, shape index: {}]   ;;  %s6416_s4 = inlined_call_operand.vmem [shape: f32[16,4], index: 4, kind: output, shape index: {}]  }
   0x1   :  { %s5554_s17 = smov 0  }
   0x2 LB: > { %s4411_s18 = sadd.s32 4294967295, %s5505_s17   ;;  %s5567_s19 = sadd.s32 1, %s5505_s17   ;;  %s5505_s17 = sphi %s5554_s17, %s6422_s17   ;;  %s5501_s16 = sphi %s5552_s16, %s6421_s16   ;;  %s5497_s15 = sphi %s5550_s15, %s6420_s15  }
   0x3   : > { %s18_s20 = ssub.s32 %s5505_s17, %s5567_s19  ;;  %s21_s21 = sadd.s32 1, %s5501_s16 }
   0x4   : > { %p19_p0 = scmp.eq.s32.totalorder %s18_s20, 0  ;;  %p28_p1 = scmp.ne.s32.totalorder %s5501_s16, %s5497_s15 }
   0x5   : > { %p29_p2 = scmp.eq.s32.totalorder %s5505_s17, 0  ;;  %p4414_p4 = scmp.ge.s32.totalorder %s5505_s17, 2 }
   0x6   : > { %s5576_s22 = scalar_select %p19_p0, %s5501_s16, %s21_s21  }
   0x7   : > { %p5578_p3 = por %p29_p2, %p28_p1  ;;  %154 = sbr.rel (%p4414_p4) target bundleno = 33 (0x21), region = 24 }
   0xe   : > { %157 = sbr.rel (!%p5578_p3) target bundleno = 21 (0x15), region = 28  ;;  %s159_s24 = sand.u32 (%p5578_p3), 1, %s5501_s16  }
   0xf   : > { %s4416_s25 = sshll.u32 (%p5578_p3), %s5505_s17, 3  ;;  %s4415_s26 = sshll.u32 (%p5578_p3), %s159_s24, 5 }
  0x10   : > { %s163_s29 = scalar_lea.vmem (%p5578_p3), %s6412_s0, %s4416_s25  ;;  %s161_s30 = scalar_lea.vmem (%p5578_p3), [#allocation3], %s4415_s26 }
  0x11   : > { %v197_v0 = vld [vmem:[%s163_s29] sm:$0xff] (%p5578_p3)  ;;  %v199_v1 = vld [vmem:[%s163_s29 + $0x10] sm:$0xff] (%p5578_p3) }
  0x12   : > { %v201_v2 = vld [vmem:[%s163_s29 + $0x20] sm:$0xff] (%p5578_p3)  ;;  %198 = vst [vmem:[%s161_s30] sm:$0xff] (%p5578_p3), %v197_v0  ;;  %200 = vst [vmem:[%s161_s30 + $0x8] sm:$0xff] (%p5578_p3), %v199_v1  ;;  %v203_v3 = vld [vmem:[%s163_s29 + $0x30] sm:$0xff] (%p5578_p3) }
  0x13   : > { %202 = vst [vmem:[%s161_s30 + $0x10] sm:$0xff] (%p5578_p3), %v201_v2  ;;  %204 = vst [vmem:[%s161_s30 + $0x18] sm:$0xff] (%p5578_p3), %v203_v3 }
  0x15 PF: > { %210 = sbr.rel (!%p5578_p3) target bundleno = 33 (0x21), region = 66  ;;  %s212_s5 = sand.u32 (%p5578_p3), 1, %s5501_s16  }
  0x16   : > { %s4417_s6 = sshll.u32 (%p5578_p3), %s5505_s17, 3  ;;  %s5243_s7 = smul.u32 (%p5578_p3), 120, %s212_s5 }
  0x17   : > { %s216_s10 = scalar_lea.vmem (%p5578_p3), %s6413_s1, %s4417_s6 }
  0x18   : > { %v272_v4 = vld [vmem:[%s216_s10] sm:$0xff] (%p5578_p3)  ;;  %v274_v5 = vld [vmem:[%s216_s10 + $0x10] sm:$0xff] (%p5578_p3)  ;;  %s214_s11 = scalar_lea.vmem (%p5578_p3), [#allocation4], %s5243_s7 }
  0x19   : > { %v276_v6 = vld [vmem:[%s216_s10 + $0x20] sm:$0xff] (%p5578_p3)  ;;  %v278_v7 = vld [vmem:[%s216_s10 + $0x30] sm:$0xff] (%p5578_p3)  ;;  %273 = vst [vmem:[%s214_s11] sm:$0xff] (%p5578_p3), %v272_v4  ;;  %275 = vst [vmem:[%s214_s11 + $0x8] sm:$0xff] (%p5578_p3), %v274_v5 }
  0x1a   : > { %v280_v8 = vld [vmem:[%s216_s10 + $0x40] sm:$0xff] (%p5578_p3)  ;;  %v282_v9 = vld [vmem:[%s216_s10 + $0x50] sm:$0xff] (%p5578_p3)  ;;  %277 = vst [vmem:[%s214_s11 + $0x10] sm:$0xff] (%p5578_p3), %v276_v6  ;;  %279 = vst [vmem:[%s214_s11 + $0x18] sm:$0xff] (%p5578_p3), %v278_v7 }
  0x1b   : > { %281 = vst [vmem:[%s214_s11 + $0x20] sm:$0xff] (%p5578_p3), %v280_v8  ;;  %283 = vst [vmem:[%s214_s11 + $0x28] sm:$0xff] (%p5578_p3), %v282_v9  ;;  %v284_v10 = vld [vmem:[%s216_s10 + $0x60] sm:$0xff] (%p5578_p3)  ;;  %v286_v11 = vld [vmem:[%s216_s10 + $0x70] sm:$0xff] (%p5578_p3) }
  0x1c   : > { %v288_v12 = vld [vmem:[%s216_s10 + $0x80] sm:$0xff]  ;;  %285 = vst [vmem:[%s214_s11 + $0x30] sm:$0xff] %v284_v10  ;;  %287 = vst [vmem:[%s214_s11 + $0x38] sm:$0xff] %v286_v11  ;;  %v290_v13 = vld [vmem:[%s216_s10 + $0x90] sm:$0xff] }
  0x1d   : > { %289 = vst [vmem:[%s214_s11 + $0x40] sm:$0xff] %v288_v12  ;;  %v292_v14 = vld [vmem:[%s216_s10 + $0xa0] sm:$0xff]  ;;  %v294_v15 = vld [vmem:[%s216_s10 + $0xb0] sm:$0xff]  ;;  %291 = vst [vmem:[%s214_s11 + $0x48] sm:$0xff] %v290_v13 }
  0x1e   : > { %293 = vst [vmem:[%s214_s11 + $0x50] sm:$0xff] %v292_v14  ;;  %295 = vst [vmem:[%s214_s11 + $0x58] sm:$0xff] %v294_v15  ;;  %v296_v16 = vld [vmem:[%s216_s10 + $0xc0] sm:$0xff]  ;;  %v298_v17 = vld [vmem:[%s216_s10 + $0xd0] sm:$0xff] }
  0x1f   : > { %v300_v18 = vld [vmem:[%s216_s10 + $0xe0] sm:$0xff]  ;;  %297 = vst [vmem:[%s214_s11 + $0x60] sm:$0xff] %v296_v16  ;;  %299 = vst [vmem:[%s214_s11 + $0x68] sm:$0xff] %v298_v17 }
  0x20   : > { %301 = vst [vmem:[%s214_s11 + $0x70] sm:$0xff] %v300_v18 }
  0x21 PF: > { %p4418_p5 = scmp.ge.s32.totalorder %s5505_s17, 1  ;;  %p306_p6 = scmp.lt.s32.totalorder %s5505_s17, 3 }
  0x23   : > { %p307_p7 = pnand %p4418_p5, %p306_p6 }
  0x24   : > { %v352_v19 = vld [vmem:[%s6414_s2] sm:$0xff] (!%p307_p7)  ;;  %vm387_vm0 = vcmask (!%p307_p7), 1043456   ;;  %s313_s14 = sand.u32 (!%p307_p7), 1, %s5497_s15   ;;  %v362_v20 = vld [vmem:[%s6414_s2 + $0x28] sm:$0xff] (!%p307_p7)  ;;  %vm644_vm1 = vcmask (!%p307_p7), 31744   ;;  %vm5507_vm2 = vmmov (!%p307_p7), 1  }
  0x25   : > { %310 = sbr.rel (%p307_p7) target bundleno = 9219 (0x2403), region = 104  ;;  %v643_v21 = vrot.slane (!%p307_p7), %v352_v19, 4  ;;  %v363_v22 = vld [vmem:[%s6414_s2 + $0x80] sm:$0xf] (!%p307_p7)  ;;  %vm5610_vm3 = vmpackc.low (!%p307_p7), %vm387_vm0, %vm5507_vm2  ;;  %v354_v25 = vld [vmem:[%s6414_s2 + $0x8] sm:$0xff] (!%p307_p7)  ;;  %s4419_s29 = sshll.u32 (!%p307_p7), %s313_s14, 5 }
  0x26   : > { %s5244_s23 = smul.u32 (!%p307_p7), 120, %s313_s14  ;;  %v5049_v23 = vpack.c.bf16 (!%p307_p7), %v363_v22, %v362_v20  ;;  %v355_v26 = vld [vmem:[%s6414_s2 + $0x60] sm:$0xff] (!%p307_p7)  ;;  %v353_v31 = vld [vmem:[%s6414_s2 + $0x58] sm:$0xff] (!%p307_p7)  ;;  %vm374_vm4 = vcmask (!%p307_p7), 97280   ;;  %s5645_s7 = scalar_lea.vmem (!%p307_p7), [#allocation3], %s4419_s29  ;;  %v356_v49 = vld [vmem:[%s6414_s2 + $0x10] sm:$0xff] (!%p307_p7) }
  0x27   : > { %4757 = vmatprep.subr.msk.mxu1 (!%p307_p7), %vm387_vm0, %v643_v21  ;;  %v5055_v30 = vpack.c.bf16 (!%p307_p7), %v355_v26, %v354_v25  ;;  %v370_v34 = vld [vmem:[%s5645_s7] sm:$0xff] (!%p307_p7)  ;;  %v371_v35 = vld [vmem:[%s5645_s7 + $0x8] sm:$0xff] (!%p307_p7)  ;;  %v372_v36 = vld [vmem:[%s5645_s7 + $0x10] sm:$0xff] (!%p307_p7)  ;;  %v1173_v46 = vrot.slane (!%p307_p7), %v353_v31, 4  ;;  %v5508_v52 = vmov (!%p307_p7), 0.0|0.0   ;;  %vm5509_vm5 = vmmov (!%p307_p7), 0  }
  0x28   : > { %4758 = vmatpush3.msk.msra.mxu1 (!%p307_p7), %vm387_vm0, %v643_v21  ;;  %s5622_s30 = scalar_lea.vmem (!%p307_p7), [#allocation4], %s5244_s23  ;;  %5051 = vmatprep.subr.msk.bf16.mxu0 (!%p307_p7), %vm5610_vm3, %v5049_v23  ;;  %v373_v39 = vld [vmem:[%s5645_s7 + $0x18] sm:$0xff] (!%p307_p7)  ;;  %v357_v50 = vld [vmem:[%s6414_s2 + $0x68] sm:$0xff] (!%p307_p7)  ;;  %v359_v54 = vld [vmem:[%s6414_s2 + $0x70] sm:$0xff] (!%p307_p7)  ;;  %v5510_v56 = vmov (!%p307_p7), 0.0   ;;  %vm1361_vm6 = vcmask (!%p307_p7), 130048  }
  0x29   : > { %v4426_v27 = vld [vmem:[%s5622_s30 + $0x8] sm:$0xff] (!%p307_p7)  ;;  %v4427_v28 = vld [vmem:[%s5622_s30 + $0x10] sm:$0xff] (!%p307_p7)  ;;  %v5627_v29 = vld [vmem:[%s5622_s30 + $0x18] sm:$0xff] (!%p307_p7)  ;;  %4777 = vmatprep.subr.msk.mxu1 (!%p307_p7), %vm387_vm0, %v352_v19  ;;  %5054 = vmatpush3.bf16.msk.msra.mxu0 (!%p307_p7), %vm5610_vm3, %v5049_v23  ;;  %v5059_v51 = vpack.c.bf16 (!%p307_p7), %v357_v50, %v356_v49  ;;  %s5511_s6 = smov (!%p307_p7), 80   ;;  %s5512_s8 = smov (!%p307_p7), 16   ;;  %vm2676_vm7 = vcmask (!%p307_p7), 1048448  }
  0x2a   : > { %4759 = vmatprep.mubr.msk.f32.mxu1 (!%p307_p7), %vm644_vm1, %v4426_v27  ;;  %v4429_v32 = vld [vmem:[%s5622_s30 + $0x20] sm:$0xff] (!%p307_p7)  ;;  %v4430_v33 = vld [vmem:[%s5622_s30 + $0x28] sm:$0xff] (!%p307_p7)  ;;  %5056 = vmatprep.subr.bf16.mxu0 (!%p307_p7), %v5055_v30  ;;  %v4431_v37 = vld [vmem:[%s5622_s30 + $0x30] sm:$0xff] (!%p307_p7)  ;;  %s5513_s9 = smov (!%p307_p7), 96   ;;  %s5514_s10 = smov (!%p307_p7), 97   ;;  %vm2886_vm8 = vcmask (!%p307_p7), 917248  }
  0x2b   : > { %4760 = vmatmul.mubr.msk.f32.vlgmr.msra.gmra.mrb[0].mxu1 (!%p307_p7), %vm644_vm1, %v4427_v28  ;;  %4751 = vmatprep.mubr.msk.f32.mxu0 (!%p307_p7), %vm374_vm4, %v370_v34  ;;  %v4432_v38 = vld [vmem:[%s5622_s30 + $0x38] sm:$0xff] (!%p307_p7)  ;;  %v4433_v40 = vld [vmem:[%s5622_s30 + $0x40] sm:$0xff] (!%p307_p7)  ;;  %v4434_v41 = vld [vmem:[%s5622_s30 + $0x48] sm:$0xff] (!%p307_p7)  ;;  %s5515_s11 = smov (!%p307_p7), 31   ;;  %s5516_s12 = smov (!%p307_p7), 64   ;;  %vm2052_vm9 = vcmask (!%p307_p7), 261248  }
  0x2c   : > { %4778 = vmatpush3.msk.msra.mxu1 %vm387_vm0, %v352_v19  ;;  %4762 = vmatprep.mubr.msk.f32.mxu1 %vm644_vm1, %v5627_v29  ;;  %v4435_v42 = vld [vmem:[%s5622_s30 + $0x50] sm:$0xff]  ;;  %v4436_v43 = vld [vmem:[%s5622_s30 + $0x58] sm:$0xff]  ;;  %v4437_v44 = vld [vmem:[%s5622_s30 + $0x60] sm:$0xff]  ;;  %s5517_s13 = smov 112   ;;  %s5518_s14 = smov 48   ;;  %vm2054_vm10 = vcmask 392448  }
  0x2d   : > { %4797 = vmatprep.subr.msk.mxu1 %vm387_vm0, %v353_v31  ;;  %4752 = vmatmul.mubr.msk.f32.vlgmr.msra.gmra.mrb[0].mxu0 %vm374_vm4, %v371_v35  ;;  %v617_v45 = vld [vmem:[%s5622_s30] sm:$0xff]  ;;  %v4475_v47 = vld [vmem:[%s5622_s30 + $0x68] sm:$0xff]  ;;  %v4500_v48 = vld [vmem:[%s5622_s30 + $0x70] sm:$0xff]  ;;  %s5519_s20 = smov 32   ;;  %vm1850_vm11 = vcmask 523648   ;;  %vm2880_vm12 = vcmask 786048  }
  0x2e   : > { %5058 = vmatpush3.bf16.msra.mxu0 %v5055_v30  ;;  %4754 = vmatprep.mubr.msk.f32.mxu0 %vm374_vm4, %v372_v36  ;;  %v358_v53 = vld [vmem:[%s6414_s2 + $0x18] sm:$0xff]  ;;  %v360_v22 = vld [vmem:[%s6414_s2 + $0x20] sm:$0xff]  ;;  %v368_v49 = vld [vmem:[%s6414_s2 + $0x48] ss:$0 sm:$0xff]  ;;  %vm2670_vm13 = vcmask 654848   ;;  %vm4180_vm14 = vcmask 523264  }
  0x2f   : > { %4763 = vmatmul.mubr.msk.f32.gmra.mrb[2].mxu1 %vm644_vm1, %v4429_v32  ;;  %5060 = vmatprep.subr.bf16.mxu0 %v5059_v51  ;;  %v5729_v55 = vpack.c.bf16 %v359_v54, %v358_v53  ;;  %v366_v61 = vld [vmem:[%s6414_s2 + $0x38] ss:$0 sm:$0xff]  ;;  %v367_v25 = vld [vmem:[%s6414_s2 + $0x40] ss:$0 sm:$0xff]  ;;  %vm529_vm15 = vcmask 252928   ;;  %s5520_s28 = smov 122  }
  0x30   : > { %4765 = vmatprep.mubr.msk.f32.mxu1 %vm644_vm1, %v4430_v33  ;;  %v361_v23 = vld [vmem:[%s6414_s2 + $0x78] sm:$0xff]  ;;  %s5522_s29 = smov 124   ;;  %s5523_s5 = smov 126   ;;  %vm613_vm2 = vcmask 15360   ;;  %vm615_vm3 = vcmask 23552  }
  0x31   : > { %4755 = vmatmul.mubr.msk.f32.gmra.mrb[2].mxu0 %vm374_vm4, %v373_v39  ;;  %v5781_v24 = vpack.c.bf16 %v361_v23, %v360_v22  ;;  %p348_p8 = scmp.lt.s32.totalorder %s4411_s18, 1 }
  0x33   : > { %4766 = vmatmul.mubr.msk.f32.gmra.mrb[4].mxu1 %vm644_vm1, %v4431_v37  ;;  %s6424_s18 = smov (!%p348_p8, %s4411_s18), 1 }
  0x34   : > { %4768 = vmatprep.mubr.msk.f32.mxu1 %vm644_vm1, %v4432_v38 }
  0x37   : > { %4769 = vmatmul.mubr.msk.f32.gmra.mrb[6].mxu1 %vm644_vm1, %v4433_v40 }
  0x38   : > { %4771 = vmatprep.mubr.msk.f32.mxu1 %vm644_vm1, %v4434_v41 }
  0x3b   : > { %4772 = vmatmul.mubr.msk.f32.gmra.mrb[8].mxu1 %vm644_vm1, %v4435_v42 }
  0x3c   : > { %4774 = vmatprep.mubr.msk.f32.mxu1 %vm644_vm1, %v4436_v43 }
  0x3f   : > { %4775 = vmatmul.mubr.msk.f32.gmra.mrb[10].mxu1 %vm644_vm1, %v4437_v44 }
  0x40   : > { %4779 = vmatprep.mubr.msk.f32.mxu1 %vm644_vm1, %v617_v45 }
  0x43   : > { %4780 = vmatmul.mubr.msk.f32.vlgmr.msra.gmra.mrb[0].mxu1 %vm644_vm1, %v4426_v27 }
  0x44   : > { %4798 = vmatpush3.msk.msra.mxu1 %vm387_vm0, %v353_v31  ;;  %4782 = vmatprep.mubr.msk.f32.mxu1 %vm644_vm1, %v4427_v28 }
  0x45   : > { %4817 = vmatprep.subr.msk.mxu1 %vm387_vm0, %v1173_v46 }
  0x47   : > { %4783 = vmatmul.mubr.msk.f32.gmra.mrb[2].mxu1 %vm644_vm1, %v5627_v29 }
  0x48   : > { %4785 = vmatprep.mubr.msk.f32.mxu1 %vm644_vm1, %v4429_v32 }
  0x4b   : > { %4786 = vmatmul.mubr.msk.f32.gmra.mrb[4].mxu1 %vm644_vm1, %v4430_v33 }
  0x4c   : > { %4788 = vmatprep.mubr.msk.f32.mxu1 %vm644_vm1, %v4431_v37 }
  0x4f   : > { %4789 = vmatmul.mubr.msk.f32.gmra.mrb[6].mxu1 %vm644_vm1, %v4432_v38 }
  0x50   : > { %4791 = vmatprep.mubr.msk.f32.mxu1 %vm644_vm1, %v4433_v40 }
  0x53   : > { %4792 = vmatmul.mubr.msk.f32.gmra.mrb[8].mxu1 %vm644_vm1, %v4434_v41 }
  0x54   : > { %4794 = vmatprep.mubr.msk.f32.mxu1 %vm644_vm1, %v4435_v42 }
  0x57   : > { %4795 = vmatmul.mubr.msk.f32.gmra.mrb[10].mxu1 %vm644_vm1, %v4436_v43 }
  0x58   : > { %4799 = vmatprep.mubr.msk.f32.mxu1 %vm644_vm1, %v4427_v28 }
  0x5b   : > { %4800 = vmatmul.mubr.msk.f32.vlgmr.msra.gmra.mrb[0].mxu1 %vm644_vm1, %v5627_v29 }
  0x5c   : > { %4818 = vmatpush3.msk.msra.mxu1 %vm387_vm0, %v1173_v46  ;;  %4802 = vmatprep.mubr.msk.f32.mxu1 %vm644_vm1, %v4429_v32  ;;  %vm611_vm0 = vcmask 7168  }
  0x5d   : > { %5093 = vmatprep.subr.bf16.mxu1 %v5508_v52 }
  0x5f   : > { %4803 = vmatmul.mubr.msk.f32.gmra.mrb[2].mxu1 %vm644_vm1, %v4430_v33 }
  0x60   : > { %4805 = vmatprep.mubr.msk.f32.mxu1 %vm644_vm1, %v4431_v37 }
  0x63   : > { %4806 = vmatmul.mubr.msk.f32.gmra.mrb[4].mxu1 %vm644_vm1, %v4432_v38 }
  0x64   : > { %4808 = vmatprep.mubr.msk.f32.mxu1 %vm644_vm1, %v4433_v40 }
  0x67   : > { %4809 = vmatmul.mubr.msk.f32.gmra.mrb[6].mxu1 %vm644_vm1, %v4434_v41 }
  0x68   : > { %4811 = vmatprep.mubr.msk.f32.mxu1 %vm644_vm1, %v4435_v42 }
  0x6b   : > { %4812 = vmatmul.mubr.msk.f32.gmra.mrb[8].mxu1 %vm644_vm1, %v4436_v43 }
  0x6c   : > { %4814 = vmatprep.mubr.msk.f32.mxu1 %vm644_vm1, %v4437_v44 }
  0x6f   : > { %4815 = vmatmul.mubr.msk.f32.gmra.mrb[10].mxu1 %vm644_vm1, %v4475_v47 }
  0x70   : > { %4819 = vmatprep.mubr.msk.f32.mxu1 %vm644_vm1, %v5627_v29 }
  0x73   : > { %4820 = vmatmul.mubr.msk.f32.vlgmr.msra.gmra.mrb[0].mxu1 %vm644_vm1, %v4429_v32 }
  0x74   : > { %4822 = vmatprep.mubr.msk.f32.mxu1 %vm644_vm1, %v4430_v33  ;;  %5095 = vmatpush3.bf16.msra.mxu1 %v5729_v55 }
  0x75   : > { %5099 = vmatprep.subr.bf16.mxu1 %v5508_v52 }
  0x77   : > { %4823 = vmatmul.mubr.msk.f32.gmra.mrb[2].mxu1 %vm644_vm1, %v4431_v37 }
  0x78   : > { %4825 = vmatprep.mubr.msk.f32.mxu1 %vm644_vm1, %v4432_v38 }
  0x7b   : > { %4826 = vmatmul.mubr.msk.f32.gmra.mrb[4].mxu1 %vm644_vm1, %v4433_v40 }
  0x7c   : > { %4828 = vmatprep.mubr.msk.f32.mxu1 %vm644_vm1, %v4434_v41 }
  0x7f   : > { %4829 = vmatmul.mubr.msk.f32.gmra.mrb[6].mxu1 %vm644_vm1, %v4435_v42 }
  0x80   : > { %4831 = vmatprep.mubr.msk.f32.mxu1 %vm644_vm1, %v4436_v43 }
  0x83   : > { %4832 = vmatmul.mubr.msk.f32.gmra.mrb[8].mxu1 %vm644_vm1, %v4437_v44 }
  0x84   : > { %4834 = vmatprep.mubr.msk.f32.mxu1 %vm644_vm1, %v4475_v47 }
  0x87   : > { %4835 = vmatmul.mubr.msk.f32.gmra.mrb[10].mxu1 %vm644_vm1, %v4500_v48 }
  0x88   : > { %4955 = vmatprep.mubr.msk.f32.mxu1 %vm5509_vm5, %v5510_v56 }
 0x100   : > { %v5735_v57 = vpop.f32.mrb[0].mxu0 }
 0x101   : > { %v5737_v58 = vpop.f32.mrb[1].mxu0 }
 0x104   : > { %v5739_v59 = vpop.f32.mrb[2].mxu0 }
 0x105   : > { %v5741_v60 = vpop.f32.mrb[3].mxu0 }
 0x146   : > { %v4821_v62 = vpop.f32.mrb[0].mxu1 }
 0x147   : > { %v1278_v63 = vpop.f32.mrb[1].mxu1  ;;  %v1350_v1 = vadd.f32 %v4821_v62, %v366_v61 }
 0x148   : > { %v1349_v0 = vadd.f32 %v1278_v63, %v366_v61 }
 0x14a   : > { %v4824_v2 = vpop.f32.mrb[2].mxu1  ;;  %4841 = vmatprep.mubr.msk.f32.mxu0 %vm1361_vm6, %v1349_v0 }
 0x14b   : > { %v1288_v3 = vpop.f32.mrb[3].mxu1  ;;  %4842 = vmatmul.mubr.msk.f32.vlgmr.msra.gmra.mrb[4].mxu0 %vm1361_vm6, %v1350_v1  ;;  %v1352_v5 = vadd.f32 %v4824_v2, %v366_v61 }
 0x14c   : > { %v1351_v4 = vadd.f32 %v1288_v3, %v366_v61  ;;  %5062 = vmatpush3.bf16.msra.mxu0 %v5059_v51 }
 0x14d   : > { %5063 = vmatprep.subr.bf16.mxu0 %v5508_v52 }
 0x14e   : > { %v4827_v6 = vpop.f32.mrb[4].mxu1  ;;  %4844 = vmatprep.mubr.msk.f32.mxu0 %vm1361_vm6, %v1351_v4 }
 0x14f   : > { %v1298_v7 = vpop.f32.mrb[5].mxu1  ;;  %4845 = vmatmul.mubr.msk.f32.gmra.mrb[6].mxu0 %vm1361_vm6, %v1352_v5  ;;  %v1354_v9 = vadd.f32 %v4827_v6, %v366_v61 }
 0x150   : > { %v1353_v8 = vadd.f32 %v1298_v7, %v366_v61 }
 0x152   : > { %v4830_v10 = vpop.f32.mrb[6].mxu1  ;;  %4847 = vmatprep.mubr.msk.f32.mxu0 %vm1361_vm6, %v1353_v8 }
 0x153   : > { %v1308_v11 = vpop.f32.mrb[7].mxu1  ;;  %4848 = vmatmul.mubr.msk.f32.gmra.mrb[8].mxu0 %vm1361_vm6, %v1354_v9  ;;  %v1356_v13 = vadd.f32 %v4830_v10, %v366_v61 }
 0x154   : > { %v1355_v12 = vadd.f32 %v1308_v11, %v366_v61 }
 0x156   : > { %v4833_v14 = vpop.f32.mrb[8].mxu1  ;;  %4850 = vmatprep.mubr.msk.f32.mxu0 %vm1361_vm6, %v1355_v12 }
 0x157   : > { %v1318_v15 = vpop.f32.mrb[9].mxu1  ;;  %4851 = vmatmul.mubr.msk.f32.gmra.mrb[10].mxu0 %vm1361_vm6, %v1356_v13  ;;  %v1358_v17 = vadd.f32 %v4833_v14, %v366_v61 }
 0x158   : > { %v1357_v16 = vadd.f32 %v1318_v15, %v366_v61 }
 0x15a   : > { %v4836_v18 = vpop.f32.mrb[10].mxu1  ;;  %4853 = vmatprep.mubr.msk.f32.mxu0 %vm1361_vm6, %v1357_v16 }
 0x15b   : > { %v1328_v19 = vpop.f32.mrb[11].mxu1  ;;  %4854 = vmatmul.mubr.msk.f32.gmra.mrb[12].mxu0 %vm1361_vm6, %v1358_v17  ;;  %v1360_v21 = vadd.f32 %v4836_v18, %v366_v61 }
 0x15c   : > { %v1359_v20 = vadd.f32 %v1328_v19, %v366_v61 }
 0x15e   : > { %4856 = vmatprep.mubr.msk.f32.mxu0 %vm1361_vm6, %v1359_v20 }
 0x15f   : > { %4857 = vmatmul.mubr.msk.f32.gmra.mrb[14].mxu0 %vm1361_vm6, %v1360_v21 }
 0x160   : > { %4863 = vmatprep.mubr.msk.f32.mxu0 %vm1361_vm6, %v1349_v0 }
 0x163   : > { %4864 = vmatmul.mubr.msk.f32.vlgmr.msra.gmra.mrb[16].mxu0 %vm1361_vm6, %v1350_v1 }
 0x164   : > { %5065 = vmatpush3.bf16.msra.mxu0 %v5729_v55  ;;  %4866 = vmatprep.mubr.msk.f32.mxu0 %vm1361_vm6, %v1351_v4 }
 0x165   : > { %5066 = vmatprep.subr.bf16.mxu0 %v5508_v52 }
 0x167   : > { %4867 = vmatmul.mubr.msk.f32.gmra.mrb[18].mxu0 %vm1361_vm6, %v1352_v5 }
 0x168   : > { %4869 = vmatprep.mubr.msk.f32.mxu0 %vm1361_vm6, %v1353_v8 }
 0x16b   : > { %4870 = vmatmul.mubr.msk.f32.gmra.mrb[20].mxu0 %vm1361_vm6, %v1354_v9 }
 0x16c   : > { %4872 = vmatprep.mubr.msk.f32.mxu0 %vm1361_vm6, %v1355_v12 }
 0x16f   : > { %4873 = vmatmul.mubr.msk.f32.gmra.mrb[22].mxu0 %vm1361_vm6, %v1356_v13 }
 0x170   : > { %4875 = vmatprep.mubr.msk.f32.mxu0 %vm1361_vm6, %v1357_v16 }
 0x173   : > { %4876 = vmatmul.mubr.msk.f32.gmra.mrb[24].mxu0 %vm1361_vm6, %v1358_v17 }
 0x174   : > { %4878 = vmatprep.mubr.msk.f32.mxu0 %vm1361_vm6, %v1359_v20 }
 0x177   : > { %4879 = vmatmul.mubr.msk.f32.gmra.mrb[26].mxu0 %vm1361_vm6, %v1360_v21 }
 0x178   : > { %4885 = vmatprep.mubr.msk.f32.mxu0 %vm5509_vm5, %v5510_v56 }
 0x17b   : > { %4886 = vmatmul.mubr.f32.vlgmr.msra.gmra.mrb[28].mxu0 %v5510_v56 }
 0x17c   : > { %5068 = vmatpush3.bf16.msra.mxu0 %v5781_v24  ;;  %4892 = vmatprep.mubr.msk.f32.mxu0 %vm5509_vm5, %v5510_v56 }
 0x17d   : > { %5069 = vmatprep.subr.bf16.mxu0 %v5508_v52 }
 0x17f   : > { %4893 = vmatmul.mubr.f32.vlgmr.msra.gmra.mrb[30].mxu0 %v5510_v56 }
 0x180   : > { %5071 = vmatpush3.bf16.msra.mxu0 %v5729_v55  ;;  %4899 = vmatprep.mubr.msk.f32.mxu0 %vm5509_vm5, %v5510_v56 }
 0x181   : > { %5072 = vmatprep.subr.bf16.mxu0 %v5508_v52 }
 0x21e   : > { %v4843_v26 = vpop.f32.mrb[4].mxu0 }
 0x21f   : > { %v5796_v27 = vadd.f32 %v4843_v26, %v367_v25  ;;  %v1464_v28 = vpop.f32.mrb[5].mxu0 }
 0x220   : > { %v1465_v16 = vadd.f32 %v1464_v28, %v367_v25 }
 0x222   : > { %v4846_v29 = vpop.f32.mrb[6].mxu0 }
 0x223   : > { %v5798_v30 = vadd.f32 %v4846_v29, %v367_v25  ;;  %v1474_v31 = vpop.f32.mrb[7].mxu0 }
 0x224   : > { %v5800_v32 = vadd.f32 %v1474_v31, %v367_v25 }
 0x226   : > { %v4849_v33 = vpop.f32.mrb[8].mxu0 }
 0x227   : > { %v5802_v34 = vadd.f32 %v4849_v33, %v367_v25  ;;  %v1484_v35 = vpop.f32.mrb[9].mxu0 }
 0x228   : > { %v5804_v36 = vadd.f32 %v1484_v35, %v367_v25 }
 0x22a   : > { %v4852_v37 = vpop.f32.mrb[10].mxu0 }
 0x22b   : > { %v5806_v38 = vadd.f32 %v4852_v37, %v367_v25  ;;  %v1494_v39 = vpop.f32.mrb[11].mxu0 }
 0x22c   : > { %v5808_v40 = vadd.f32 %v1494_v39, %v367_v25 }
 0x22e   : > { %v4855_v41 = vpop.f32.mrb[12].mxu0 }
 0x22f   : > { %v5810_v42 = vadd.f32 %v4855_v41, %v367_v25  ;;  %v1504_v43 = vpop.f32.mrb[13].mxu0 }
 0x230   : > { %v5812_v44 = vadd.f32 %v1504_v43, %v367_v25 }
 0x232   : > { %v4858_v45 = vpop.f32.mrb[14].mxu0 }
 0x233   : > { %v5814_v46 = vadd.f32 %v4858_v45, %v367_v25  ;;  %v1514_v47 = vpop.f32.mrb[15].mxu0 }
 0x234   : > { %v5816_v48 = vadd.f32 %v1514_v47, %v367_v25 }
 0x236   : > { %v4865_v50 = vpop.f32.mrb[16].mxu0 }
 0x237   : > { %v5821_v51 = vadd.f32 %v4865_v50, %v368_v49  ;;  %v1589_v53 = vpop.f32.mrb[17].mxu0 }
 0x238   : > { %v5823_v54 = vadd.f32 %v1589_v53, %v368_v49 }
 0x23a   : > { %v4868_v61 = vpop.f32.mrb[18].mxu0 }
 0x23b   : > { %v5825_v62 = vadd.f32 %v4868_v61, %v368_v49  ;;  %v1599_v63 = vpop.f32.mrb[19].mxu0 }
 0x23c   : > { %v5827_v0 = vadd.f32 %v1599_v63, %v368_v49 }
 0x23e   : > { %v4871_v1 = vpop.f32.mrb[20].mxu0 }
 0x23f   : > { %v5829_v2 = vadd.f32 %v4871_v1, %v368_v49  ;;  %v1609_v3 = vpop.f32.mrb[21].mxu0 }
 0x240   : > { %v5831_v4 = vadd.f32 %v1609_v3, %v368_v49 }
 0x242   : > { %v4874_v5 = vpop.f32.mrb[22].mxu0 }
 0x243   : > { %v5833_v6 = vadd.f32 %v4874_v5, %v368_v49  ;;  %v1619_v7 = vpop.f32.mrb[23].mxu0 }
 0x244   : > { %v5835_v8 = vadd.f32 %v1619_v7, %v368_v49 }
 0x246   : > { %v4877_v9 = vpop.f32.mrb[24].mxu0 }
 0x247   : > { %v5837_v10 = vadd.f32 %v4877_v9, %v368_v49  ;;  %v1629_v11 = vpop.f32.mrb[25].mxu0 }
 0x248   : > { %v5839_v12 = vadd.f32 %v1629_v11, %v368_v49 }
 0x24a   : > { %v4880_v13 = vpop.f32.mrb[26].mxu0 }
 0x24b   : > { %v1639_v14 = vpop.f32.mrb[27].mxu0  ;;  %v1645_v20 = vadd.f32 %v4880_v13, %v368_v49 }
 0x24c   : > { %v5841_v15 = vadd.f32 %v1639_v14, %v368_v49 }
 0x24e   : > { %v1717_v17 = vpop.f32.mrb[28].mxu0 }
 0x24f   : > { %v1721_v18 = vadd.f32 %v1717_v17, %v1465_v16  ;;  %v4887_v19 = vpop.f32.mrb[29].mxu0 }
 0x251   : > { %5287 = vtanh.f32 %v1721_v18  ;;  %v4538_v31 = vmul.f32 -1.442695, %v1721_v18 }
 0x252   : > { %v1788_v21 = vpop.f32.mrb[30].mxu0 }
 0x253   : > { %v1792_v22 = vadd.f32 %v1788_v21, %v1645_v20  ;;  %v4894_v23 = vpop.f32.mrb[31].mxu0 }
 0x255   : > { %5289 = vtanh.f32 %v1792_v22  ;;  %v4539_v33 = vmul.f32 -1.442695, %v1792_v22 }
 0x256   : > { %5291 = vpow2.f32 %v4538_v31 }
 0x257   : > { %5293 = vpow2.f32 %v4539_v33 }
 0x25b   : > { %v5288_v26 = vpop.eup %5287 }
 0x25c   : > { %1802 = vrot.lane.b32.xlu0 %v5288_v26, %s5511_s6 }
 0x25f   : > { %v5290_v29 = vpop.eup %5289 }
 0x260   : > { %1826 = vrot.lane.b32.xlu0 %v5290_v29, %s5511_s6  ;;  %v5292_v25 = vpop.eup %5291 }
 0x261   : > { %v1796_v28 = vadd.f32 1.0, %v5292_v25  ;;  %v5294_v35 = vpop.eup %5293 }
 0x262   : > { %v1820_v37 = vadd.f32 1.0, %v5294_v35 }
 0x263   : > { %5295 = vrcp.f32 %v1796_v28 }
 0x264   : > { %5297 = vrcp.f32 %v1820_v37 }
 0x26d   : > { %v5296_v39 = vpop.eup %5295 }
 0x26e   : > { %v5298_v45 = vpop.eup %5297  ;;  %v1800_v50 = vmul.f32 0.0, %v5296_v39 }
 0x26f   : > { %v1824_v63 = vmul.f32 0.0, %v5298_v45 }
 0x2ce   : > { %v1803_v41 = vpop.permute.xlu0 %1802 }
 0x2cf   : > { %v1805_v43 = vmul.f32 %v5296_v39, %v1803_v41 }
 0x2d1   : > { %1807 = vrot.lane.b32.xlu1 %v1805_v43, %s5512_s8 }
 0x2d2   : > { %v1827_v47 = vpop.permute.xlu0 %1826 }
 0x2d3   : > { %v1829_v49 = vmul.f32 %v5298_v45, %v1827_v47 }
 0x2d5   : > { %1831 = vrot.lane.b32.xlu1 %v1829_v49, %s5512_s8 }
 0x343   : > { %v1808_v53 = vpop.permute.xlu1 %1807 }
 0x344   : > { %v1810_v61 = vadd.f32 %v1808_v53, %v1800_v50 }
 0x346   : > { %5299 = vtanh.f32 %v1810_v61 }
 0x347   : > { %v1832_v1 = vpop.permute.xlu1 %1831 }
 0x348   : > { %v1834_v3 = vadd.f32 %v1832_v1, %v1824_v63 }
 0x34a   : > { %5301 = vtanh.f32 %v1834_v3 }
 0x350   : > { %v5300_v5 = vpop.eup %5299 }
 0x351   : > { %1813 = vrot.lane.b32.xlu0 %v5300_v5, %s5512_s8 }
 0x354   : > { %v5302_v7 = vpop.eup %5301 }
 0x355   : > { %1837 = vrot.lane.b32.xlu1 %v5302_v7, %s5512_s8 }
 0x3c3   : > { %v1814_v9 = vpop.permute.xlu0 %1813 }
 0x3c4   : > { %v1816_v11 = vmul.f32 %v5296_v39, %v1814_v9 }
 0x3c6   : > { %1842 = vrot.lane.b32.xlu0 %v1816_v11, %s5513_s9 }
 0x3c7   : > { %v1838_v13 = vpop.permute.xlu1 %1837 }
 0x3c8   : > { %v5850_v14 = vmul.f32 %v5298_v45, %v1838_v13 }
 0x3ca   : > { %1925 = vrot.lane.b32.xlu1 %v5850_v14, %s5513_s9 }
 0x438   : > { %v1843_v16 = vpop.permute.xlu0 %1842 }
 0x439   : > { %1845 = vst.msk [vmem:[#allocation2] sm:$0xff] %vm1361_vm6, %v1843_v16  ;;  %4900 = vmatmul.mubr.msk.f32.vlgmr.msra.gmra.mrb[32].mxu0 %vm1361_vm6, %v1843_v16 }
 0x43a   : > { %5074 = vmatpush3.bf16.msra.mxu0 %v5781_v24  ;;  %4906 = vmatprep.mubr.msk.f32.mxu0 %vm5509_vm5, %v5510_v56 }
 0x43b   : > { %5075 = vmatprep.subr.bf16.mxu0 %v5508_v52 }
 0x43c   : > { %v1926_v17 = vpop.permute.xlu1 %1925 }
 0x43d   : > { %4907 = vmatmul.mubr.msk.f32.vlgmr.msra.gmra.mrb[34].mxu0 %vm1361_vm6, %v1926_v17 }
 0x43e   : > { %5077 = vmatpush3.bf16.msra.mxu0 %v5729_v55  ;;  %4913 = vmatprep.mubr.msk.f32.mxu0 %vm5509_vm5, %v5510_v56 }
 0x43f   : > { %5078 = vmatprep.subr.bf16.mxu0 %v5508_v52 }
 0x50c   : > { %v1920_v18 = vpop.f32.mrb[32].mxu0 }
 0x50d   : > { %v1924_v19 = vadd.f32 %v1920_v18, %v5796_v27  ;;  %v4901_v20 = vpop.f32.mrb[33].mxu0 }
 0x50f   : > { %5303 = vtanh.f32 %v1924_v19  ;;  %v4542_v31 = vmul.f32 -1.442695, %v1924_v19 }
 0x510   : > { %v1995_v21 = vpop.f32.mrb[34].mxu0 }
 0x511   : > { %v1999_v22 = vadd.f32 %v1995_v21, %v5841_v15  ;;  %v4908_v23 = vpop.f32.mrb[35].mxu0 }
 0x513   : > { %5305 = vtanh.f32 %v1999_v22  ;;  %v4543_v33 = vmul.f32 -1.442695, %v1999_v22 }
 0x514   : > { %5307 = vpow2.f32 %v4542_v31 }
 0x515   : > { %5309 = vpow2.f32 %v4543_v33 }
 0x519   : > { %v5304_v26 = vpop.eup %5303 }
 0x51a   : > { %2009 = vrot.lane.b32.xlu0 %v5304_v26, %s5511_s6 }
 0x51d   : > { %v5306_v29 = vpop.eup %5305 }
 0x51e   : > { %2033 = vrot.lane.b32.xlu1 %v5306_v29, %s5511_s6  ;;  %v5308_v25 = vpop.eup %5307 }
 0x51f   : > { %v2003_v28 = vadd.f32 1.0, %v5308_v25  ;;  %v5310_v27 = vpop.eup %5309 }
 0x520   : > { %v2027_v35 = vadd.f32 1.0, %v5310_v27 }
 0x521   : > { %5311 = vrcp.f32 %v2003_v28 }
 0x522   : > { %5313 = vrcp.f32 %v2027_v35 }
 0x52b   : > { %v5312_v37 = vpop.eup %5311 }
 0x52c   : > { %v5314_v41 = vpop.eup %5313  ;;  %v2007_v47 = vmul.f32 %v5312_v37, %v1810_v61 }
 0x52d   : > { %v2031_v53 = vmul.f32 %v5314_v41, %v1834_v3 }
 0x58c   : > { %v2010_v15 = vpop.permute.xlu0 %2009 }
 0x58d   : > { %v2012_v39 = vmul.f32 %v5312_v37, %v2010_v15 }
 0x58f   : > { %2014 = vrot.lane.b32.xlu0 %v2012_v39, %s5512_s8 }
 0x590   : > { %v2034_v43 = vpop.permute.xlu1 %2033 }
 0x591   : > { %v2036_v45 = vmul.f32 %v5314_v41, %v2034_v43 }
 0x593   : > { %2038 = vrot.lane.b32.xlu1 %v2036_v45, %s5512_s8 }
 0x601   : > { %v2015_v49 = vpop.permute.xlu0 %2014 }
 0x602   : > { %v2017_v50 = vadd.f32 %v2015_v49, %v2007_v47 }
 0x604   : > { %5315 = vtanh.f32 %v2017_v50 }
 0x605   : > { %v2039_v63 = vpop.permute.xlu1 %2038 }
 0x606   : > { %v2041_v1 = vadd.f32 %v2039_v63, %v2031_v53 }
 0x608   : > { %5317 = vtanh.f32 %v2041_v1 }
 0x60e   : > { %v5316_v5 = vpop.eup %5315 }
 0x60f   : > { %2020 = vrot.lane.b32.xlu0 %v5316_v5, %s5512_s8 }
 0x612   : > { %v5318_v7 = vpop.eup %5317 }
 0x613   : > { %2044 = vrot.lane.b32.xlu1 %v5318_v7, %s5512_s8 }
 0x681   : > { %v2021_v9 = vpop.permute.xlu0 %2020 }
 0x682   : > { %v5873_v11 = vmul.f32 %v5312_v37, %v2021_v9 }
 0x684   : > { %2056 = vrot.lane.b32.xlu0 %v5873_v11, %s5513_s9 }
 0x685   : > { %v2045_v61 = vpop.permute.xlu1 %2044 }
 0x686   : > { %v5877_v13 = vmul.f32 %v5314_v41, %v2045_v61 }
 0x688   : > { %2132 = vrot.lane.b32.xlu1 %v5877_v13, %s5513_s9 }
 0x6f6   : > { %v2057_v3 = vpop.permute.xlu0 %2056 }
 0x6f7   : > { %4914 = vmatmul.mubr.msk.f32.vlgmr.msra.gmra.mrb[36].mxu0 %vm1361_vm6, %v2057_v3 }
 0x6f8   : > { %5080 = vmatpush3.bf16.msra.mxu0 %v5781_v24  ;;  %4920 = vmatprep.mubr.msk.f32.mxu0 %vm5509_vm5, %v5510_v56 }
 0x6f9   : > { %5081 = vmatprep.subr.bf16.mxu0 %v5508_v52 }
 0x6fa   : > { %v2133_v16 = vpop.permute.xlu1 %2132 }
 0x6fb   : > { %4921 = vmatmul.mubr.msk.f32.vlgmr.msra.gmra.mrb[38].mxu0 %vm1361_vm6, %v2133_v16 }
 0x6fc   : > { %5083 = vmatpush3.bf16.msra.mxu0 %v5729_v55  ;;  %4927 = vmatprep.mubr.msk.f32.mxu0 %vm5509_vm5, %v5510_v56 }
 0x6fd   : > { %5084 = vmatprep.subr.bf16.mxu0 %v5508_v52 }
 0x7ca   : > { %v2126_v17 = vpop.f32.mrb[36].mxu0 }
 0x7cb   : > { %v2130_v18 = vadd.f32 %v2126_v17, %v5800_v32  ;;  %v4915_v19 = vpop.f32.mrb[37].mxu0 }
 0x7cd   : > { %5319 = vtanh.f32 %v2130_v18  ;;  %v4546_v29 = vmul.f32 -1.442695, %v2130_v18 }
 0x7ce   : > { %v2202_v20 = vpop.f32.mrb[38].mxu0 }
 0x7cf   : > { %v2206_v21 = vadd.f32 %v2202_v20, %v5837_v10  ;;  %v4922_v22 = vpop.f32.mrb[39].mxu0 }
 0x7d1   : > { %5321 = vtanh.f32 %v2206_v21  ;;  %v4547_v31 = vmul.f32 -1.442695, %v2206_v21 }
 0x7d2   : > { %5323 = vpow2.f32 %v4546_v29 }
 0x7d3   : > { %5325 = vpow2.f32 %v4547_v31 }
 0x7d7   : > { %v5320_v23 = vpop.eup %5319 }
 0x7d8   : > { %2216 = vrot.lane.b32.xlu0 %v5320_v23, %s5511_s6 }
 0x7db   : > { %v5322_v26 = vpop.eup %5321 }
 0x7dc   : > { %2240 = vrot.lane.b32.xlu1 %v5322_v26, %s5511_s6  ;;  %v5324_v33 = vpop.eup %5323 }
 0x7dd   : > { %v2210_v25 = vadd.f32 1.0, %v5324_v33  ;;  %v5326_v32 = vpop.eup %5325 }
 0x7de   : > { %v2234_v28 = vadd.f32 1.0, %v5326_v32 }
 0x7df   : > { %5327 = vrcp.f32 %v2210_v25 }
 0x7e0   : > { %5329 = vrcp.f32 %v2234_v28 }
 0x7e9   : > { %v5328_v27 = vpop.eup %5327 }
 0x7ea   : > { %v5330_v37 = vpop.eup %5329  ;;  %v2214_v41 = vmul.f32 %v5328_v27, %v2017_v50 }
 0x7eb   : > { %v2238_v47 = vmul.f32 %v5330_v37, %v2041_v1 }
 0x84a   : > { %v2217_v10 = vpop.permute.xlu0 %2216 }
 0x84b   : > { %v2219_v35 = vmul.f32 %v5328_v27, %v2217_v10 }
 0x84d   : > { %2221 = vrot.lane.b32.xlu0 %v2219_v35, %s5512_s8 }
 0x84e   : > { %v2241_v15 = vpop.permute.xlu1 %2240 }
 0x84f   : > { %v2243_v39 = vmul.f32 %v5330_v37, %v2241_v15 }
 0x851   : > { %2245 = vrot.lane.b32.xlu1 %v2243_v39, %s5512_s8 }
 0x8bf   : > { %v2222_v43 = vpop.permute.xlu0 %2221 }
 0x8c0   : > { %v2224_v45 = vadd.f32 %v2222_v43, %v2214_v41 }
 0x8c2   : > { %5331 = vtanh.f32 %v2224_v45 }
 0x8c3   : > { %v2246_v49 = vpop.permute.xlu1 %2245 }
 0x8c4   : > { %v2248_v53 = vadd.f32 %v2246_v49, %v2238_v47 }
 0x8c6   : > { %5333 = vtanh.f32 %v2248_v53 }
 0x8cc   : > { %v5332_v63 = vpop.eup %5331 }
 0x8cd   : > { %2227 = vrot.lane.b32.xlu0 %v5332_v63, %s5512_s8 }
 0x8d0   : > { %v5334_v5 = vpop.eup %5333 }
 0x8d1   : > { %2251 = vrot.lane.b32.xlu1 %v5334_v5, %s5512_s8 }
 0x93f   : > { %v2228_v7 = vpop.permute.xlu0 %2227 }
 0x940   : > { %v5899_v9 = vmul.f32 %v5328_v27, %v2228_v7 }
 0x942   : > { %2262 = vrot.lane.b32.xlu0 %v5899_v9, %s5513_s9 }
 0x943   : > { %v2252_v50 = vpop.permute.xlu1 %2251 }
 0x944   : > { %v5903_v61 = vmul.f32 %v5330_v37, %v2252_v50 }
 0x946   : > { %2337 = vrot.lane.b32.xlu1 %v5903_v61, %s5513_s9 }
 0x9b4   : > { %v2263_v1 = vpop.permute.xlu0 %2262 }
 0x9b5   : > { %4928 = vmatmul.mubr.msk.f32.vlgmr.msra.gmra.mrb[40].mxu0 %vm1361_vm6, %v2263_v1 }
 0x9b6   : > { %5086 = vmatpush3.bf16.msra.mxu0 %v5781_v24  ;;  %4934 = vmatprep.mubr.msk.f32.mxu0 %vm5509_vm5, %v5510_v56 }
 0x9b7   : > { %5087 = vmatprep.subr.bf16.mxu0 %v5508_v52 }
 0x9b8   : > { %v2338_v3 = vpop.permute.xlu1 %2337 }
 0x9b9   : > { %4935 = vmatmul.mubr.msk.f32.vlgmr.msra.gmra.mrb[42].mxu0 %vm1361_vm6, %v2338_v3 }
 0x9ba   : > { %5089 = vmatpush3.bf16.msra.mxu0 %v5729_v55  ;;  %4941 = vmatprep.mubr.msk.f32.mxu0 %vm5509_vm5, %v5510_v56 }
 0x9bb   : > { %5090 = vmatprep.subr.bf16.mxu0 %v5508_v52 }
 0xa88   : > { %v2332_v16 = vpop.f32.mrb[40].mxu0 }
 0xa89   : > { %v2336_v17 = vadd.f32 %v2332_v16, %v5798_v30  ;;  %v4929_v18 = vpop.f32.mrb[41].mxu0 }
 0xa8b   : > { %5335 = vtanh.f32 %v2336_v17  ;;  %v4550_v26 = vmul.f32 -1.442695, %v2336_v17 }
 0xa8c   : > { %v2407_v19 = vpop.f32.mrb[42].mxu0 }
 0xa8d   : > { %v2411_v20 = vadd.f32 %v2407_v19, %v5839_v12  ;;  %v4936_v21 = vpop.f32.mrb[43].mxu0 }
 0xa8f   : > { %5337 = vtanh.f32 %v2411_v20  ;;  %v4551_v29 = vmul.f32 -1.442695, %v2411_v20 }
 0xa90   : > { %5339 = vpow2.f32 %v4550_v26 }
 0xa91   : > { %5341 = vpow2.f32 %v4551_v29 }
 0xa95   : > { %v5336_v22 = vpop.eup %5335 }
 0xa96   : > { %2421 = vrot.lane.b32.xlu0 %v5336_v22, %s5511_s6 }
 0xa99   : > { %v5338_v23 = vpop.eup %5337 }
 0xa9a   : > { %2445 = vrot.lane.b32.xlu1 %v5338_v23, %s5511_s6  ;;  %v5340_v31 = vpop.eup %5339 }
 0xa9b   : > { %v2415_v33 = vadd.f32 1.0, %v5340_v31  ;;  %v5342_v30 = vpop.eup %5341 }
 0xa9c   : > { %v2439_v25 = vadd.f32 1.0, %v5342_v30 }
 0xa9d   : > { %5343 = vrcp.f32 %v2415_v33 }
 0xa9e   : > { %5345 = vrcp.f32 %v2439_v25 }
 0xaa7   : > { %v5344_v32 = vpop.eup %5343 }
 0xaa8   : > { %v5346_v27 = vpop.eup %5345  ;;  %v2419_v37 = vmul.f32 %v5344_v32, %v2224_v45 }
 0xaa9   : > { %v2443_v41 = vmul.f32 %v5346_v27, %v2248_v53 }
 0xb08   : > { %v2422_v12 = vpop.permute.xlu0 %2421 }
 0xb09   : > { %v2424_v28 = vmul.f32 %v5344_v32, %v2422_v12 }
 0xb0b   : > { %2426 = vrot.lane.b32.xlu0 %v2424_v28, %s5512_s8 }
 0xb0c   : > { %v2446_v10 = vpop.permute.xlu1 %2445 }
 0xb0d   : > { %v2448_v35 = vmul.f32 %v5346_v27, %v2446_v10 }
 0xb0f   : > { %2450 = vrot.lane.b32.xlu1 %v2448_v35, %s5512_s8 }
 0xb7d   : > { %v2427_v15 = vpop.permute.xlu0 %2426 }
 0xb7e   : > { %v2429_v39 = vadd.f32 %v2427_v15, %v2419_v37 }
 0xb80   : > { %5347 = vtanh.f32 %v2429_v39 }
 0xb81   : > { %v2451_v43 = vpop.permute.xlu1 %2450 }
 0xb82   : > { %v2453_v47 = vadd.f32 %v2451_v43, %v2443_v41 }
 0xb84   : > { %5349 = vtanh.f32 %v2453_v47 }
 0xb8a   : > { %v5348_v49 = vpop.eup %5347 }
 0xb8b   : > { %2432 = vrot.lane.b32.xlu0 %v5348_v49, %s5512_s8 }
 0xb8e   : > { %v5350_v63 = vpop.eup %5349 }
 0xb8f   : > { %2456 = vrot.lane.b32.xlu1 %v5350_v63, %s5512_s8 }
 0xbfd   : > { %v2433_v5 = vpop.permute.xlu0 %2432 }
 0xbfe   : > { %v5925_v7 = vmul.f32 %v5344_v32, %v2433_v5 }
 0xc00   : > { %2470 = vrot.lane.b32.xlu0 %v5925_v7, %s5513_s9 }
 0xc01   : > { %v2457_v45 = vpop.permute.xlu1 %2456 }
 0xc02   : > { %v2459_v50 = vmul.f32 %v5346_v27, %v2457_v45 }
 0xc04   : > { %2466 = vrot.lane.b32.xlu1 %v2459_v50, %s5513_s9 }
 0xc72   : > { %v2471_v53 = vpop.permute.xlu0 %2470 }
 0xc73   : > { %4942 = vmatmul.mubr.msk.f32.vlgmr.msra.gmra.mrb[44].mxu0 %vm1361_vm6, %v2471_v53 }
 0xc74   : > { %5092 = vmatpush3.bf16.msra.mxu0 %v5781_v24  ;;  %4948 = vmatprep.mubr.msk.f32.mxu0 %vm5509_vm5, %v5510_v56 }
 0xc75   : > { %5096 = vmatprep.subr.bf16.mxu0 %v5508_v52 }
 0xc76   : > { %v5935_v1 = vpop.permute.xlu1 %2466 }
 0xc77   : > { %4949 = vmatmul.mubr.msk.f32.vlgmr.msra.gmra.mrb[46].mxu0 %vm1361_vm6, %v5935_v1 }
 0xc78   : > { %5098 = vmatpush3.bf16.msra.mxu0 %v5781_v24  ;;  %4962 = vmatprep.mubr.msk.f32.mxu0 %vm5509_vm5, %v5510_v56 }
 0xc79   : > { %5102 = vmatprep.subr.bf16.mxu0 %v5508_v52 }
 0xd46   : > { %v2540_v3 = vpop.f32.mrb[44].mxu0 }
 0xd47   : > { %v2544_v16 = vadd.f32 %v2540_v3, %v5804_v36  ;;  %v4943_v17 = vpop.f32.mrb[45].mxu0 }
 0xd49   : > { %5351 = vtanh.f32 %v2544_v16  ;;  %v4554_v23 = vmul.f32 -1.442695, %v2544_v16 }
 0xd4a   : > { %v2613_v18 = vpop.f32.mrb[46].mxu0 }
 0xd4b   : > { %v2617_v19 = vadd.f32 %v2613_v18, %v5833_v6  ;;  %v4950_v20 = vpop.f32.mrb[47].mxu0 }
 0xd4d   : > { %5353 = vtanh.f32 %v2617_v19  ;;  %v4555_v26 = vmul.f32 -1.442695, %v2617_v19 }
 0xd4e   : > { %5355 = vpow2.f32 %v4554_v23 }
 0xd4f   : > { %5357 = vpow2.f32 %v4555_v26 }
 0xd53   : > { %v5352_v21 = vpop.eup %5351 }
 0xd54   : > { %2627 = vrot.lane.b32.xlu0 %v5352_v21, %s5511_s6 }
 0xd57   : > { %v5354_v22 = vpop.eup %5353 }
 0xd58   : > { %2651 = vrot.lane.b32.xlu1 %v5354_v22, %s5511_s6  ;;  %v5356_v29 = vpop.eup %5355 }
 0xd59   : > { %v2621_v31 = vadd.f32 1.0, %v5356_v29  ;;  %v5358_v36 = vpop.eup %5357 }
 0xd5a   : > { %v2645_v33 = vadd.f32 1.0, %v5358_v36 }
 0xd5b   : > { %5359 = vrcp.f32 %v2621_v31 }
 0xd5c   : > { %5361 = vrcp.f32 %v2645_v33 }
 0xd65   : > { %v5360_v30 = vpop.eup %5359 }
 0xd66   : > { %v5362_v32 = vpop.eup %5361  ;;  %v2625_v27 = vmul.f32 %v5360_v30, %v2429_v39 }
 0xd67   : > { %v2649_v37 = vmul.f32 %v5362_v32, %v2453_v47 }
 0xdc6   : > { %v2628_v6 = vpop.permute.xlu0 %2627 }
 0xdc7   : > { %v2630_v25 = vmul.f32 %v5360_v30, %v2628_v6 }
 0xdc9   : > { %2632 = vrot.lane.b32.xlu0 %v2630_v25, %s5512_s8 }
 0xdca   : > { %v2652_v12 = vpop.permute.xlu1 %2651 }
 0xdcb   : > { %v2654_v28 = vmul.f32 %v5362_v32, %v2652_v12 }
 0xdcd   : > { %2656 = vrot.lane.b32.xlu1 %v2654_v28, %s5512_s8 }
 0xe3b   : > { %v2633_v10 = vpop.permute.xlu0 %2632 }
 0xe3c   : > { %v2635_v35 = vadd.f32 %v2633_v10, %v2625_v27 }
 0xe3e   : > { %5363 = vtanh.f32 %v2635_v35 }
 0xe3f   : > { %v2657_v15 = vpop.permute.xlu1 %2656 }
 0xe40   : > { %v2659_v41 = vadd.f32 %v2657_v15, %v2649_v37 }
 0xe42   : > { %5365 = vtanh.f32 %v2659_v41 }
 0xe48   : > { %v5364_v43 = vpop.eup %5363 }
 0xe49   : > { %2638 = vrot.lane.b32.xlu0 %v5364_v43, %s5512_s8 }
 0xe4c   : > { %v5366_v49 = vpop.eup %5365 }
 0xe4d   : > { %2662 = vrot.lane.b32.xlu1 %v5366_v49, %s5512_s8 }
 0xebb   : > { %v2639_v63 = vpop.permute.xlu0 %2638 }
 0xebc   : > { %v5951_v5 = vmul.f32 %v5360_v30, %v2639_v63 }
 0xebe   : > { %2678 = vrot.lane.b32.xlu0 %v5951_v5, %s5513_s9 }
 0xebf   : > { %v2663_v39 = vpop.permute.xlu1 %2662 }
 0xec0   : > { %v5955_v45 = vmul.f32 %v5362_v32, %v2663_v39 }
 0xec2   : > { %2753 = vrot.lane.b32.xlu1 %v5955_v45, %s5513_s9 }
 0xf30   : > { %v2679_v47 = vpop.permute.xlu0 %2678 }
 0xf31   : > { %4956 = vmatmul.mubr.msk.f32.vlgmr.msra.gmra.mrb[12].mxu1 %vm1361_vm6, %v2679_v47 }
 0xf32   : > { %5101 = vmatpush3.bf16.msra.mxu1 %v5729_v55  ;;  %4969 = vmatprep.mubr.msk.f32.mxu1 %vm5509_vm5, %v5510_v56 }
 0xf33   : > { %5105 = vmatprep.subr.bf16.mxu1 %v5508_v52 }
 0xf34   : > { %v2754_v50 = vpop.permute.xlu1 %2753 }
 0xf35   : > { %4963 = vmatmul.mubr.msk.f32.vlgmr.msra.gmra.mrb[48].mxu0 %vm1361_vm6, %v2754_v50 }
 0xf36   : > { %5104 = vmatpush3.bf16.msra.mxu0 %v5781_v24  ;;  %4976 = vmatprep.mubr.msk.f32.mxu0 %vm5509_vm5, %v5510_v56 }
 0xf37   : > { %5108 = vmatprep.subr.bf16.mxu0 %v5508_v52 }
0x1004   : > { %v2748_v53 = vpop.f32.mrb[12].mxu1 }
0x1005   : > { %v2752_v3 = vadd.f32 %v2748_v53, %v5802_v34  ;;  %v4957_v16 = vpop.f32.mrb[13].mxu1 }
0x1007   : > { %5367 = vtanh.f32 %v2752_v3  ;;  %v4558_v22 = vmul.f32 -1.442695, %v2752_v3 }
0x1008   : > { %v2823_v17 = vpop.f32.mrb[48].mxu0 }
0x1009   : > { %v2827_v18 = vadd.f32 %v2823_v17, %v5835_v8  ;;  %v4964_v19 = vpop.f32.mrb[49].mxu0 }
0x100b   : > { %5369 = vtanh.f32 %v2827_v18  ;;  %v4559_v23 = vmul.f32 -1.442695, %v2827_v18 }
0x100c   : > { %5371 = vpow2.f32 %v4558_v22 }
0x100d   : > { %5373 = vpow2.f32 %v4559_v23 }
0x1011   : > { %v5368_v20 = vpop.eup %5367 }
0x1012   : > { %2837 = vrot.lane.b32.xlu0 %v5368_v20, %s5511_s6 }
0x1015   : > { %v5370_v21 = vpop.eup %5369 }
0x1016   : > { %2861 = vrot.lane.b32.xlu1 %v5370_v21, %s5511_s6  ;;  %v5372_v26 = vpop.eup %5371 }
0x1017   : > { %v2831_v29 = vadd.f32 1.0, %v5372_v26  ;;  %v5374_v34 = vpop.eup %5373 }
0x1018   : > { %v2855_v31 = vadd.f32 1.0, %v5374_v34 }
0x1019   : > { %5375 = vrcp.f32 %v2831_v29 }
0x101a   : > { %5377 = vrcp.f32 %v2855_v31 }
0x1023   : > { %v5376_v36 = vpop.eup %5375 }
0x1024   : > { %v5378_v30 = vpop.eup %5377  ;;  %v2835_v32 = vmul.f32 %v5376_v36, %v2635_v35 }
0x1025   : > { %v2859_v27 = vmul.f32 %v5378_v30, %v2659_v41 }
0x1084   : > { %v2838_v8 = vpop.permute.xlu0 %2837 }
0x1085   : > { %v2840_v33 = vmul.f32 %v5376_v36, %v2838_v8 }
0x1087   : > { %2842 = vrot.lane.b32.xlu0 %v2840_v33, %s5512_s8 }
0x1088   : > { %v2862_v6 = vpop.permute.xlu1 %2861 }
0x1089   : > { %v2864_v25 = vmul.f32 %v5378_v30, %v2862_v6 }
0x108b   : > { %2866 = vrot.lane.b32.xlu1 %v2864_v25, %s5512_s8 }
0x10f9   : > { %v2843_v12 = vpop.permute.xlu0 %2842 }
0x10fa   : > { %v2845_v28 = vadd.f32 %v2843_v12, %v2835_v32 }
0x10fc   : > { %5379 = vtanh.f32 %v2845_v28 }
0x10fd   : > { %v2867_v10 = vpop.permute.xlu1 %2866 }
0x10fe   : > { %v2869_v37 = vadd.f32 %v2867_v10, %v2859_v27 }
0x1100   : > { %5381 = vtanh.f32 %v2869_v37 }
0x1106   : > { %v5380_v15 = vpop.eup %5379 }
0x1107   : > { %2848 = vrot.lane.b32.xlu0 %v5380_v15, %s5512_s8 }
0x110a   : > { %v5382_v43 = vpop.eup %5381 }
0x110b   : > { %2872 = vrot.lane.b32.xlu1 %v5382_v43, %s5512_s8 }
0x1179   : > { %v2849_v49 = vpop.permute.xlu0 %2848 }
0x117a   : > { %v5977_v63 = vmul.f32 %v5376_v36, %v2849_v49 }
0x117c   : > { %2888 = vrot.lane.b32.xlu0 %v5977_v63, %s5513_s9 }
0x117d   : > { %v2873_v35 = vpop.permute.xlu1 %2872 }
0x117e   : > { %v5981_v39 = vmul.f32 %v5378_v30, %v2873_v35 }
0x1180   : > { %2963 = vrot.lane.b32.xlu1 %v5981_v39, %s5513_s9 }
0x11ee   : > { %v2889_v41 = vpop.permute.xlu0 %2888 }
0x11ef   : > { %4970 = vmatmul.mubr.msk.f32.vlgmr.msra.gmra.mrb[14].mxu1 %vm1361_vm6, %v2889_v41 }
0x11f0   : > { %5107 = vmatpush3.bf16.msra.mxu1 %v5729_v55  ;;  %4983 = vmatprep.mubr.msk.f32.mxu1 %vm5509_vm5, %v5510_v56 }
0x11f1   : > { %5111 = vmatprep.subr.bf16.mxu1 %v5508_v52 }
0x11f2   : > { %v2964_v47 = vpop.permute.xlu1 %2963 }
0x11f3   : > { %4977 = vmatmul.mubr.msk.f32.vlgmr.msra.gmra.mrb[50].mxu0 %vm1361_vm6, %v2964_v47 }
0x11f4   : > { %5110 = vmatpush3.bf16.msra.mxu0 %v5781_v24  ;;  %4990 = vmatprep.mubr.msk.f32.mxu0 %vm5509_vm5, %v5510_v56 }
0x11f5   : > { %5114 = vmatprep.subr.bf16.mxu0 %v5508_v52 }
0x12c2   : > { %v2958_v50 = vpop.f32.mrb[14].mxu1 }
0x12c3   : > { %v2962_v53 = vadd.f32 %v2958_v50, %v5808_v40  ;;  %v4971_v3 = vpop.f32.mrb[15].mxu1 }
0x12c5   : > { %5383 = vtanh.f32 %v2962_v53  ;;  %v4562_v21 = vmul.f32 -1.442695, %v2962_v53 }
0x12c6   : > { %v3033_v16 = vpop.f32.mrb[50].mxu0 }
0x12c7   : > { %v3037_v17 = vadd.f32 %v3033_v16, %v5829_v2  ;;  %v4978_v18 = vpop.f32.mrb[51].mxu0 }
0x12c9   : > { %5385 = vtanh.f32 %v3037_v17  ;;  %v4563_v22 = vmul.f32 -1.442695, %v3037_v17 }
0x12ca   : > { %5387 = vpow2.f32 %v4562_v21 }
0x12cb   : > { %5389 = vpow2.f32 %v4563_v22 }
0x12cf   : > { %v5384_v19 = vpop.eup %5383 }
0x12d0   : > { %3047 = vrot.lane.b32.xlu0 %v5384_v19, %s5511_s6 }
0x12d3   : > { %v5386_v20 = vpop.eup %5385 }
0x12d4   : > { %3071 = vrot.lane.b32.xlu1 %v5386_v20, %s5511_s6  ;;  %v5388_v23 = vpop.eup %5387 }
0x12d5   : > { %v3041_v26 = vadd.f32 1.0, %v5388_v23  ;;  %v5390_v40 = vpop.eup %5389 }
0x12d6   : > { %v3065_v29 = vadd.f32 1.0, %v5390_v40 }
0x12d7   : > { %5391 = vrcp.f32 %v3041_v26 }
0x12d8   : > { %5393 = vrcp.f32 %v3065_v29 }
0x12e1   : > { %v5392_v34 = vpop.eup %5391 }
0x12e2   : > { %v5394_v36 = vpop.eup %5393  ;;  %v3045_v30 = vmul.f32 %v5392_v34, %v2845_v28 }
0x12e3   : > { %v3069_v32 = vmul.f32 %v5394_v36, %v2869_v37 }
0x1342   : > { %v3048_v2 = vpop.permute.xlu0 %3047 }
0x1343   : > { %v3050_v31 = vmul.f32 %v5392_v34, %v3048_v2 }
0x1345   : > { %3052 = vrot.lane.b32.xlu0 %v3050_v31, %s5512_s8 }
0x1346   : > { %v3072_v8 = vpop.permute.xlu1 %3071 }
0x1347   : > { %v3074_v33 = vmul.f32 %v5394_v36, %v3072_v8 }
0x1349   : > { %3076 = vrot.lane.b32.xlu1 %v3074_v33, %s5512_s8 }
0x13b7   : > { %v3053_v6 = vpop.permute.xlu0 %3052 }
0x13b8   : > { %v3055_v25 = vadd.f32 %v3053_v6, %v3045_v30 }
0x13ba   : > { %5395 = vtanh.f32 %v3055_v25 }
0x13bb   : > { %v3077_v12 = vpop.permute.xlu1 %3076 }
0x13bc   : > { %v3079_v27 = vadd.f32 %v3077_v12, %v3069_v32 }
0x13be   : > { %5397 = vtanh.f32 %v3079_v27 }
0x13c4   : > { %v5396_v10 = vpop.eup %5395 }
0x13c5   : > { %3058 = vrot.lane.b32.xlu0 %v5396_v10, %s5512_s8 }
0x13c8   : > { %v5398_v15 = vpop.eup %5397 }
0x13c9   : > { %3082 = vrot.lane.b32.xlu1 %v5398_v15, %s5512_s8 }
0x1437   : > { %v3059_v43 = vpop.permute.xlu0 %3058 }
0x1438   : > { %v6003_v49 = vmul.f32 %v5392_v34, %v3059_v43 }
0x143a   : > { %3096 = vrot.lane.b32.xlu0 %v6003_v49, %s5513_s9 }
0x143b   : > { %v3083_v28 = vpop.permute.xlu1 %3082 }
0x143c   : > { %v6007_v35 = vmul.f32 %v5394_v36, %v3083_v28 }
0x143e   : > { %3171 = vrot.lane.b32.xlu1 %v6007_v35, %s5513_s9 }
0x14ac   : > { %v3097_v37 = vpop.permute.xlu0 %3096 }
0x14ad   : > { %4984 = vmatmul.mubr.msk.f32.vlgmr.msra.gmra.mrb[16].mxu1 %vm1361_vm6, %v3097_v37 }
0x14ae   : > { %5113 = vmatpush3.bf16.msra.mxu1 %v5729_v55  ;;  %4997 = vmatprep.mubr.msk.f32.mxu1 %vm5509_vm5, %v5510_v56 }
0x14af   : > { %5117 = vmatprep.subr.bf16.mxu1 %v5508_v52 }
0x14b0   : > { %v3172_v41 = vpop.permute.xlu1 %3171 }
0x14b1   : > { %4991 = vmatmul.mubr.msk.f32.vlgmr.msra.gmra.mrb[52].mxu0 %vm1361_vm6, %v3172_v41 }
0x14b2   : > { %5116 = vmatpush3.bf16.msra.mxu0 %v5781_v24  ;;  %5004 = vmatprep.mubr.msk.f32.mxu0 %vm5509_vm5, %v5510_v56 }
0x14b3   : > { %5120 = vmatprep.subr.bf16.mxu0 %v5508_v52 }
0x1580   : > { %v3166_v47 = vpop.f32.mrb[16].mxu1 }
0x1581   : > { %v3170_v50 = vadd.f32 %v3166_v47, %v5806_v38  ;;  %v4985_v53 = vpop.f32.mrb[17].mxu1 }
0x1583   : > { %5399 = vtanh.f32 %v3170_v50  ;;  %v4566_v20 = vmul.f32 -1.442695, %v3170_v50 }
0x1584   : > { %v3241_v3 = vpop.f32.mrb[52].mxu0 }
0x1585   : > { %v3245_v16 = vadd.f32 %v3241_v3, %v5831_v4  ;;  %v4992_v17 = vpop.f32.mrb[53].mxu0 }
0x1587   : > { %5401 = vtanh.f32 %v3245_v16  ;;  %v4567_v21 = vmul.f32 -1.442695, %v3245_v16 }
0x1588   : > { %5403 = vpow2.f32 %v4566_v20 }
0x1589   : > { %5405 = vpow2.f32 %v4567_v21 }
0x158d   : > { %v5400_v18 = vpop.eup %5399 }
0x158e   : > { %3255 = vrot.lane.b32.xlu0 %v5400_v18, %s5511_s6 }
0x1591   : > { %v5402_v19 = vpop.eup %5401 }
0x1592   : > { %3279 = vrot.lane.b32.xlu1 %v5402_v19, %s5511_s6  ;;  %v5404_v22 = vpop.eup %5403 }
0x1593   : > { %v3249_v23 = vadd.f32 1.0, %v5404_v22  ;;  %v5406_v38 = vpop.eup %5405 }
0x1594   : > { %v3273_v26 = vadd.f32 1.0, %v5406_v38 }
0x1595   : > { %5407 = vrcp.f32 %v3249_v23 }
0x1596   : > { %5409 = vrcp.f32 %v3273_v26 }
0x159f   : > { %v5408_v40 = vpop.eup %5407 }
0x15a0   : > { %v5410_v34 = vpop.eup %5409  ;;  %v3253_v36 = vmul.f32 %v5408_v40, %v3055_v25 }
0x15a1   : > { %v3277_v30 = vmul.f32 %v5410_v34, %v3079_v27 }
0x1600   : > { %v3256_v4 = vpop.permute.xlu0 %3255 }
0x1601   : > { %v3258_v29 = vmul.f32 %v5408_v40, %v3256_v4 }
0x1603   : > { %3260 = vrot.lane.b32.xlu0 %v3258_v29, %s5512_s8 }
0x1604   : > { %v3280_v2 = vpop.permute.xlu1 %3279 }
0x1605   : > { %v3282_v31 = vmul.f32 %v5410_v34, %v3280_v2 }
0x1607   : > { %3284 = vrot.lane.b32.xlu1 %v3282_v31, %s5512_s8 }
0x1675   : > { %v3261_v8 = vpop.permute.xlu0 %3260 }
0x1676   : > { %v3263_v33 = vadd.f32 %v3261_v8, %v3253_v36 }
0x1678   : > { %5411 = vtanh.f32 %v3263_v33 }
0x1679   : > { %v3285_v6 = vpop.permute.xlu1 %3284 }
0x167a   : > { %v3287_v32 = vadd.f32 %v3285_v6, %v3277_v30 }
0x167c   : > { %5413 = vtanh.f32 %v3287_v32 }
0x1682   : > { %v5412_v12 = vpop.eup %5411 }
0x1683   : > { %3266 = vrot.lane.b32.xlu0 %v5412_v12, %s5512_s8 }
0x1686   : > { %v5414_v10 = vpop.eup %5413 }
0x1687   : > { %3290 = vrot.lane.b32.xlu1 %v5414_v10, %s5512_s8 }
0x16f5   : > { %v3267_v15 = vpop.permute.xlu0 %3266 }
0x16f6   : > { %v6029_v43 = vmul.f32 %v5408_v40, %v3267_v15 }
0x16f8   : > { %3304 = vrot.lane.b32.xlu0 %v6029_v43, %s5513_s9 }
0x16f9   : > { %v3291_v25 = vpop.permute.xlu1 %3290 }
0x16fa   : > { %v6033_v28 = vmul.f32 %v5410_v34, %v3291_v25 }
0x16fc   : > { %3379 = vrot.lane.b32.xlu1 %v6033_v28, %s5513_s9 }
0x176a   : > { %v3305_v27 = vpop.permute.xlu0 %3304 }
0x176b   : > { %4998 = vmatmul.mubr.msk.f32.vlgmr.msra.gmra.mrb[18].mxu1 %vm1361_vm6, %v3305_v27 }
0x176c   : > { %5119 = vmatpush3.bf16.msra.mxu1 %v5729_v55  ;;  %5011 = vmatprep.mubr.msk.f32.mxu1 %vm5509_vm5, %v5510_v56 }
0x176d   : > { %5123 = vmatprep.subr.bf16.mxu1 %v5508_v52 }
0x176e   : > { %v3380_v37 = vpop.permute.xlu1 %3379 }
0x176f   : > { %5005 = vmatmul.mubr.msk.f32.vlgmr.msra.gmra.mrb[54].mxu0 %vm1361_vm6, %v3380_v37 }
0x1770   : > { %5122 = vmatpush3.bf16.msra.mxu0 %v5781_v24  ;;  %5018 = vmatprep.mubr.msk.f32.mxu0 %vm5509_vm5, %v5510_v56 }
0x1771   : > { %5126 = vmatprep.subr.bf16.mxu0 %v5508_v52 }
0x183e   : > { %v3374_v41 = vpop.f32.mrb[18].mxu1 }
0x183f   : > { %v3378_v47 = vadd.f32 %v3374_v41, %v5812_v44  ;;  %v4999_v50 = vpop.f32.mrb[19].mxu1 }
0x1841   : > { %5415 = vtanh.f32 %v3378_v47  ;;  %v4570_v19 = vmul.f32 -1.442695, %v3378_v47 }
0x1842   : > { %v3449_v53 = vpop.f32.mrb[54].mxu0 }
0x1843   : > { %v3453_v3 = vadd.f32 %v3449_v53, %v5825_v62  ;;  %v5006_v16 = vpop.f32.mrb[55].mxu0 }
0x1845   : > { %5417 = vtanh.f32 %v3453_v3  ;;  %v4571_v20 = vmul.f32 -1.442695, %v3453_v3 }
0x1846   : > { %5419 = vpow2.f32 %v4570_v19 }
0x1847   : > { %5421 = vpow2.f32 %v4571_v20 }
0x184b   : > { %v5416_v17 = vpop.eup %5415 }
0x184c   : > { %3463 = vrot.lane.b32.xlu0 %v5416_v17, %s5511_s6 }
0x184f   : > { %v5418_v18 = vpop.eup %5417 }
0x1850   : > { %3487 = vrot.lane.b32.xlu1 %v5418_v18, %s5511_s6  ;;  %v5420_v21 = vpop.eup %5419 }
0x1851   : > { %v3457_v22 = vadd.f32 1.0, %v5420_v21  ;;  %v5422_v44 = vpop.eup %5421 }
0x1852   : > { %v3481_v23 = vadd.f32 1.0, %v5422_v44 }
0x1853   : > { %5423 = vrcp.f32 %v3457_v22 }
0x1854   : > { %5425 = vrcp.f32 %v3481_v23 }
0x185d   : > { %v5424_v38 = vpop.eup %5423 }
0x185e   : > { %v5426_v40 = vpop.eup %5425  ;;  %v3461_v34 = vmul.f32 %v5424_v38, %v3263_v33 }
0x185f   : > { %v3485_v36 = vmul.f32 %v5426_v40, %v3287_v32 }
0x18be   : > { %v3464_v62 = vpop.permute.xlu0 %3463 }
0x18bf   : > { %v3466_v26 = vmul.f32 %v5424_v38, %v3464_v62 }
0x18c1   : > { %3468 = vrot.lane.b32.xlu0 %v3466_v26, %s5512_s8 }
0x18c2   : > { %v3488_v4 = vpop.permute.xlu1 %3487 }
0x18c3   : > { %v3490_v29 = vmul.f32 %v5426_v40, %v3488_v4 }
0x18c5   : > { %3492 = vrot.lane.b32.xlu1 %v3490_v29, %s5512_s8 }
0x1933   : > { %v3469_v2 = vpop.permute.xlu0 %3468 }
0x1934   : > { %v3471_v31 = vadd.f32 %v3469_v2, %v3461_v34 }
0x1936   : > { %5427 = vtanh.f32 %v3471_v31 }
0x1937   : > { %v3493_v8 = vpop.permute.xlu1 %3492 }
0x1938   : > { %v3495_v30 = vadd.f32 %v3493_v8, %v3485_v36 }
0x193a   : > { %5429 = vtanh.f32 %v3495_v30 }
0x1940   : > { %v5428_v6 = vpop.eup %5427 }
0x1941   : > { %3474 = vrot.lane.b32.xlu0 %v5428_v6, %s5512_s8 }
0x1944   : > { %v5430_v12 = vpop.eup %5429 }
0x1945   : > { %3498 = vrot.lane.b32.xlu1 %v5430_v12, %s5512_s8 }
0x19b3   : > { %v3475_v10 = vpop.permute.xlu0 %3474 }
0x19b4   : > { %v3477_v15 = vmul.f32 %v5424_v38, %v3475_v10 }
0x19b6   : > { %3503 = vrot.lane.b32.xlu0 %v3477_v15, %s5513_s9 }
0x19b7   : > { %v3499_v25 = vpop.permute.xlu1 %3498 }
0x19b8   : > { %v6056_v27 = vmul.f32 %v5426_v40, %v3499_v25 }
0x19ba   : > { %3585 = vrot.lane.b32.xlu1 %v6056_v27, %s5513_s9 }
0x1a28   : > { %v3504_v33 = vpop.permute.xlu0 %3503 }
0x1a29   : > { %3506 = vst.msk [vmem:[#allocation2 + $0x8] sm:$0xff] %vm1361_vm6, %v3504_v33  ;;  %5012 = vmatmul.mubr.msk.f32.vlgmr.msra.gmra.mrb[20].mxu1 %vm1361_vm6, %v3504_v33 }
0x1a2a   : > { %5125 = vmatpush3.bf16.msra.mxu1 %v5729_v55  ;;  %5025 = vmatprep.mubr.msk.f32.mxu1 %vm5509_vm5, %v5510_v56 }
0x1a2b   : > { %5129 = vmatprep.subr.bf16.mxu1 %v5508_v52 }
0x1a2c   : > { %v3586_v32 = vpop.permute.xlu1 %3585 }
0x1a2d   : > { %5019 = vmatmul.mubr.msk.f32.vlgmr.msra.gmra.mrb[56].mxu0 %vm1361_vm6, %v3586_v32 }
0x1a2e   : > { %5128 = vmatpush3.bf16.msra.mxu0 %v5781_v24  ;;  %5032 = vmatprep.mubr.msk.f32.mxu0 %vm5509_vm5, %v5510_v56 }
0x1a2f   : > { %5132 = vmatprep.subr.bf16.mxu0 %v5508_v52 }
0x1afc   : > { %v3580_v37 = vpop.f32.mrb[20].mxu1 }
0x1afd   : > { %v3584_v41 = vadd.f32 %v3580_v37, %v5810_v42  ;;  %v5013_v47 = vpop.f32.mrb[21].mxu1 }
0x1aff   : > { %5431 = vtanh.f32 %v3584_v41  ;;  %v4574_v18 = vmul.f32 -1.442695, %v3584_v41 }
0x1b00   : > { %v3655_v50 = vpop.f32.mrb[56].mxu0 }
0x1b01   : > { %v3659_v53 = vadd.f32 %v3655_v50, %v5827_v0  ;;  %v5020_v3 = vpop.f32.mrb[57].mxu0 }
0x1b03   : > { %5433 = vtanh.f32 %v3659_v53  ;;  %v4575_v19 = vmul.f32 -1.442695, %v3659_v53 }
0x1b04   : > { %5435 = vpow2.f32 %v4574_v18 }
0x1b05   : > { %5437 = vpow2.f32 %v4575_v19 }
0x1b09   : > { %v5432_v16 = vpop.eup %5431 }
0x1b0a   : > { %3669 = vrot.lane.b32.xlu0 %v5432_v16, %s5511_s6 }
0x1b0d   : > { %v5434_v17 = vpop.eup %5433 }
0x1b0e   : > { %3693 = vrot.lane.b32.xlu1 %v5434_v17, %s5511_s6  ;;  %v5436_v20 = vpop.eup %5435 }
0x1b0f   : > { %v3663_v21 = vadd.f32 1.0, %v5436_v20  ;;  %v5438_v42 = vpop.eup %5437 }
0x1b10   : > { %v3687_v22 = vadd.f32 1.0, %v5438_v42 }
0x1b11   : > { %5439 = vrcp.f32 %v3663_v21 }
0x1b12   : > { %5441 = vrcp.f32 %v3687_v22 }
0x1b1b   : > { %v5440_v44 = vpop.eup %5439 }
0x1b1c   : > { %v5442_v38 = vpop.eup %5441  ;;  %v3667_v40 = vmul.f32 %v5440_v44, %v3471_v31 }
0x1b1d   : > { %v3691_v34 = vmul.f32 %v5442_v38, %v3495_v30 }
0x1b7c   : > { %v3670_v0 = vpop.permute.xlu0 %3669 }
0x1b7d   : > { %v3672_v23 = vmul.f32 %v5440_v44, %v3670_v0 }
0x1b7f   : > { %3674 = vrot.lane.b32.xlu0 %v3672_v23, %s5512_s8 }
0x1b80   : > { %v3694_v62 = vpop.permute.xlu1 %3693 }
0x1b81   : > { %v3696_v26 = vmul.f32 %v5442_v38, %v3694_v62 }
0x1b83   : > { %3698 = vrot.lane.b32.xlu1 %v3696_v26, %s5512_s8 }
0x1bf1   : > { %v3675_v4 = vpop.permute.xlu0 %3674 }
0x1bf2   : > { %v3677_v29 = vadd.f32 %v3675_v4, %v3667_v40 }
0x1bf4   : > { %5443 = vtanh.f32 %v3677_v29 }
0x1bf5   : > { %v3699_v2 = vpop.permute.xlu1 %3698 }
0x1bf6   : > { %v3701_v36 = vadd.f32 %v3699_v2, %v3691_v34 }
0x1bf8   : > { %5445 = vtanh.f32 %v3701_v36 }
0x1bfe   : > { %v5444_v8 = vpop.eup %5443 }
0x1bff   : > { %3680 = vrot.lane.b32.xlu0 %v5444_v8, %s5512_s8 }
0x1c02   : > { %v5446_v6 = vpop.eup %5445 }
0x1c03   : > { %3704 = vrot.lane.b32.xlu1 %v5446_v6, %s5512_s8 }
0x1c71   : > { %v3681_v12 = vpop.permute.xlu0 %3680 }
0x1c72   : > { %v6079_v10 = vmul.f32 %v5440_v44, %v3681_v12 }
0x1c74   : > { %3714 = vrot.lane.b32.xlu0 %v6079_v10, %s5513_s9 }
0x1c75   : > { %v3705_v31 = vpop.permute.xlu1 %3704 }
0x1c76   : > { %v6083_v15 = vmul.f32 %v5442_v38, %v3705_v31 }
0x1c78   : > { %3790 = vrot.lane.b32.xlu1 %v6083_v15, %s5513_s9 }
0x1ce6   : > { %v3715_v30 = vpop.permute.xlu0 %3714 }
0x1ce7   : > { %5026 = vmatmul.mubr.msk.f32.vlgmr.msra.gmra.mrb[22].mxu1 %vm1361_vm6, %v3715_v30 }
0x1ce8   : > { %5131 = vmatpush3.bf16.msra.mxu1 %v5729_v55  ;;  %5039 = vmatprep.mubr.msk.f32.mxu1 %vm5509_vm5, %v5510_v56 }
0x1ce9   : > { %5135 = vmatprep.subr.bf16.mxu1 %v5508_v52 }
0x1cea   : > { %v3791_v25 = vpop.permute.xlu1 %3790 }
0x1ceb   : > { %5033 = vmatmul.mubr.msk.f32.vlgmr.msra.gmra.mrb[58].mxu0 %vm1361_vm6, %v3791_v25 }
0x1cec   : > { %5134 = vmatpush3.bf16.msra.mxu0 %v5781_v24  ;;  %5046 = vmatprep.mubr.msk.f32.mxu0 %vm5509_vm5, %v5510_v56 }
0x1ced   : > { %5171 = vmatprep.subr.bf16.mxu0 %v5508_v52 }
0x1dba   : > { %v3784_v33 = vpop.f32.mrb[22].mxu1 }
0x1dbb   : > { %v3788_v32 = vadd.f32 %v3784_v33, %v5816_v48  ;;  %v5027_v37 = vpop.f32.mrb[23].mxu1 }
0x1dbd   : > { %5447 = vtanh.f32 %v3788_v32  ;;  %v4578_v24 = vmul.f32 -1.442695, %v3788_v32 }
0x1dbe   : > { %v3860_v55 = vpop.f32.mrb[58].mxu0 }
0x1dbf   : > { %v3864_v41 = vadd.f32 %v3860_v55, %v5821_v51  ;;  %v5034_v47 = vpop.f32.mrb[59].mxu0 }
0x1dc1   : > { %5449 = vtanh.f32 %v3864_v41  ;;  %v4579_v56 = vmul.f32 -1.442695, %v3864_v41 }
0x1dc2   : > { %5451 = vpow2.f32 %v4578_v24 }
0x1dc3   : > { %5453 = vpow2.f32 %v4579_v56 }
0x1dc7   : > { %v5448_v50 = vpop.eup %5447 }
0x1dc8   : > { %3874 = vrot.lane.b32.xlu0 %v5448_v50, %s5511_s6 }
0x1dcb   : > { %v5450_v53 = vpop.eup %5449 }
0x1dcc   : > { %3898 = vrot.lane.b32.xlu1 %v5450_v53, %s5511_s6  ;;  %v5452_v3 = vpop.eup %5451 }
0x1dcd   : > { %v3868_v16 = vadd.f32 1.0, %v5452_v3  ;;  %v5454_v48 = vpop.eup %5453 }
0x1dce   : > { %v3892_v17 = vadd.f32 1.0, %v5454_v48 }
0x1dcf   : > { %5455 = vrcp.f32 %v3868_v16 }
0x1dd0   : > { %5457 = vrcp.f32 %v3892_v17 }
0x1dd9   : > { %v5456_v18 = vpop.eup %5455 }
0x1dda   : > { %v5458_v20 = vpop.eup %5457  ;;  %v3872_v22 = vmul.f32 %v5456_v18, %v3677_v29 }
0x1ddb   : > { %v3896_v23 = vmul.f32 %v5458_v20, %v3701_v36 }
0x1e3a   : > { %v3875_v51 = vpop.permute.xlu0 %3874 }
0x1e3b   : > { %v3877_v19 = vmul.f32 %v5456_v18, %v3875_v51 }
0x1e3d   : > { %3879 = vrot.lane.b32.xlu0 %v3877_v19, %s5512_s8 }
0x1e3e   : > { %v3899_v21 = vpop.permute.xlu1 %3898 }
0x1e3f   : > { %v3901_v42 = vmul.f32 %v5458_v20, %v3899_v21 }
0x1e41   : > { %3903 = vrot.lane.b32.xlu1 %v3901_v42, %s5512_s8 }
0x1eaf   : > { %v3880_v44 = vpop.permute.xlu0 %3879 }
0x1eb0   : > { %v3882_v0 = vadd.f32 %v3880_v44, %v3872_v22 }
0x1eb2   : > { %5459 = vtanh.f32 %v3882_v0 }
0x1eb3   : > { %v3904_v38 = vpop.permute.xlu1 %3903 }
0x1eb4   : > { %v3906_v62 = vadd.f32 %v3904_v38, %v3896_v23  ;;  %v4137_v23 = vld [vmem:[%s6415_s3 + $0x28] sm:$0xff]  ;;  %v4160_v38 = vld [vmem:[%s6415_s3 + $0xe0] sm:$0xff] }
0x1eb6   : > { %5461 = vtanh.f32 %v3906_v62 }
0x1ebc   : > { %v5460_v26 = vpop.eup %5459 }
0x1ebd   : > { %3885 = vrot.lane.b32.xlu0 %v5460_v26, %s5512_s8 }
0x1ec0   : > { %v5462_v40 = vpop.eup %5461 }
0x1ec1   : > { %3909 = vrot.lane.b32.xlu1 %v5462_v40, %s5512_s8 }
0x1f2f   : > { %v3886_v4 = vpop.permute.xlu0 %3885 }
0x1f30   : > { %v6105_v34 = vmul.f32 %v5456_v18, %v3886_v4  ;;  %v4162_v4 = vld [vmem:[%s6415_s3 + $0xf0] sm:$0xff] }
0x1f32   : > { %3920 = vrot.lane.b32.xlu0 %v6105_v34, %s5513_s9 }
0x1f33   : > { %v3910_v29 = vpop.permute.xlu1 %3909 }
0x1f34   : > { %v6109_v2 = vmul.f32 %v5458_v20, %v3910_v29  ;;  %v4163_v29 = vld [vmem:[%s6415_s3 + $0xf8] sm:$0xff] }
0x1f36   : > { %3995 = vrot.lane.b32.xlu1 %v6109_v2, %s5513_s9 }
0x1fa4   : > { %v3921_v36 = vpop.permute.xlu0 %3920 }
0x1fa5   : > { %5040 = vmatmul.mubr.msk.f32.vlgmr.msra.gmra.mrb[24].mxu1 %vm1361_vm6, %v3921_v36 }
0x1fa8   : > { %v3996_v8 = vpop.permute.xlu1 %3995 }
0x1fa9   : > { %5047 = vmatmul.mubr.msk.f32.vlgmr.msra.gmra.mrb[60].mxu0 %vm1361_vm6, %v3996_v8  ;;  %v5145_v8 = vpack.c.bf16 %v4163_v29, %v4162_v4 }
0x2078   : > { %v3990_v6 = vpop.f32.mrb[24].mxu1 }
0x2079   : > { %v3994_v12 = vadd.f32 %v3990_v6, %v5814_v46  ;;  %v5041_v31 = vpop.f32.mrb[25].mxu1  ;;  %v4141_v6 = vld [vmem:[%s6415_s3 + $0x48] sm:$0xff] }
0x207a   : > { %v4165_v31 = vld [vmem:[%s6415_s3 + $0x108] sm:$0xff] }
0x207b   : > { %5463 = vtanh.f32 %v3994_v12  ;;  %v4582_v55 = vmul.f32 -1.442695, %v3994_v12  ;;  %v4164_v12 = vld [vmem:[%s6415_s3 + $0x100] sm:$0xff] }
0x207c   : > { %v4065_v30 = vpop.f32.mrb[60].mxu0 }
0x207d   : > { %v4069_v25 = vadd.f32 %v4065_v30, %v5823_v54  ;;  %v5048_v33 = vpop.f32.mrb[61].mxu0 }
0x207e   : > { %v4143_v33 = vld [vmem:[%s6415_s3 + $0x58] sm:$0xff] }
0x207f   : > { %5465 = vtanh.f32 %v4069_v25  ;;  %v4583_v41 = vmul.f32 -1.442695, %v4069_v25  ;;  %v5148_v25 = vpack.c.bf16 %v4165_v31, %v4164_v12 }
0x2080   : > { %5467 = vpow2.f32 %v4582_v55 }
0x2081   : > { %5469 = vpow2.f32 %v4583_v41 }
0x2085   : > { %v5464_v32 = vpop.eup %5463 }
0x2086   : > { %4079 = vrot.lane.b32.xlu0 %v5464_v32, %s5511_s6  ;;  %v4166_v32 = vld [vmem:[%s6415_s3 + $0x110] sm:$0xff] }
0x2089   : > { %v5466_v37 = vpop.eup %5465 }
0x208a   : > { %4103 = vrot.lane.b32.xlu1 %v5466_v37, %s5511_s6  ;;  %v5468_v47 = vpop.eup %5467  ;;  %v4167_v37 = vld [vmem:[%s6415_s3 + $0x118] sm:$0xff] }
0x208b   : > { %v4073_v50 = vadd.f32 1.0, %v5468_v47  ;;  %v5470_v46 = vpop.eup %5469  ;;  %v5151_v41 = vpack.c.bf16 %v4167_v37, %v4166_v32  ;;  %v4144_v47 = vld [vmem:[%s6415_s3 + $0x60] sm:$0xff] }
0x208c   : > { %v4097_v53 = vadd.f32 1.0, %v5470_v46  ;;  %v4168_v46 = vld [vmem:[%s6415_s3 + $0x120] sm:$0xff] }
0x208d   : > { %5471 = vrcp.f32 %v4073_v50  ;;  %v4145_v50 = vld [vmem:[%s6415_s3 + $0x68] sm:$0xff] }
0x208e   : > { %5473 = vrcp.f32 %v4097_v53  ;;  %v4169_v53 = vld [vmem:[%s6415_s3 + $0x128] sm:$0xff] }
0x2097   : > { %v6119_v24 = vpop.eup %5471 }
0x2098   : > { %v6123_v3 = vpop.eup %5473  ;;  %v4077_v17 = vmul.f32 %v6119_v24, %v3882_v0  ;;  %v4136_v0 = vld [vmem:[%s6415_s3 + $0x20] sm:$0xff] }
0x2099   : > { %v4101_v19 = vmul.f32 %v6123_v3, %v3906_v62  ;;  %v4161_v62 = vld [vmem:[%s6415_s3 + $0xe8] sm:$0xff]  ;;  %v5178_v26 = vpack.c.bf16 %v4137_v23, %v4136_v0 }
0x209a   : > { %v5142_v40 = vpack.c.bf16 %v4161_v62, %v4160_v38  ;;  %v4177_v0 = vld [vmem:[%s6415_s3 + $0x168] sm:$0xff]  ;;  %v4154_v38 = vld [vmem:[%s6415_s3 + $0xb0] sm:$0xff]  ;;  %v4155_v62 = vld [vmem:[%s6415_s3 + $0xb8] sm:$0xff] }
0x20f8   : > { %v4080_v54 = vpop.permute.xlu0 %4079 }
0x20f9   : > { %v4082_v56 = vmul.f32 %v6119_v24, %v4080_v54  ;;  %v5190_v54 = vpack.c.bf16 %v4145_v50, %v4144_v47 }
0x20fb   : > { %4084 = vrot.lane.b32.xlu0 %v4082_v56, %s5512_s8  ;;  %v5154_v56 = vpack.c.bf16 %v4169_v53, %v4168_v46 }
0x20fc   : > { %v4104_v16 = vpop.permute.xlu1 %4103 }
0x20fd   : > { %v4106_v48 = vmul.f32 %v6123_v3, %v4104_v16  ;;  %v4146_v16 = vld [vmem:[%s6415_s3 + $0x70] sm:$0xff] }
0x20ff   : > { %4108 = vrot.lane.b32.xlu1 %v4106_v48, %s5512_s8  ;;  %v4147_v48 = vld [vmem:[%s6415_s3 + $0x78] sm:$0xff] }
0x216d   : > { %v4085_v18 = vpop.permute.xlu0 %4084 }
0x216e   : > { %v4087_v51 = vadd.f32 %v4085_v18, %v4077_v17  ;;  %v4170_v17 = vld [vmem:[%s6415_s3 + $0x130] sm:$0xff]  ;;  %v4171_v18 = vld [vmem:[%s6415_s3 + $0x138] sm:$0xff] }
0x2170   : > { %5475 = vtanh.f32 %v4087_v51  ;;  %v5193_v51 = vpack.c.bf16 %v4147_v48, %v4146_v16 }
0x2171   : > { %v4109_v20 = vpop.permute.xlu1 %4108 }
0x2172   : > { %v4111_v21 = vadd.f32 %v4109_v20, %v4101_v19  ;;  %v5157_v19 = vpack.c.bf16 %v4171_v18, %v4170_v17  ;;  %v4148_v20 = vld [vmem:[%s6415_s3 + $0x80] sm:$0xff] }
0x2174   : > { %5477 = vtanh.f32 %v4111_v21  ;;  %v4149_v21 = vld [vmem:[%s6415_s3 + $0x88] sm:$0xff] }
0x217a   : > { %v5476_v42 = vpop.eup %5475 }
0x217b   : > { %4090 = vrot.lane.b32.xlu0 %v5476_v42, %s5512_s8  ;;  %v4172_v42 = vld [vmem:[%s6415_s3 + $0x140] sm:$0xff] }
0x217e   : > { %v5478_v22 = vpop.eup %5477 }
0x217f   : > { %478 = vrot.lane.b32.xlu0 %v5737_v58, %s5514_s10  ;;  %4114 = vrot.lane.b32.xlu1 %v5478_v22, %s5512_s8  ;;  %v4173_v22 = vld [vmem:[%s6415_s3 + $0x148] sm:$0xff] }
0x2183   : > { %488 = vrot.lane.b32.xlu0 %v5741_v60, %s5514_s10  ;;  %480 = vrot.lane.b32.xlu1 %v5735_v57, %s5514_s10 }
0x2187   : > { %506 = vrot.lane.b32.xlu0 %v5737_v58, %s5515_s11  ;;  %490 = vrot.lane.b32.xlu1 %v5739_v59, %s5514_s10 }
0x218b   : > { %551 = vrot.lane.b32.xlu0 %v5735_v57, %s5515_s11  ;;  %510 = vrot.lane.b32.xlu1 %v5741_v60, %s5515_s11 }
0x218f   : > { %2673 = vrot.lane.b32.xlu0 %v5955_v45, %s5511_s6  ;;  %555 = vrot.lane.b32.xlu1 %v5739_v59, %s5515_s11  ;;  %v4156_v45 = vld [vmem:[%s6415_s3 + $0xc0] sm:$0xff]  ;;  %s5524_s11 = smov 125  }
0x2193   : > { %2883 = vrot.lane.b32.xlu0 %v5981_v39, %s5516_s12  ;;  %2049 = vrot.lane.b32.xlu1 %v5873_v11, %s5517_s13  ;;  %v4132_v11 = vld [vmem:[%s6415_s3] sm:$0xff]  ;;  %v4134_v39 = vld [vmem:[%s6415_s3 + $0x10] sm:$0xff] }
0x2197   : > { %1847 = vrot.lane.b32.xlu0 %v5850_v14, %s5512_s8  ;;  %3092 = vrot.lane.b32.xlu1 %v6007_v35, %s5518_s14  ;;  %v4133_v14 = vld [vmem:[%s6415_s3 + $0x8] sm:$0xff] }
0x219b   : > { %3300 = vrot.lane.b32.xlu0 %v6033_v28, %s5519_s20  ;;  %2461 = vrot.lane.b32.xlu1 %v5925_v7, %s5512_s8  ;;  %v5172_v7 = vpack.c.bf16 %v4133_v14, %v4132_v11  ;;  %v4135_v28 = vld [vmem:[%s6415_s3 + $0x18] sm:$0xff]  ;;  %v5196_v11 = vpack.c.bf16 %v4149_v21, %v4148_v20  ;;  %v5160_v14 = vpack.c.bf16 %v4173_v22, %v4172_v42 }
0x219d   : > { %5173 = vmatpush1.bf16.msra.mxu0 %v5172_v7  ;;  %v4151_v7 = vld [vmem:[%s6415_s3 + $0x98] sm:$0xff] }
0x219e   : > { %5174 = vmatprep.subr.bf16.mxu0 %v5508_v52 }
0x219f   : > { %3508 = vrot.lane.b32.xlu0 %v6056_v27, %s5512_s8  ;;  %2667 = vrot.lane.b32.xlu1 %v5951_v5, %s5519_s20  ;;  %v4157_v5 = vld [vmem:[%s6415_s3 + $0xc8] sm:$0xff]  ;;  %v4159_v27 = vld [vmem:[%s6415_s3 + $0xd8] sm:$0xff] }
0x21a0   : > { %v5136_v35 = vpack.c.bf16 %v4157_v5, %v4156_v45  ;;  %v4150_v45 = vld [vmem:[%s6415_s3 + $0x90] sm:$0xff] }
0x21a1   : > { %v5199_v5 = vpack.c.bf16 %v4151_v7, %v4150_v45 }
0x21a2   : > { %5137 = vmatpush1.bf16.msra.mxu1 %v5136_v35  ;;  %v4175_v35 = vld [vmem:[%s6415_s3 + $0x158] sm:$0xff] }
0x21a3   : > { %2257 = vrot.lane.b32.xlu0 %v5903_v61, %s5517_s13  ;;  %3709 = vrot.lane.b32.xlu1 %v6079_v10, %s5517_s13  ;;  %v4158_v61 = vld [vmem:[%s6415_s3 + $0xd0] sm:$0xff]  ;;  %v5175_v10 = vpack.c.bf16 %v4135_v28, %v4134_v39 }
0x21a4   : > { %v5139_v44 = vpack.c.bf16 %v4159_v27, %v4158_v61  ;;  %5138 = vmatprep.subr.bf16.mxu1 %v5508_v52  ;;  %v4174_v39 = vld [vmem:[%s6415_s3 + $0x150] sm:$0xff]  ;;  %v4152_v61 = vld [vmem:[%s6415_s3 + $0xa0] sm:$0xff]  ;;  %v4153_v27 = vld [vmem:[%s6415_s3 + $0xa8] sm:$0xff] }
0x21a5   : > { %5176 = vmatpush1.bf16.msra.mxu0 %v5175_v10  ;;  %v5163_v28 = vpack.c.bf16 %v4175_v35, %v4174_v39  ;;  %v5202_v10 = vpack.c.bf16 %v4153_v27, %v4152_v61 }
0x21a6   : > { %5140 = vmatpush1.bf16.msra.mxu1 %v5139_v44  ;;  %5177 = vmatprep.subr.bf16.mxu0 %v5508_v52  ;;  %v4176_v44 = vld [vmem:[%s6415_s3 + $0x160] sm:$0xff] }
0x21a7   : > { %3087 = vrot.lane.b32.xlu0 %v6003_v49, %s5516_s12  ;;  %2877 = vrot.lane.b32.xlu1 %v5977_v63, %s5518_s14  ;;  %v4138_v63 = vld [vmem:[%s6415_s3 + $0x30] sm:$0xff]  ;;  %v4139_v49 = vld [vmem:[%s6415_s3 + $0x38] sm:$0xff]  ;;  %v5166_v23 = vpack.c.bf16 %v4177_v0, %v4176_v44 }
0x21a8   : > { %5141 = vmatprep.subr.bf16.mxu1 %v5508_v52  ;;  %v5181_v36 = vpack.c.bf16 %v4139_v49, %v4138_v63  ;;  %v4179_v63 = vld [vmem:[%s6415_s3 + $0x178] sm:$0xff] }
0x21a9   : > { %5179 = vmatpush1.bf16.msra.mxu0 %v5178_v26  ;;  %v5205_v26 = vpack.c.bf16 %v4155_v62, %v4154_v38  ;;  %v364_v62 = vld [vmem:[%s6414_s2 + $0x30] ss:$0 sm:$0xff] }
0x21aa   : > { %5143 = vmatpush1.bf16.msra.mxu1 %v5142_v40  ;;  %5180 = vmatprep.subr.bf16.mxu0 %v5508_v52  ;;  %v4178_v40 = vld [vmem:[%s6415_s3 + $0x170] sm:$0xff] }
0x21ab   : > { %3915 = vrot.lane.b32.xlu1 %v6109_v2, %s5517_s13  ;;  %v4140_v2 = vld [vmem:[%s6415_s3 + $0x40] sm:$0xff]  ;;  %5144 = vmatprep.subr.bf16.mxu1 %v5508_v52  ;;  %v5169_v49 = vpack.c.bf16 %v4179_v63, %v4178_v40  ;;  %s5521_s13 = smov 123  }
0x21ac   : > { %v5184_v30 = vpack.c.bf16 %v4141_v6, %v4140_v2 }
0x21ad   : > { %5182 = vmatpush1.bf16.msra.mxu0 %v5181_v36 }
0x21ae   : > { %5146 = vmatpush1.bf16.msra.mxu1 %v5145_v8  ;;  %5183 = vmatprep.subr.bf16.mxu0 %v5508_v52 }
0x21af   : > { %3295 = vrot.lane.b32.xlu1 %v6029_v43, %s5511_s6  ;;  %v4142_v43 = vld [vmem:[%s6415_s3 + $0x50] sm:$0xff]  ;;  %5147 = vmatprep.subr.bf16.mxu1 %v5508_v52 }
0x21b0   : > { %v5187_v55 = vpack.c.bf16 %v4143_v33, %v4142_v43 }
0x21b1   : > { %5185 = vmatpush1.bf16.msra.mxu0 %v5184_v30 }
0x21b2   : > { %5149 = vmatpush1.bf16.msra.mxu1 %v5148_v25  ;;  %5186 = vmatprep.subr.bf16.mxu0 %v5508_v52 }
0x21b3   : > { %5150 = vmatprep.subr.bf16.mxu1 %v5508_v52 }
0x21b5   : > { %5188 = vmatpush1.bf16.msra.mxu0 %v5187_v55 }
0x21b6   : > { %5152 = vmatpush1.bf16.msra.mxu1 %v5151_v41  ;;  %5189 = vmatprep.subr.bf16.mxu0 %v5508_v52 }
0x21b7   : > { %5153 = vmatprep.subr.bf16.mxu1 %v5508_v52 }
0x21b9   : > { %5191 = vmatpush1.bf16.msra.mxu0 %v5190_v54 }
0x21ba   : > { %5155 = vmatpush1.bf16.msra.mxu1 %v5154_v56  ;;  %5192 = vmatprep.subr.bf16.mxu0 %v5508_v52 }
0x21bb   : > { %5156 = vmatprep.subr.bf16.mxu1 %v5508_v52 }
0x21bd   : > { %5194 = vmatpush1.bf16.msra.mxu0 %v5193_v51 }
0x21be   : > { %5158 = vmatpush1.bf16.msra.mxu1 %v5157_v19  ;;  %5195 = vmatprep.subr.bf16.mxu0 %v5508_v52 }
0x21bf   : > { %5159 = vmatprep.subr.bf16.mxu1 %v5508_v52 }
0x21c1   : > { %5197 = vmatpush1.bf16.msra.mxu0 %v5196_v11 }
0x21c2   : > { %5161 = vmatpush1.bf16.msra.mxu1 %v5160_v14  ;;  %5198 = vmatprep.subr.bf16.mxu0 %v5508_v52 }
0x21c3   : > { %5162 = vmatprep.subr.bf16.mxu1 %v5508_v52 }
0x21c5   : > { %5200 = vmatpush1.bf16.msra.mxu0 %v5199_v5 }
0x21c6   : > { %5201 = vmatprep.subr.bf16.mxu0 %v5508_v52  ;;  %5164 = vmatpush1.bf16.msra.mxu1 %v5163_v28 }
0x21c7   : > { %5165 = vmatprep.subr.bf16.mxu1 %v5508_v52 }
0x21c9   : > { %5203 = vmatpush1.bf16.msra.mxu0 %v5202_v10 }
0x21ca   : > { %5204 = vmatprep.subr.bf16.mxu0 %v5508_v52  ;;  %5167 = vmatpush1.bf16.msra.mxu1 %v5166_v23 }
0x21cb   : > { %5168 = vmatprep.subr.bf16.mxu1 %v5508_v52 }
0x21cd   : > { %5206 = vmatpush1.bf16.msra.mxu0 %v5205_v26  ;;  %v365_v26 = vld [vmem:[%s6414_s2 + $0x31] ss:$0 sm:$0xff] }
0x21ce   : > { %5170 = vmatpush1.bf16.msra.mxu1 %v5169_v49 }
0x21ed   : > { %v4091_v4 = vpop.permute.xlu0 %4090 }
0x21ee   : > { %v4093_v29 = vmul.f32 %v6119_v24, %v4091_v4 }
0x21f0   : > { %4119 = vrot.lane.b32.xlu0 %v4093_v29, %s5512_s8 }
0x21f1   : > { %v479_v36 = vpop.permute.xlu0 %478  ;;  %v4115_v8 = vpop.permute.xlu1 %4114 }
0x21f2   : > { %v4117_v2 = vmul.f32 %v6123_v3, %v4115_v8  ;;  %v484_v12 = vmul.f32 %v479_v36, %v5737_v58  ;;  %v498_v31 = vmul.f32 %v479_v36, %v5741_v60 }
0x21f4   : > { %4124 = vrot.lane.b32.xlu0 %v4117_v2, %s5513_s9 }
0x21f5   : > { %v489_v52 = vpop.permute.xlu0 %488  ;;  %v481_v6 = vpop.permute.xlu1 %480 }
0x21f6   : > { %v494_v30 = vmul.f32 %v489_v52, %v5741_v60  ;;  %v500_v25 = vmul.f32 %v489_v52, %v5737_v58  ;;  %v485_v37 = vmul.f32 %v5735_v57, %v481_v6  ;;  %v499_v3 = vmul.f32 %v5739_v59, %v481_v6 }
0x21f8   : > { %v496_v43 = vadd.f32 %v494_v30, %v484_v12  ;;  %v502_v24 = vsub.f32 %v498_v31, %v500_v25 }
0x21f9   : > { %v507_v33 = vpop.permute.xlu0 %506  ;;  %v491_v32 = vpop.permute.xlu1 %490 }
0x21fa   : > { %v495_v55 = vmul.f32 %v5739_v59, %v491_v32  ;;  %v501_v41 = vmul.f32 %v5735_v57, %v491_v32 }
0x21fc   : > { %v497_v47 = vadd.f32 %v495_v55, %v485_v37  ;;  %v503_v50 = vsub.f32 %v499_v3, %v501_v41  ;;  %v5479_v41 = vld [vmem:[%s5645_s7] sm:$0xff] }
0x21fd   : > { %v552_v46 = vpop.permute.xlu0 %551  ;;  %v511_v53 = vpop.permute.xlu1 %510 }
0x21fe   : > { %v504_v54 = vadd.f32 %v497_v47, %v496_v43  ;;  %v505_v60 = vadd.f32 %v503_v50, %v502_v24 }
0x2200   : > { %v509_v58 = vmul.f32 %v507_v33, %v504_v54  ;;  %v516_v56 = vmul.f32 %v507_v33, %v505_v60  ;;  %v513_v16 = vmul.f32 %v511_v53, %v505_v60  ;;  %v515_v48 = vmul.f32 %v511_v53, %v504_v54 }
0x2201   : > { %v2674_v17 = vpop.permute.xlu0 %2673  ;;  %v556_v18 = vpop.permute.xlu1 %555  ;;  %v554_v51 = vmul.f32 %v552_v46, %v504_v54  ;;  %v561_v19 = vmul.f32 %v552_v46, %v505_v60 }
0x2202   : > { %2677 = vst.msk [vmem:[#allocation2 + $0x10] sm:$0xff] %vm2676_vm7, %v2674_v17  ;;  %v558_v59 = vmul.f32 %v556_v18, %v505_v60  ;;  %v560_v20 = vmul.f32 %v556_v18, %v504_v54  ;;  %v514_v57 = vsub.f32 %v509_v58, %v513_v16  ;;  %v517_v21 = vadd.f32 %v516_v56, %v515_v48 }
0x2204   : > { %v559_v42 = vsub.f32 %v554_v51, %v558_v59  ;;  %v562_v22 = vadd.f32 %v561_v19, %v560_v20  ;;  %524 = vrot.lane.b32.xlu0 %v517_v21, %s5514_s10  ;;  %519 = vrot.lane.b32.xlu1 %v514_v57, %s5514_s10  ;;  %v5480_v20 = vld [vmem:[%s5645_s7 + $0x8] sm:$0xff] }
0x2205   : > { %v2884_v11 = vpop.permute.xlu0 %2883  ;;  %v2050_v14 = vpop.permute.xlu1 %2049 }
0x2206   : > { %2887 = vst.msk [vmem:[#allocation2 + $0x10] sm:$0xff] %vm2886_vm8, %v2884_v11 }
0x2207   : > { %2053 = vst.msk [vmem:[#allocation2] sm:$0xff] %vm2052_vm9, %v2050_v14  ;;  %v5482_v14 = vld [vmem:[%s5645_s7 + $0x10] sm:$0xff] }
0x2208   : > { %2255 = vst.msk [vmem:[#allocation2] sm:$0xff] %vm2054_vm10, %v5899_v9  ;;  %569 = vrot.lane.b32.xlu0 %v562_v22, %s5514_s10  ;;  %564 = vrot.lane.b32.xlu1 %v559_v42, %s5514_s10  ;;  %v5481_v22 = vld [vmem:[%s5645_s7 + $0x18] sm:$0xff]  ;;  %s4420_s7 = sshll.u32 %s6424_s18, 3 }
0x2209   : > { %v1848_v45 = vpop.permute.xlu0 %1847  ;;  %v3093_v7 = vpop.permute.xlu1 %3092  ;;  %s351_s6 = scalar_lea.vmem %s6416_s4, %s4420_s7 }
0x220a   : > { %1851 = vst.msk [vmem:[#allocation2 + $0x18] sm:$0xff] %vm1850_vm11, %v1848_v45 }
0x220b   : > { %3095 = vst.msk [vmem:[#allocation2 + $0x10] sm:$0xff] %vm2880_vm12, %v3093_v7  ;;  %v369_v7 = vld [vmem:[%s6414_s2 + $0x50] ss:$0 sm:$0xff] }
0x220c   : > { %2055 = vst.msk [vmem:[#allocation2 + $0x18] sm:$0xff] %vm2054_vm10, %v5877_v13 }
0x220d   : > { %v3301_v5 = vpop.permute.xlu0 %3300  ;;  %v2462_v39 = vpop.permute.xlu1 %2461 }
0x220e   : > { %3303 = vst.msk [vmem:[#allocation2 + $0x10] sm:$0xff] %vm2670_vm13, %v3301_v5 }
0x220f   : > { %2464 = vst.msk [vmem:[#allocation2] sm:$0xff] %vm1850_vm11, %v2462_v39 }
0x2211   : > { %v3509_v9 = vpop.permute.xlu0 %3508  ;;  %v2668_v35 = vpop.permute.xlu1 %2667 }
0x2212   : > { %3511 = vst.msk [vmem:[#allocation2 + $0x10] sm:$0xff] %vm1850_vm11, %v3509_v9 }
0x2213   : > { %2671 = vst.msk [vmem:[#allocation2] sm:$0xff] %vm2670_vm13, %v2668_v35  ;;  %v4586_v35 = vld [vmem:[%s5622_s30 + $0x38] sm:$0xff] }
0x2214   : > { %3713 = vst.msk [vmem:[#allocation2 + $0x10] sm:$0xff] %vm2054_vm10, %v6083_v15 }
0x2215   : > { %v2258_v28 = vpop.permute.xlu0 %2257  ;;  %v3710_v61 = vpop.permute.xlu1 %3709 }
0x2216   : > { %2260 = vst.msk [vmem:[#allocation2 + $0x18] sm:$0xff] %vm2052_vm9, %v2258_v28  ;;  %3712 = vst.msk [vmem:[#allocation2 + $0x8] sm:$0xff] %vm2052_vm9, %v3710_v61 }
0x2217   : > { %2469 = vst.msk [vmem:[#allocation2 + $0x18] sm:$0xff] %vm1361_vm6, %v5935_v1 }
0x2218   : > { %3913 = vst.msk [vmem:[#allocation2 + $0x8] sm:$0xff] %vm2054_vm10, %v6105_v34 }
0x2219   : > { %v3088_v13 = vpop.permute.xlu0 %3087  ;;  %v2878_v27 = vpop.permute.xlu1 %2877 }
0x221a   : > { %2881 = vst.msk [vmem:[#allocation2] sm:$0xff] %vm2880_vm12, %v2878_v27 }
0x221b   : > { %3090 = vst.msk [vmem:[#allocation2] sm:$0xff] %vm2886_vm8, %v3088_v13 }
0x221d   : > { %v3916_v15 = vpop.permute.xlu1 %3915 }
0x221e   : > { %3918 = vst.msk [vmem:[#allocation2 + $0x10] sm:$0xff] %vm2052_vm9, %v3916_v15  ;;  %v4131_v10 = vld [vmem:[#allocation2 + $0x18] sm:$0xff] }
0x221f   : > { %4584 = vmatprep.mubr.msk.f32.mxu1 %vm4180_vm14, %v4131_v10 }
0x2221   : > { %v3296_v44 = vpop.permute.xlu1 %3295 }
0x2222   : > { %3298 = vst.msk [vmem:[#allocation2] sm:$0xff] %vm2676_vm7, %v3296_v44 }
0x2229   : > { %v4128_v23 = vld [vmem:[#allocation2] sm:$0xff] }
0x2262   : > { %v4120_v0 = vpop.permute.xlu0 %4119 }
0x2263   : > { %4122 = vst.msk [vmem:[#allocation2 + $0x8] sm:$0xff] %vm1850_vm11, %v4120_v0 }
0x2266   : > { %v4125_v1 = vpop.permute.xlu0 %4124 }
0x2267   : > { %4127 = vst.msk [vmem:[#allocation2 + $0x10] sm:$0xff] %vm1361_vm6, %v4125_v1 }
0x226a   : > { %v4129_v34 = vld [vmem:[#allocation2 + $0x8] sm:$0xff] }
0x226b   : > { %4585 = vmatprep.mubr.msk.f32.mxu0 %vm4180_vm14, %v4129_v34 }
0x226c   : > { %4322 = vmatmul.mubr.f32.vlgmr.msra.gmra.mrb[62].mxu0 %v4128_v23 }
0x226e   : > { %v4130_v38 = vld [vmem:[#allocation2 + $0x10] sm:$0xff] }
0x226f   : > { %4249 = vmatmul.mubr.f32.vlgmr.msra.gmra.mrb[26].mxu1 %v4130_v38 }
0x2276   : > { %v525_v40 = vpop.permute.xlu0 %524  ;;  %v520_v63 = vpop.permute.xlu1 %519 }
0x2277   : > { %v527_v49 = vmul.f32 %v525_v40, %v365_v26  ;;  %v522_v4 = vmul.f32 %v520_v63, %v364_v62  ;;  %v533_v36 = vmul.f32 %v525_v40, %v364_v62  ;;  %v534_v8 = vmul.f32 %v520_v63, %v365_v26 }
0x2279   : > { %v528_v29 = vsub.f32 %v522_v4, %v527_v49  ;;  %v535_v37 = vadd.f32 %v534_v8, %v533_v36 }
0x227a   : > { %v570_v2 = vpop.permute.xlu0 %569  ;;  %v565_v52 = vpop.permute.xlu1 %564 }
0x227b   : > { %v572_v6 = vmul.f32 %v570_v2, %v365_v26  ;;  %v577_v12 = vmul.f32 %v570_v2, %v364_v62  ;;  %v567_v31 = vmul.f32 %v565_v52, %v364_v62  ;;  %v578_v30 = vmul.f32 %v565_v52, %v365_v26 }
0x227c   : > { %v530_v25 = vsel %vm529_vm15, %v528_v29, 0.0  ;;  %v536_v3 = vsel %vm529_vm15, %v535_v37, 0.0 }
0x227d   : > { %531 = vadd.xlane.f32.xlu1 %v530_v25  ;;  %v579_v43 = vadd.f32 %v578_v30, %v577_v12  ;;  %v573_v24 = vsub.f32 %v567_v31, %v572_v6 }
0x227f   : > { %v580_v33 = vsel %vm529_vm15, %v579_v43, 0.0  ;;  %v574_v32 = vsel %vm529_vm15, %v573_v24, 0.0 }
0x2280   : > { %575 = vadd.xlane.f32.xlu0 %v574_v32 }
0x2281   : > { %581 = vadd.xlane.f32.xlu1 %v580_v33 }
0x2284   : > { %537 = vadd.xlane.f32.xlu0 %v536_v3 }
0x230a   : > { %v532_v55 = vpop.xlane.xlu1 %531 }
0x230b   : > { %v539_v47 = vmul.f32 %v5479_v41, %v532_v55 }
0x230d   : > { %541 = vrot.lane.b32.xlu0 %v539_v47, %s5520_s28  ;;  %v576_v50 = vpop.xlane.xlu0 %575 }
0x230e   : > { %v583_v46 = vmul.f32 %v5479_v41, %v576_v50  ;;  %v582_v53 = vpop.xlane.xlu1 %581 }
0x230f   : > { %v589_v54 = vmul.f32 %v5479_v41, %v582_v53 }
0x2310   : > { %585 = vrot.lane.b32.xlu1 %v583_v46, %s5520_s28 }
0x2311   : > { %591 = vrot.lane.b32.xlu0 %v589_v54, %s5520_s28  ;;  %v538_v60 = vpop.xlane.xlu0 %537 }
0x2312   : > { %v545_v58 = vmul.f32 %v5479_v41, %v538_v60 }
0x2314   : > { %547 = vrot.lane.b32.xlu1 %v545_v58, %s5520_s28 }
0x233f   : > { %v4323_v56 = vpop.f32.mrb[62].mxu0 }
0x2340   : > { %v4325_v16 = vpop.f32.mrb[63].mxu0 }
0x2342   : > { %v4250_v48 = vpop.f32.mrb[26].mxu1 }
0x2343   : > { %v4324_v17 = vadd.f32 %v4323_v56, %v4250_v48  ;;  %v4252_v18 = vpop.f32.mrb[27].mxu1 }
0x2345   : > { %v4327_v9 = vadd.f32 %v4324_v17, %v369_v7 }
0x2347   : > { %v4330_v27 = vadd.f32 %v4586_v35, %v4327_v9 }
0x237f   : > { %v542_v51 = vpop.permute.xlu0 %541 }
0x2380   : > { %v544_v19 = vadd.f32 %v5479_v41, %v542_v51 }
0x2382   : > { %596 = vrot.lane.b32.xlu1 %v544_v19, %s5521_s13  ;;  %v586_v59 = vpop.permute.xlu1 %585 }
0x2383   : > { %v588_v57 = vadd.f32 %v5480_v20, %v586_v59  ;;  %v592_v21 = vpop.permute.xlu0 %591 }
0x2384   : > { %v594_v11 = vadd.f32 %v5481_v22, %v592_v21 }
0x2385   : > { %600 = vrot.lane.b32.xlu0 %v588_v57, %s5522_s29 }
0x2386   : > { %v548_v42 = vpop.permute.xlu1 %547 }
0x2387   : > { %v550_v45 = vadd.f32 %v5482_v14, %v548_v42 }
0x2389   : > { %608 = vrot.lane.b32.xlu0 %v594_v11, %s5523_s5  ;;  %604 = vrot.lane.b32.xlu1 %v550_v45, %s5524_s11 }
0x23f4   : > { %v597_v5 = vpop.permute.xlu1 %596 }
0x23f7   : > { %v601_v39 = vpop.permute.xlu0 %600 }
0x23f8   : > { %v612_v28 = vsel %vm611_vm0, %v597_v5, %v601_v39 }
0x23fb   : > { %v609_v61 = vpop.permute.xlu0 %608  ;;  %v605_v13 = vpop.permute.xlu1 %604 }
0x23fc   : > { %v614_v15 = vsel %vm613_vm2, %v612_v28, %v605_v13 }
0x23fd   : > { %v616_v10 = vsel %vm615_vm3, %v614_v15, %v609_v61 }
0x23fe   : > { %v4331_v44 = vadd.f32 %v4330_v27, %v616_v10 }
0x2400   : > { %v4332_v0 = vsub.f32 %v4331_v44, %v4586_v35 }
0x2402   : > { %4333 = vst.msk [vmem:[%s351_s6] sm:$0xff] %vm644_vm1, %v4332_v0 }
0x2403 PF: > { %p11_p9 = scmp.ge.s32.totalorder %s5567_s19, 4   ;;  %s6420_s15 = smov %s5501_s16 }
0x2404   : > { %s6421_s16 = smov %s5576_s22  ;;  %s6422_s17 = smov %s5567_s19 }
0x2405   :  { %13 = sbr.rel (!%p11_p9) target bundleno = 2 (0x2), region = 159 }

</bundles_post_ra>
